<compile_context>
chip_gen: v5e
topology: v5e:2x2
jax: 0.10.0
libtpu: 0.0.40
codegen_flags: <defaults>
</compile_context>

<pallas_src>
import jax
import jax.numpy as jnp
from jax import lax
from jax.experimental import pallas as pl
from jax.experimental.pallas import tpu as pltpu


def classifier_kernel(emb_ref, len_ref,
                      w_ih_t_ref, w_hh_t_ref, b_gates_ref,
                      w_att_ref, b_att_ref,
                      w_comb_ref, b_comb_ref,
                      logits_ref, attn_ref,
                      gates_ref, outs_ref):
    T, Bt, H = outs_ref.shape

    lengths = len_ref[...]                       # (Bt, 1) int32
    w_hh_t = w_hh_t_ref[...]                     # (H, 4H) bf16

    # ---- Hoisted input projection: ONE flattened bf16 MXU matmul.
    # emb rows are laid out row = t*Bt + j, so the result lands directly in the
    # 2D gates scratch with no reshape.
    gates_ref[...] = (
        jnp.dot(emb_ref[...], w_ih_t_ref[...],
                preferred_element_type=jnp.float32) + b_gates_ref[...])

    # ---- LSTM recurrence (PyTorch gate order i, f, g, o).  Only the h @ W_hh
    # dot and the gate math sit on the serial critical path.
    # TODO(synk): hold W_hh resident in the MXU via matmul_push_rhs/acc_lhs/pop
    # when H/4H fit the MXU tile; jnp.dot kept for portability.
    # TODO(synk): at production sizes make H (and D) multiples of 128 so each
    # gate slice below is whole vregs instead of sub-128 lane slices.
    def step(t, carry):
        h, c = carry
        row0 = pl.multiple_of(t * Bt, Bt)
        gates = gates_ref[pl.ds(row0, Bt), :] + jnp.dot(
            h.astype(jnp.bfloat16), w_hh_t, preferred_element_type=jnp.float32)
        i_g = jax.nn.sigmoid(gates[:, 0 * H:1 * H])
        f_g = jax.nn.sigmoid(gates[:, 1 * H:2 * H])
        g_g = jnp.tanh(gates[:, 2 * H:3 * H])
        o_g = jax.nn.sigmoid(gates[:, 3 * H:4 * H])
        c_new = f_g * c + i_g * g_g
        h_new = o_g * jnp.tanh(c_new)
        valid = t < lengths                              # (Bt, 1) bool
        outs_ref[t] = jnp.where(valid, h_new, 0.0)       # pad_packed -> zeros
        return (jnp.where(valid, h_new, h),              # freeze state past len
                jnp.where(valid, c_new, c))

    h0 = jnp.zeros((Bt, H), jnp.float32)
    c0 = jnp.zeros((Bt, H), jnp.float32)
    lax.fori_loop(0, T, step, (h0, c0), unroll=min(8, T))

    outs = outs_ref[...]                                 # (T, Bt, H) f32

    # ---- SelfAttention (layers=1): tanh(Linear(H,1)) scores via VPU reduce,
    # lane-dense (Bt, T) softmax, length mask, renormalize.
    w_att_b = w_att_ref[...][None, :, :]                 # (1, 1, H)
    u = jnp.tanh(jnp.sum(outs * w_att_b, axis=-1) + b_att_ref[...])   # (T, Bt)
    scores = u.T                                         # (Bt, T) lane-dense

    t_lane = lax.broadcasted_iota(jnp.int32, (Bt, T), 1)
    mask = t_lane < lengths                              # (Bt, T) bool

    s = scores - jnp.max(scores, axis=-1, keepdims=True)
    e = jnp.where(mask, jnp.exp(s), 0.0)
    denom = jnp.maximum(jnp.sum(e, axis=-1, keepdims=True), 1e-9)  # len==0 guard
    attn_bt = e / denom                                  # (Bt, T)
    attn_ref[...] = attn_bt

    rep = jnp.sum(outs * attn_bt.T[:, :, None], axis=0)  # (Bt, H)

    # ---- Folded extralinear -> dropout(identity, eval) -> output ----
    logits_ref[...] = (jnp.dot(rep, w_comb_ref[...],
                               preferred_element_type=jnp.float32)
                       + b_comb_ref[...])


def _vmem_bytes(b_tile, T, D, H, O, weight_bufs=2):
    """Rough per-tile VMEM footprint estimate (ignores lane/sublane padding)."""
    bf2, f4 = 2, 4
    emb = 2 * T * b_tile * D * bf2                        # double-buffered input
    lens = 2 * b_tile * f4
    gates = T * b_tile * 4 * H * f4                       # scratch
    outs = T * b_tile * H * f4                            # scratch
    outputs = 2 * (b_tile * O + b_tile * T) * f4
    weights = weight_bufs * ((D * 4 * H + H * 4 * H) * bf2
                             + (4 * H + H + 1 + H * O + O) * f4)
    return emb + lens + gates + outs + outputs + weights


def _pick_b_tile(B, T, D, H, O, budget_bytes=24 << 20):
    cands = [c for c in range(8, B + 1, 8) if B % c == 0]
    if not cands:
        return B                                          # tiny batch: one tile
    # Prefer >=2 tiles so v7x's two TensorCores both get work (and the pipeline
    # has something to overlap the emb DMA with), then largest tile that fits.
    multi = [c for c in cands if B // c >= 2] or cands
    fits = [c for c in multi if _vmem_bytes(c, T, D, H, O) <= budget_bytes]
    return max(fits) if fits else min(multi)


def classifier_forward(x_ids, lengths, params, b_tile=None):
    emb_table = params["emb_table"]
    B, T = x_ids.shape
    D = emb_table.shape[1]
    H = params["w_hh"].shape[1]
    E = params["w_ex"].shape[0]
    O = params["w_out"].shape[0]

    if not (b_tile is not None and 0 < b_tile <= B and B % b_tile == 0
            and (b_tile % 8 == 0 or b_tile == B)):
        b_tile = _pick_b_tile(B, T, D, H, O)
    n_btiles = B // b_tile

    # Embed (eval mode: noise/dropout disabled).  Gather straight into the
    # per-tile layout the kernel consumes (row = t*b_tile + j); only the tiny
    # int32 id matrix gets permuted.  bf16 halves the HBM round trip and feeds
    # the MXU directly.
    # TODO(synk): move this gather into the kernel (scalar-prefetched ids +
    # manual embedding-row DMAs) to drop the HBM round trip entirely.
    ids_tiles = (x_ids.reshape(n_btiles, b_tile, T)
                 .transpose(0, 2, 1).reshape(n_btiles, T * b_tile))
    emb = jnp.take(emb_table.astype(jnp.bfloat16), ids_tiles, axis=0)

    len_col = lengths.astype(jnp.int32).reshape(B, 1)

    w_ih_t = params["w_ih"].T.astype(jnp.bfloat16)                  # (D, 4H)
    w_hh_t = params["w_hh"].T.astype(jnp.bfloat16)                  # (H, 4H)
    b_gates = (params["b_ih"] + params["b_hh"]).reshape(1, 4 * H).astype(jnp.float32)
    w_att = params["w_att"].reshape(1, H).astype(jnp.float32)
    b_att = params["b_att"].reshape(1, 1).astype(jnp.float32)
    # Fold extralinear + output (eval-only: dropout identity, no nonlinearity).
    w_ex_t = params["w_ex"].T.astype(jnp.float32)                   # (H, E)
    w_out_t = params["w_out"].T.astype(jnp.float32)                 # (E, O)
    w_comb = jnp.dot(w_ex_t, w_out_t)                               # (H, O)
    b_comb = (jnp.dot(params["b_ex"].reshape(1, E).astype(jnp.float32), w_out_t)
              + params["b_out"].reshape(1, O).astype(jnp.float32))

    footprint = _vmem_bytes(b_tile, T, D, H, O)
    vmem_limit = int(min(48 << 20, max(32 << 20, footprint + footprint // 4)))

    out_shape = (jax.ShapeDtypeStruct((B, O), jnp.float32),
                 jax.ShapeDtypeStruct((B, T), jnp.float32))

    def _call(single_buffer_weights):
        def wspec(shape):
            nd = len(shape)
            index_map = lambda b, _nd=nd: (0,) * _nd
            if single_buffer_weights:
                return pl.BlockSpec(shape, index_map,
                                    pipeline_mode=pl.Buffered(1))
            return pl.BlockSpec(shape, index_map)

        in_specs = [
            pl.BlockSpec((None, T * b_tile, D), lambda b: (b, 0, 0)),   # emb
            pl.BlockSpec((b_tile, 1), lambda b: (b, 0)),                # lengths
            wspec(w_ih_t.shape), wspec(w_hh_t.shape), wspec(b_gates.shape),
            wspec(w_att.shape), wspec(b_att.shape),
            wspec(w_comb.shape), wspec(b_comb.shape),
        ]
        out_specs = (pl.BlockSpec((b_tile, O), lambda b: (b, 0)),
                     pl.BlockSpec((b_tile, T), lambda b: (b, 0)))
        grid_spec = pltpu.PrefetchScalarGridSpec(
            num_scalar_prefetch=0,
            grid=(n_btiles,),
            in_specs=in_specs,
            out_specs=out_specs,
            scratch_shapes=[pltpu.VMEM((T * b_tile, 4 * H), jnp.float32),  # gates
                            pltpu.VMEM((T, b_tile, H), jnp.float32)])      # lstm outs
        return pl.pallas_call(
            classifier_kernel,
            grid_spec=grid_spec,
            out_shape=out_shape,
            compiler_params=pltpu.CompilerParams(
                dimension_semantics=("parallel",),
                vmem_limit_bytes=vmem_limit),
        )(emb, len_col, w_ih_t, w_hh_t, b_gates, w_att, b_att, w_comb, b_comb)

    if hasattr(pl, "Buffered"):
        try:
            return _call(True)
        except Exception:
            pass  # pl.Buffered(1) unsupported in this build -> default buffering
    return _call(False)


def init_params(key, vocab=32, embed_dim=32, hidden=32, extralinear=64, out_size=1):
    ks = jax.random.split(key, 11)

    def nrm(k, shape, scale=0.1):
        return (scale * jax.random.normal(k, shape)).astype(jnp.float32)

    return dict(
        emb_table=nrm(ks[0], (vocab, embed_dim), 1.0),
        w_ih=nrm(ks[1], (4 * hidden, embed_dim)),
        w_hh=nrm(ks[2], (4 * hidden, hidden)),
        b_ih=nrm(ks[3], (4 * hidden,)),
        b_hh=nrm(ks[4], (4 * hidden,)),
        w_att=nrm(ks[5], (1, hidden)),
        b_att=nrm(ks[6], (1,)),
        w_ex=nrm(ks[7], (extralinear, hidden)),
        b_ex=nrm(ks[8], (extralinear,)),
        w_out=nrm(ks[9], (out_size, extralinear)),
        b_out=nrm(ks[10], (out_size,)),
    )


if __name__ == "__main__":
    key = jax.random.PRNGKey(0)
    k_par, k_x1, k_len1, k_x2, k_len2 = jax.random.split(key, 5)

    V, D, H, E, O = 32, 32, 32, 64, 1
    params = init_params(k_par, vocab=V, embed_dim=D, hidden=H,
                         extralinear=E, out_size=O)

    # TODO(synk): concat_repr=True branch (data-dependent gather of the hidden
    # state at the token-id==4 position, plus host-side prints) not implemented.

    # Config 1: tiny batch -> single full-batch tile (grid of 1).
    B, T = 4, 8
    x_ids = jax.random.randint(k_x1, (B, T), 0, V)
    lengths = jax.random.randint(k_len1, (B,), 1, T + 1)
    logits, attentions = classifier_forward(x_ids, lengths, params)
    jax.block_until_ready((logits, attentions))
    assert logits.shape == (B, O) and attentions.shape == (B, T)
    assert bool(jnp.all(jnp.isfinite(logits)))
    assert bool(jnp.allclose(attentions.sum(-1), 1.0, atol=1e-3))

    # Config 2: larger batch -> exercises the multi-tile "parallel" grid path.
    B2 = 16
    x_ids2 = jax.random.randint(k_x2, (B2, T), 0, V)
    lengths2 = jax.random.randint(k_len2, (B2,), 1, T + 1)
    logits2, attentions2 = classifier_forward(x_ids2, lengths2, params)
    jax.block_until_ready((logits2, attentions2))
    assert logits2.shape == (B2, O) and attentions2.shape == (B2, T)
    assert bool(jnp.all(jnp.isfinite(logits2)))
    assert bool(jnp.allclose(attentions2.sum(-1), 1.0, atol=1e-3))

    print("KERNEL_OK")
</pallas_src>

<mosaic_0001>
module attributes {stable_mosaic.version = 11 : i64} {
  func.func @classifier_kernel(%arg0: i32, %arg1: memref<1x32x32xbf16, #tpu.memory_space<vmem>>, %arg2: memref<4x1xi32, #tpu.memory_space<vmem>>, %arg3: memref<32x128xbf16, #tpu.memory_space<vmem>>, %arg4: memref<32x128xbf16, #tpu.memory_space<vmem>>, %arg5: memref<1x128xf32, #tpu.memory_space<vmem>>, %arg6: memref<1x32xf32, #tpu.memory_space<vmem>>, %arg7: memref<1x1xf32, #tpu.memory_space<vmem>>, %arg8: memref<32x1xf32, #tpu.memory_space<vmem>>, %arg9: memref<1x1xf32, #tpu.memory_space<vmem>>, %arg10: memref<4x1xf32, #tpu.memory_space<vmem>>, %arg11: memref<4x8xf32, #tpu.memory_space<vmem>>, %arg12: memref<32x128xf32, #tpu.memory_space<vmem>>, %arg13: memref<8x4x32xf32, #tpu.memory_space<vmem>>) attributes {dimension_semantics = [#tpu.dimension_semantics<parallel>], iteration_bounds = array<i64: 1>, scalar_prefetch = 0 : i64, scratch_operands = 2 : i64, tpu.core_type = #tpu.core_type<tc>, window_params = [{transform_indices = @transform_0, window_bounds = array<i64: 1, 32, 32>}, {transform_indices = @transform_1, window_bounds = array<i64: 4, 1>}, {pipeline_mode = #tpu.pipeline_mode<synchronous>, transform_indices = @transform_2, window_bounds = array<i64: 32, 128>}, {pipeline_mode = #tpu.pipeline_mode<synchronous>, transform_indices = @transform_3, window_bounds = array<i64: 32, 128>}, {pipeline_mode = #tpu.pipeline_mode<synchronous>, transform_indices = @transform_4, window_bounds = array<i64: 1, 128>}, {pipeline_mode = #tpu.pipeline_mode<synchronous>, transform_indices = @transform_5, window_bounds = array<i64: 1, 32>}, {pipeline_mode = #tpu.pipeline_mode<synchronous>, transform_indices = @transform_6, window_bounds = array<i64: 1, 1>}, {pipeline_mode = #tpu.pipeline_mode<synchronous>, transform_indices = @transform_7, window_bounds = array<i64: 32, 1>}, {pipeline_mode = #tpu.pipeline_mode<synchronous>, transform_indices = @transform_8, window_bounds = array<i64: 1, 1>}, {transform_indices = @transform_9, window_bounds = array<i64: 4, 1>}, {transform_indices = @transform_10, window_bounds = array<i64: 4, 8>}]} {
    %c0 = arith.constant 0 : index
    %c0_0 = arith.constant 0 : index
    %0 = vector.load %arg2[%c0, %c0_0] : memref<4x1xi32, #tpu.memory_space<vmem>>, vector<4x1xi32>
    %c0_1 = arith.constant 0 : index
    %c0_2 = arith.constant 0 : index
    %1 = vector.load %arg4[%c0_1, %c0_2] : memref<32x128xbf16, #tpu.memory_space<vmem>>, vector<32x128xbf16>
    %c0_3 = arith.constant 0 : index
    %c0_4 = arith.constant 0 : index
    %c0_5 = arith.constant 0 : index
    %2 = vector.load %arg1[%c0_3, %c0_4, %c0_5] : memref<1x32x32xbf16, #tpu.memory_space<vmem>>, vector<1x32x32xbf16>
    %3 = vector.shape_cast %2 : vector<1x32x32xbf16> to vector<32x32xbf16>
    %c0_6 = arith.constant 0 : index
    %c0_7 = arith.constant 0 : index
    %4 = vector.load %arg3[%c0_6, %c0_7] : memref<32x128xbf16, #tpu.memory_space<vmem>>, vector<32x128xbf16>
    %cst = arith.constant dense<0.000000e+00> : vector<32x128xf32>
    %5 = tpu.matmul %3, %4, %cst {dimension_numbers = #tpu.dot_dimension_numbers<[1], [0], [0], [1], [0, 0, 1, 1], [], []>} : vector<32x32xbf16>, vector<32x128xbf16>, vector<32x128xf32> -> vector<32x128xf32>
    %c0_8 = arith.constant 0 : index
    %c0_9 = arith.constant 0 : index
    %6 = vector.load %arg5[%c0_8, %c0_9] : memref<1x128xf32, #tpu.memory_space<vmem>>, vector<1x128xf32>
    %7 = vector.broadcast %6 : vector<1x128xf32> to vector<32x128xf32>
    %8 = arith.addf %5, %7 : vector<32x128xf32>
    %c0_10 = arith.constant 0 : index
    %c0_11 = arith.constant 0 : index
    %9 = vector.load %arg12[%c0_10, %c0_11] : memref<32x128xf32, #tpu.memory_space<vmem>>, vector<32x128xf32>
    tpu.vector_store %arg12[%c0_10, %c0_11], %8 {strides = array<i32>} : memref<32x128xf32, #tpu.memory_space<vmem>>, vector<32x128xf32>,
    %cst_12 = arith.constant 0.000000e+00 : f32
    %10 = vector.broadcast %cst_12 : f32 to vector<4x32xf32>
    %cst_13 = arith.constant 0.000000e+00 : f32
    %11 = vector.broadcast %cst_13 : f32 to vector<4x32xf32>
    %c0_i32 = arith.constant 0 : i32
    %c4_i32 = arith.constant 4 : i32
    %12 = arith.muli %c0_i32, %c4_i32 : i32
    %13 = tpu.assume_multiple %12, 4 : i32
    %14 = arith.index_cast %13 : i32 to index
    %c0_14 = arith.constant 0 : index
    %15 = vector.load %arg12[%14, %c0_14] : memref<32x128xf32, #tpu.memory_space<vmem>>, vector<4x128xf32>
    %16 = arith.truncf %10 : vector<4x32xf32> to vector<4x32xbf16>
    %cst_15 = arith.constant dense<0.000000e+00> : vector<4x128xf32>
    %17 = tpu.matmul %16, %1, %cst_15 {dimension_numbers = #tpu.dot_dimension_numbers<[1], [0], [0], [1], [0, 0, 1, 1], [], []>} : vector<4x32xbf16>, vector<32x128xbf16>, vector<4x128xf32> -> vector<4x128xf32>
    %18 = arith.addf %15, %17 : vector<4x128xf32>
    %19 = vector.extract_strided_slice %18 {offsets = [0, 0], sizes = [4, 32], strides = [1, 1]} : vector<4x128xf32> to vector<4x32xf32>
    %20 = arith.negf %19 : vector<4x32xf32>
    %21 = math.exp %20 : vector<4x32xf32>
    %cst_16 = arith.constant 1.000000e+00 : f32
    %22 = vector.broadcast %cst_16 : f32 to vector<4x32xf32>
    %23 = arith.addf %22, %21 : vector<4x32xf32>
    %24 = arith.divf %22, %23 : vector<4x32xf32>
    %25 = vector.extract_strided_slice %18 {offsets = [0, 32], sizes = [4, 32], strides = [1, 1]} : vector<4x128xf32> to vector<4x32xf32>
    %26 = arith.negf %25 : vector<4x32xf32>
    %27 = math.exp %26 : vector<4x32xf32>
    %cst_17 = arith.constant 1.000000e+00 : f32
    %28 = vector.broadcast %cst_17 : f32 to vector<4x32xf32>
    %29 = arith.addf %28, %27 : vector<4x32xf32>
    %30 = arith.divf %28, %29 : vector<4x32xf32>
    %31 = vector.extract_strided_slice %18 {offsets = [0, 64], sizes = [4, 32], strides = [1, 1]} : vector<4x128xf32> to vector<4x32xf32>
    %32 = math.tanh %31 : vector<4x32xf32>
    %33 = vector.extract_strided_slice %18 {offsets = [0, 96], sizes = [4, 32], strides = [1, 1]} : vector<4x128xf32> to vector<4x32xf32>
    %34 = arith.negf %33 : vector<4x32xf32>
    %35 = math.exp %34 : vector<4x32xf32>
    %cst_18 = arith.constant 1.000000e+00 : f32
    %36 = vector.broadcast %cst_18 : f32 to vector<4x32xf32>
    %37 = arith.addf %36, %35 : vector<4x32xf32>
    %38 = arith.divf %36, %37 : vector<4x32xf32>
    %39 = arith.mulf %30, %11 : vector<4x32xf32>
    %40 = arith.mulf %24, %32 : vector<4x32xf32>
    %41 = arith.addf %39, %40 : vector<4x32xf32>
    %42 = math.tanh %41 : vector<4x32xf32>
    %43 = arith.mulf %38, %42 : vector<4x32xf32>
    %44 = vector.broadcast %c0_i32 : i32 to vector<4x1xi32>
    %45 = arith.cmpi slt, %44, %0 : vector<4x1xi32>
    %cst_19 = arith.constant 0.000000e+00 : f32
    %46 = vector.shape_cast %45 : vector<4x1xi1> to vector<4x1xi1>
    %47 = vector.broadcast %46 : vector<4x1xi1> to vector<4x32xi1>
    %48 = vector.broadcast %cst_19 : f32 to vector<4x32xf32>
    %49 = arith.select %47, %43, %48 : vector<4x32xi1>, vector<4x32xf32>
    %50 = arith.index_cast %c0_i32 : i32 to index
    %c0_20 = arith.constant 0 : index
    %c0_21 = arith.constant 0 : index
    %51 = vector.load %arg13[%50, %c0_20, %c0_21] : memref<8x4x32xf32, #tpu.memory_space<vmem>>, vector<1x4x32xf32>
    %52 = vector.shape_cast %51 : vector<1x4x32xf32> to vector<4x32xf32>
    %53 = vector.shape_cast %49 : vector<4x32xf32> to vector<1x4x32xf32>
    tpu.vector_store %arg13[%50, %c0_20, %c0_21], %53 {strides = array<i32>} : memref<8x4x32xf32, #tpu.memory_space<vmem>>, vector<1x4x32xf32>,
    %54 = vector.shape_cast %45 : vector<4x1xi1> to vector<4x1xi1>
    %55 = vector.broadcast %54 : vector<4x1xi1> to vector<4x32xi1>
    %56 = arith.select %55, %43, %10 : vector<4x32xi1>, vector<4x32xf32>
    %57 = vector.shape_cast %45 : vector<4x1xi1> to vector<4x1xi1>
    %58 = vector.broadcast %57 : vector<4x1xi1> to vector<4x32xi1>
    %59 = arith.select %58, %41, %11 : vector<4x32xi1>, vector<4x32xf32>
    %c1_i32 = arith.constant 1 : i32
    %c4_i32_22 = arith.constant 4 : i32
    %60 = arith.muli %c1_i32, %c4_i32_22 : i32
    %61 = tpu.assume_multiple %60, 4 : i32
    %62 = arith.index_cast %61 : i32 to index
    %c0_23 = arith.constant 0 : index
    %63 = vector.load %arg12[%62, %c0_23] : memref<32x128xf32, #tpu.memory_space<vmem>>, vector<4x128xf32>
    %64 = arith.truncf %56 : vector<4x32xf32> to vector<4x32xbf16>
    %cst_24 = arith.constant dense<0.000000e+00> : vector<4x128xf32>
    %65 = tpu.matmul %64, %1, %cst_24 {dimension_numbers = #tpu.dot_dimension_numbers<[1], [0], [0], [1], [0, 0, 1, 1], [], []>} : vector<4x32xbf16>, vector<32x128xbf16>, vector<4x128xf32> -> vector<4x128xf32>
    %66 = arith.addf %63, %65 : vector<4x128xf32>
    %67 = vector.extract_strided_slice %66 {offsets = [0, 0], sizes = [4, 32], strides = [1, 1]} : vector<4x128xf32> to vector<4x32xf32>
    %68 = arith.negf %67 : vector<4x32xf32>
    %69 = math.exp %68 : vector<4x32xf32>
    %cst_25 = arith.constant 1.000000e+00 : f32
    %70 = vector.broadcast %cst_25 : f32 to vector<4x32xf32>
    %71 = arith.addf %70, %69 : vector<4x32xf32>
    %72 = arith.divf %70, %71 : vector<4x32xf32>
    %73 = vector.extract_strided_slice %66 {offsets = [0, 32], sizes = [4, 32], strides = [1, 1]} : vector<4x128xf32> to vector<4x32xf32>
    %74 = arith.negf %73 : vector<4x32xf32>
    %75 = math.exp %74 : vector<4x32xf32>
    %cst_26 = arith.constant 1.000000e+00 : f32
    %76 = vector.broadcast %cst_26 : f32 to vector<4x32xf32>
    %77 = arith.addf %76, %75 : vector<4x32xf32>
    %78 = arith.divf %76, %77 : vector<4x32xf32>
    %79 = vector.extract_strided_slice %66 {offsets = [0, 64], sizes = [4, 32], strides = [1, 1]} : vector<4x128xf32> to vector<4x32xf32>
    %80 = math.tanh %79 : vector<4x32xf32>
    %81 = vector.extract_strided_slice %66 {offsets = [0, 96], sizes = [4, 32], strides = [1, 1]} : vector<4x128xf32> to vector<4x32xf32>
    %82 = arith.negf %81 : vector<4x32xf32>
    %83 = math.exp %82 : vector<4x32xf32>
    %cst_27 = arith.constant 1.000000e+00 : f32
    %84 = vector.broadcast %cst_27 : f32 to vector<4x32xf32>
    %85 = arith.addf %84, %83 : vector<4x32xf32>
    %86 = arith.divf %84, %85 : vector<4x32xf32>
    %87 = arith.mulf %78, %59 : vector<4x32xf32>
    %88 = arith.mulf %72, %80 : vector<4x32xf32>
    %89 = arith.addf %87, %88 : vector<4x32xf32>
    %90 = math.tanh %89 : vector<4x32xf32>
    %91 = arith.mulf %86, %90 : vector<4x32xf32>
    %92 = vector.broadcast %c1_i32 : i32 to vector<4x1xi32>
    %93 = arith.cmpi slt, %92, %0 : vector<4x1xi32>
    %cst_28 = arith.constant 0.000000e+00 : f32
    %94 = vector.shape_cast %93 : vector<4x1xi1> to vector<4x1xi1>
    %95 = vector.broadcast %94 : vector<4x1xi1> to vector<4x32xi1>
    %96 = vector.broadcast %cst_28 : f32 to vector<4x32xf32>
    %97 = arith.select %95, %91, %96 : vector<4x32xi1>, vector<4x32xf32>
    %98 = arith.index_cast %c1_i32 : i32 to index
    %c0_29 = arith.constant 0 : index
    %c0_30 = arith.constant 0 : index
    %99 = vector.load %arg13[%98, %c0_29, %c0_30] : memref<8x4x32xf32, #tpu.memory_space<vmem>>, vector<1x4x32xf32>
    %100 = vector.shape_cast %99 : vector<1x4x32xf32> to vector<4x32xf32>
    %101 = vector.shape_cast %97 : vector<4x32xf32> to vector<1x4x32xf32>
    tpu.vector_store %arg13[%98, %c0_29, %c0_30], %101 {strides = array<i32>} : memref<8x4x32xf32, #tpu.memory_space<vmem>>, vector<1x4x32xf32>,
    %102 = vector.shape_cast %93 : vector<4x1xi1> to vector<4x1xi1>
    %103 = vector.broadcast %102 : vector<4x1xi1> to vector<4x32xi1>
    %104 = arith.select %103, %91, %56 : vector<4x32xi1>, vector<4x32xf32>
    %105 = vector.shape_cast %93 : vector<4x1xi1> to vector<4x1xi1>
    %106 = vector.broadcast %105 : vector<4x1xi1> to vector<4x32xi1>
    %107 = arith.select %106, %89, %59 : vector<4x32xi1>, vector<4x32xf32>
    %c2_i32 = arith.constant 2 : i32
    %c4_i32_31 = arith.constant 4 : i32
    %108 = arith.muli %c2_i32, %c4_i32_31 : i32
    %109 = tpu.assume_multiple %108, 4 : i32
    %110 = arith.index_cast %109 : i32 to index
    %c0_32 = arith.constant 0 : index
    %111 = vector.load %arg12[%110, %c0_32] : memref<32x128xf32, #tpu.memory_space<vmem>>, vector<4x128xf32>
    %112 = arith.truncf %104 : vector<4x32xf32> to vector<4x32xbf16>
    %cst_33 = arith.constant dense<0.000000e+00> : vector<4x128xf32>
    %113 = tpu.matmul %112, %1, %cst_33 {dimension_numbers = #tpu.dot_dimension_numbers<[1], [0], [0], [1], [0, 0, 1, 1], [], []>} : vector<4x32xbf16>, vector<32x128xbf16>, vector<4x128xf32> -> vector<4x128xf32>
    %114 = arith.addf %111, %113 : vector<4x128xf32>
    %115 = vector.extract_strided_slice %114 {offsets = [0, 0], sizes = [4, 32], strides = [1, 1]} : vector<4x128xf32> to vector<4x32xf32>
    %116 = arith.negf %115 : vector<4x32xf32>
    %117 = math.exp %116 : vector<4x32xf32>
    %cst_34 = arith.constant 1.000000e+00 : f32
    %118 = vector.broadcast %cst_34 : f32 to vector<4x32xf32>
    %119 = arith.addf %118, %117 : vector<4x32xf32>
    %120 = arith.divf %118, %119 : vector<4x32xf32>
    %121 = vector.extract_strided_slice %114 {offsets = [0, 32], sizes = [4, 32], strides = [1, 1]} : vector<4x128xf32> to vector<4x32xf32>
    %122 = arith.negf %121 : vector<4x32xf32>
    %123 = math.exp %122 : vector<4x32xf32>
    %cst_35 = arith.constant 1.000000e+00 : f32
    %124 = vector.broadcast %cst_35 : f32 to vector<4x32xf32>
    %125 = arith.addf %124, %123 : vector<4x32xf32>
    %126 = arith.divf %124, %125 : vector<4x32xf32>
    %127 = vector.extract_strided_slice %114 {offsets = [0, 64], sizes = [4, 32], strides = [1, 1]} : vector<4x128xf32> to vector<4x32xf32>
    %128 = math.tanh %127 : vector<4x32xf32>
    %129 = vector.extract_strided_slice %114 {offsets = [0, 96], sizes = [4, 32], strides = [1, 1]} : vector<4x128xf32> to vector<4x32xf32>
    %130 = arith.negf %129 : vector<4x32xf32>
    %131 = math.exp %130 : vector<4x32xf32>
    %cst_36 = arith.constant 1.000000e+00 : f32
    %132 = vector.broadcast %cst_36 : f32 to vector<4x32xf32>
    %133 = arith.addf %132, %131 : vector<4x32xf32>
    %134 = arith.divf %132, %133 : vector<4x32xf32>
    %135 = arith.mulf %126, %107 : vector<4x32xf32>
    %136 = arith.mulf %120, %128 : vector<4x32xf32>
    %137 = arith.addf %135, %136 : vector<4x32xf32>
    %138 = math.tanh %137 : vector<4x32xf32>
    %139 = arith.mulf %134, %138 : vector<4x32xf32>
    %140 = vector.broadcast %c2_i32 : i32 to vector<4x1xi32>
    %141 = arith.cmpi slt, %140, %0 : vector<4x1xi32>
    %cst_37 = arith.constant 0.000000e+00 : f32
    %142 = vector.shape_cast %141 : vector<4x1xi1> to vector<4x1xi1>
    %143 = vector.broadcast %142 : vector<4x1xi1> to vector<4x32xi1>
    %144 = vector.broadcast %cst_37 : f32 to vector<4x32xf32>
    %145 = arith.select %143, %139, %144 : vector<4x32xi1>, vector<4x32xf32>
    %146 = arith.index_cast %c2_i32 : i32 to index
    %c0_38 = arith.constant 0 : index
    %c0_39 = arith.constant 0 : index
    %147 = vector.load %arg13[%146, %c0_38, %c0_39] : memref<8x4x32xf32, #tpu.memory_space<vmem>>, vector<1x4x32xf32>
    %148 = vector.shape_cast %147 : vector<1x4x32xf32> to vector<4x32xf32>
    %149 = vector.shape_cast %145 : vector<4x32xf32> to vector<1x4x32xf32>
    tpu.vector_store %arg13[%146, %c0_38, %c0_39], %149 {strides = array<i32>} : memref<8x4x32xf32, #tpu.memory_space<vmem>>, vector<1x4x32xf32>,
    %150 = vector.shape_cast %141 : vector<4x1xi1> to vector<4x1xi1>
    %151 = vector.broadcast %150 : vector<4x1xi1> to vector<4x32xi1>
    %152 = arith.select %151, %139, %104 : vector<4x32xi1>, vector<4x32xf32>
    %153 = vector.shape_cast %141 : vector<4x1xi1> to vector<4x1xi1>
    %154 = vector.broadcast %153 : vector<4x1xi1> to vector<4x32xi1>
    %155 = arith.select %154, %137, %107 : vector<4x32xi1>, vector<4x32xf32>
    %c3_i32 = arith.constant 3 : i32
    %c4_i32_40 = arith.constant 4 : i32
    %156 = arith.muli %c3_i32, %c4_i32_40 : i32
    %157 = tpu.assume_multiple %156, 4 : i32
    %158 = arith.index_cast %157 : i32 to index
    %c0_41 = arith.constant 0 : index
    %159 = vector.load %arg12[%158, %c0_41] : memref<32x128xf32, #tpu.memory_space<vmem>>, vector<4x128xf32>
    %160 = arith.truncf %152 : vector<4x32xf32> to vector<4x32xbf16>
    %cst_42 = arith.constant dense<0.000000e+00> : vector<4x128xf32>
    %161 = tpu.matmul %160, %1, %cst_42 {dimension_numbers = #tpu.dot_dimension_numbers<[1], [0], [0], [1], [0, 0, 1, 1], [], []>} : vector<4x32xbf16>, vector<32x128xbf16>, vector<4x128xf32> -> vector<4x128xf32>
    %162 = arith.addf %159, %161 : vector<4x128xf32>
    %163 = vector.extract_strided_slice %162 {offsets = [0, 0], sizes = [4, 32], strides = [1, 1]} : vector<4x128xf32> to vector<4x32xf32>
    %164 = arith.negf %163 : vector<4x32xf32>
    %165 = math.exp %164 : vector<4x32xf32>
    %cst_43 = arith.constant 1.000000e+00 : f32
    %166 = vector.broadcast %cst_43 : f32 to vector<4x32xf32>
    %167 = arith.addf %166, %165 : vector<4x32xf32>
    %168 = arith.divf %166, %167 : vector<4x32xf32>
    %169 = vector.extract_strided_slice %162 {offsets = [0, 32], sizes = [4, 32], strides = [1, 1]} : vector<4x128xf32> to vector<4x32xf32>
    %170 = arith.negf %169 : vector<4x32xf32>
    %171 = math.exp %170 : vector<4x32xf32>
    %cst_44 = arith.constant 1.000000e+00 : f32
    %172 = vector.broadcast %cst_44 : f32 to vector<4x32xf32>
    %173 = arith.addf %172, %171 : vector<4x32xf32>
    %174 = arith.divf %172, %173 : vector<4x32xf32>
    %175 = vector.extract_strided_slice %162 {offsets = [0, 64], sizes = [4, 32], strides = [1, 1]} : vector<4x128xf32> to vector<4x32xf32>
    %176 = math.tanh %175 : vector<4x32xf32>
    %177 = vector.extract_strided_slice %162 {offsets = [0, 96], sizes = [4, 32], strides = [1, 1]} : vector<4x128xf32> to vector<4x32xf32>
    %178 = arith.negf %177 : vector<4x32xf32>
    %179 = math.exp %178 : vector<4x32xf32>
    %cst_45 = arith.constant 1.000000e+00 : f32
    %180 = vector.broadcast %cst_45 : f32 to vector<4x32xf32>
    %181 = arith.addf %180, %179 : vector<4x32xf32>
    %182 = arith.divf %180, %181 : vector<4x32xf32>
    %183 = arith.mulf %174, %155 : vector<4x32xf32>
    %184 = arith.mulf %168, %176 : vector<4x32xf32>
    %185 = arith.addf %183, %184 : vector<4x32xf32>
    %186 = math.tanh %185 : vector<4x32xf32>
    %187 = arith.mulf %182, %186 : vector<4x32xf32>
    %188 = vector.broadcast %c3_i32 : i32 to vector<4x1xi32>
    %189 = arith.cmpi slt, %188, %0 : vector<4x1xi32>
    %cst_46 = arith.constant 0.000000e+00 : f32
    %190 = vector.shape_cast %189 : vector<4x1xi1> to vector<4x1xi1>
    %191 = vector.broadcast %190 : vector<4x1xi1> to vector<4x32xi1>
    %192 = vector.broadcast %cst_46 : f32 to vector<4x32xf32>
    %193 = arith.select %191, %187, %192 : vector<4x32xi1>, vector<4x32xf32>
    %194 = arith.index_cast %c3_i32 : i32 to index
    %c0_47 = arith.constant 0 : index
    %c0_48 = arith.constant 0 : index
    %195 = vector.load %arg13[%194, %c0_47, %c0_48] : memref<8x4x32xf32, #tpu.memory_space<vmem>>, vector<1x4x32xf32>
    %196 = vector.shape_cast %195 : vector<1x4x32xf32> to vector<4x32xf32>
    %197 = vector.shape_cast %193 : vector<4x32xf32> to vector<1x4x32xf32>
    tpu.vector_store %arg13[%194, %c0_47, %c0_48], %197 {strides = array<i32>} : memref<8x4x32xf32, #tpu.memory_space<vmem>>, vector<1x4x32xf32>,
    %198 = vector.shape_cast %189 : vector<4x1xi1> to vector<4x1xi1>
    %199 = vector.broadcast %198 : vector<4x1xi1> to vector<4x32xi1>
    %200 = arith.select %199, %187, %152 : vector<4x32xi1>, vector<4x32xf32>
    %201 = vector.shape_cast %189 : vector<4x1xi1> to vector<4x1xi1>
    %202 = vector.broadcast %201 : vector<4x1xi1> to vector<4x32xi1>
    %203 = arith.select %202, %185, %155 : vector<4x32xi1>, vector<4x32xf32>
    %c4_i32_49 = arith.constant 4 : i32
    %c4_i32_50 = arith.constant 4 : i32
    %204 = arith.muli %c4_i32_49, %c4_i32_50 : i32
    %205 = tpu.assume_multiple %204, 4 : i32
    %206 = arith.index_cast %205 : i32 to index
    %c0_51 = arith.constant 0 : index
    %207 = vector.load %arg12[%206, %c0_51] : memref<32x128xf32, #tpu.memory_space<vmem>>, vector<4x128xf32>
    %208 = arith.truncf %200 : vector<4x32xf32> to vector<4x32xbf16>
    %cst_52 = arith.constant dense<0.000000e+00> : vector<4x128xf32>
    %209 = tpu.matmul %208, %1, %cst_52 {dimension_numbers = #tpu.dot_dimension_numbers<[1], [0], [0], [1], [0, 0, 1, 1], [], []>} : vector<4x32xbf16>, vector<32x128xbf16>, vector<4x128xf32> -> vector<4x128xf32>
    %210 = arith.addf %207, %209 : vector<4x128xf32>
    %211 = vector.extract_strided_slice %210 {offsets = [0, 0], sizes = [4, 32], strides = [1, 1]} : vector<4x128xf32> to vector<4x32xf32>
    %212 = arith.negf %211 : vector<4x32xf32>
    %213 = math.exp %212 : vector<4x32xf32>
    %cst_53 = arith.constant 1.000000e+00 : f32
    %214 = vector.broadcast %cst_53 : f32 to vector<4x32xf32>
    %215 = arith.addf %214, %213 : vector<4x32xf32>
    %216 = arith.divf %214, %215 : vector<4x32xf32>
    %217 = vector.extract_strided_slice %210 {offsets = [0, 32], sizes = [4, 32], strides = [1, 1]} : vector<4x128xf32> to vector<4x32xf32>
    %218 = arith.negf %217 : vector<4x32xf32>
    %219 = math.exp %218 : vector<4x32xf32>
    %cst_54 = arith.constant 1.000000e+00 : f32
    %220 = vector.broadcast %cst_54 : f32 to vector<4x32xf32>
    %221 = arith.addf %220, %219 : vector<4x32xf32>
    %222 = arith.divf %220, %221 : vector<4x32xf32>
    %223 = vector.extract_strided_slice %210 {offsets = [0, 64], sizes = [4, 32], strides = [1, 1]} : vector<4x128xf32> to vector<4x32xf32>
    %224 = math.tanh %223 : vector<4x32xf32>
    %225 = vector.extract_strided_slice %210 {offsets = [0, 96], sizes = [4, 32], strides = [1, 1]} : vector<4x128xf32> to vector<4x32xf32>
    %226 = arith.negf %225 : vector<4x32xf32>
    %227 = math.exp %226 : vector<4x32xf32>
    %cst_55 = arith.constant 1.000000e+00 : f32
    %228 = vector.broadcast %cst_55 : f32 to vector<4x32xf32>
    %229 = arith.addf %228, %227 : vector<4x32xf32>
    %230 = arith.divf %228, %229 : vector<4x32xf32>
    %231 = arith.mulf %222, %203 : vector<4x32xf32>
    %232 = arith.mulf %216, %224 : vector<4x32xf32>
    %233 = arith.addf %231, %232 : vector<4x32xf32>
    %234 = math.tanh %233 : vector<4x32xf32>
    %235 = arith.mulf %230, %234 : vector<4x32xf32>
    %236 = vector.broadcast %c4_i32_49 : i32 to vector<4x1xi32>
    %237 = arith.cmpi slt, %236, %0 : vector<4x1xi32>
    %cst_56 = arith.constant 0.000000e+00 : f32
    %238 = vector.shape_cast %237 : vector<4x1xi1> to vector<4x1xi1>
    %239 = vector.broadcast %238 : vector<4x1xi1> to vector<4x32xi1>
    %240 = vector.broadcast %cst_56 : f32 to vector<4x32xf32>
    %241 = arith.select %239, %235, %240 : vector<4x32xi1>, vector<4x32xf32>
    %242 = arith.index_cast %c4_i32_49 : i32 to index
    %c0_57 = arith.constant 0 : index
    %c0_58 = arith.constant 0 : index
    %243 = vector.load %arg13[%242, %c0_57, %c0_58] : memref<8x4x32xf32, #tpu.memory_space<vmem>>, vector<1x4x32xf32>
    %244 = vector.shape_cast %243 : vector<1x4x32xf32> to vector<4x32xf32>
    %245 = vector.shape_cast %241 : vector<4x32xf32> to vector<1x4x32xf32>
    tpu.vector_store %arg13[%242, %c0_57, %c0_58], %245 {strides = array<i32>} : memref<8x4x32xf32, #tpu.memory_space<vmem>>, vector<1x4x32xf32>,
    %246 = vector.shape_cast %237 : vector<4x1xi1> to vector<4x1xi1>
    %247 = vector.broadcast %246 : vector<4x1xi1> to vector<4x32xi1>
    %248 = arith.select %247, %235, %200 : vector<4x32xi1>, vector<4x32xf32>
    %249 = vector.shape_cast %237 : vector<4x1xi1> to vector<4x1xi1>
    %250 = vector.broadcast %249 : vector<4x1xi1> to vector<4x32xi1>
    %251 = arith.select %250, %233, %203 : vector<4x32xi1>, vector<4x32xf32>
    %c5_i32 = arith.constant 5 : i32
    %c4_i32_59 = arith.constant 4 : i32
    %252 = arith.muli %c5_i32, %c4_i32_59 : i32
    %253 = tpu.assume_multiple %252, 4 : i32
    %254 = arith.index_cast %253 : i32 to index
    %c0_60 = arith.constant 0 : index
    %255 = vector.load %arg12[%254, %c0_60] : memref<32x128xf32, #tpu.memory_space<vmem>>, vector<4x128xf32>
    %256 = arith.truncf %248 : vector<4x32xf32> to vector<4x32xbf16>
    %cst_61 = arith.constant dense<0.000000e+00> : vector<4x128xf32>
    %257 = tpu.matmul %256, %1, %cst_61 {dimension_numbers = #tpu.dot_dimension_numbers<[1], [0], [0], [1], [0, 0, 1, 1], [], []>} : vector<4x32xbf16>, vector<32x128xbf16>, vector<4x128xf32> -> vector<4x128xf32>
    %258 = arith.addf %255, %257 : vector<4x128xf32>
    %259 = vector.extract_strided_slice %258 {offsets = [0, 0], sizes = [4, 32], strides = [1, 1]} : vector<4x128xf32> to vector<4x32xf32>
    %260 = arith.negf %259 : vector<4x32xf32>
    %261 = math.exp %260 : vector<4x32xf32>
    %cst_62 = arith.constant 1.000000e+00 : f32
    %262 = vector.broadcast %cst_62 : f32 to vector<4x32xf32>
    %263 = arith.addf %262, %261 : vector<4x32xf32>
    %264 = arith.divf %262, %263 : vector<4x32xf32>
    %265 = vector.extract_strided_slice %258 {offsets = [0, 32], sizes = [4, 32], strides = [1, 1]} : vector<4x128xf32> to vector<4x32xf32>
    %266 = arith.negf %265 : vector<4x32xf32>
    %267 = math.exp %266 : vector<4x32xf32>
    %cst_63 = arith.constant 1.000000e+00 : f32
    %268 = vector.broadcast %cst_63 : f32 to vector<4x32xf32>
    %269 = arith.addf %268, %267 : vector<4x32xf32>
    %270 = arith.divf %268, %269 : vector<4x32xf32>
    %271 = vector.extract_strided_slice %258 {offsets = [0, 64], sizes = [4, 32], strides = [1, 1]} : vector<4x128xf32> to vector<4x32xf32>
    %272 = math.tanh %271 : vector<4x32xf32>
    %273 = vector.extract_strided_slice %258 {offsets = [0, 96], sizes = [4, 32], strides = [1, 1]} : vector<4x128xf32> to vector<4x32xf32>
    %274 = arith.negf %273 : vector<4x32xf32>
    %275 = math.exp %274 : vector<4x32xf32>
    %cst_64 = arith.constant 1.000000e+00 : f32
    %276 = vector.broadcast %cst_64 : f32 to vector<4x32xf32>
    %277 = arith.addf %276, %275 : vector<4x32xf32>
    %278 = arith.divf %276, %277 : vector<4x32xf32>
    %279 = arith.mulf %270, %251 : vector<4x32xf32>
    %280 = arith.mulf %264, %272 : vector<4x32xf32>
    %281 = arith.addf %279, %280 : vector<4x32xf32>
    %282 = math.tanh %281 : vector<4x32xf32>
    %283 = arith.mulf %278, %282 : vector<4x32xf32>
    %284 = vector.broadcast %c5_i32 : i32 to vector<4x1xi32>
    %285 = arith.cmpi slt, %284, %0 : vector<4x1xi32>
    %cst_65 = arith.constant 0.000000e+00 : f32
    %286 = vector.shape_cast %285 : vector<4x1xi1> to vector<4x1xi1>
    %287 = vector.broadcast %286 : vector<4x1xi1> to vector<4x32xi1>
    %288 = vector.broadcast %cst_65 : f32 to vector<4x32xf32>
    %289 = arith.select %287, %283, %288 : vector<4x32xi1>, vector<4x32xf32>
    %290 = arith.index_cast %c5_i32 : i32 to index
    %c0_66 = arith.constant 0 : index
    %c0_67 = arith.constant 0 : index
    %291 = vector.load %arg13[%290, %c0_66, %c0_67] : memref<8x4x32xf32, #tpu.memory_space<vmem>>, vector<1x4x32xf32>
    %292 = vector.shape_cast %291 : vector<1x4x32xf32> to vector<4x32xf32>
    %293 = vector.shape_cast %289 : vector<4x32xf32> to vector<1x4x32xf32>
    tpu.vector_store %arg13[%290, %c0_66, %c0_67], %293 {strides = array<i32>} : memref<8x4x32xf32, #tpu.memory_space<vmem>>, vector<1x4x32xf32>,
    %294 = vector.shape_cast %285 : vector<4x1xi1> to vector<4x1xi1>
    %295 = vector.broadcast %294 : vector<4x1xi1> to vector<4x32xi1>
    %296 = arith.select %295, %283, %248 : vector<4x32xi1>, vector<4x32xf32>
    %297 = vector.shape_cast %285 : vector<4x1xi1> to vector<4x1xi1>
    %298 = vector.broadcast %297 : vector<4x1xi1> to vector<4x32xi1>
    %299 = arith.select %298, %281, %251 : vector<4x32xi1>, vector<4x32xf32>
    %c6_i32 = arith.constant 6 : i32
    %c4_i32_68 = arith.constant 4 : i32
    %300 = arith.muli %c6_i32, %c4_i32_68 : i32
    %301 = tpu.assume_multiple %300, 4 : i32
    %302 = arith.index_cast %301 : i32 to index
    %c0_69 = arith.constant 0 : index
    %303 = vector.load %arg12[%302, %c0_69] : memref<32x128xf32, #tpu.memory_space<vmem>>, vector<4x128xf32>
    %304 = arith.truncf %296 : vector<4x32xf32> to vector<4x32xbf16>
    %cst_70 = arith.constant dense<0.000000e+00> : vector<4x128xf32>
    %305 = tpu.matmul %304, %1, %cst_70 {dimension_numbers = #tpu.dot_dimension_numbers<[1], [0], [0], [1], [0, 0, 1, 1], [], []>} : vector<4x32xbf16>, vector<32x128xbf16>, vector<4x128xf32> -> vector<4x128xf32>
    %306 = arith.addf %303, %305 : vector<4x128xf32>
    %307 = vector.extract_strided_slice %306 {offsets = [0, 0], sizes = [4, 32], strides = [1, 1]} : vector<4x128xf32> to vector<4x32xf32>
    %308 = arith.negf %307 : vector<4x32xf32>
    %309 = math.exp %308 : vector<4x32xf32>
    %cst_71 = arith.constant 1.000000e+00 : f32
    %310 = vector.broadcast %cst_71 : f32 to vector<4x32xf32>
    %311 = arith.addf %310, %309 : vector<4x32xf32>
    %312 = arith.divf %310, %311 : vector<4x32xf32>
    %313 = vector.extract_strided_slice %306 {offsets = [0, 32], sizes = [4, 32], strides = [1, 1]} : vector<4x128xf32> to vector<4x32xf32>
    %314 = arith.negf %313 : vector<4x32xf32>
    %315 = math.exp %314 : vector<4x32xf32>
    %cst_72 = arith.constant 1.000000e+00 : f32
    %316 = vector.broadcast %cst_72 : f32 to vector<4x32xf32>
    %317 = arith.addf %316, %315 : vector<4x32xf32>
    %318 = arith.divf %316, %317 : vector<4x32xf32>
    %319 = vector.extract_strided_slice %306 {offsets = [0, 64], sizes = [4, 32], strides = [1, 1]} : vector<4x128xf32> to vector<4x32xf32>
    %320 = math.tanh %319 : vector<4x32xf32>
    %321 = vector.extract_strided_slice %306 {offsets = [0, 96], sizes = [4, 32], strides = [1, 1]} : vector<4x128xf32> to vector<4x32xf32>
    %322 = arith.negf %321 : vector<4x32xf32>
    %323 = math.exp %322 : vector<4x32xf32>
    %cst_73 = arith.constant 1.000000e+00 : f32
    %324 = vector.broadcast %cst_73 : f32 to vector<4x32xf32>
    %325 = arith.addf %324, %323 : vector<4x32xf32>
    %326 = arith.divf %324, %325 : vector<4x32xf32>
    %327 = arith.mulf %318, %299 : vector<4x32xf32>
    %328 = arith.mulf %312, %320 : vector<4x32xf32>
    %329 = arith.addf %327, %328 : vector<4x32xf32>
    %330 = math.tanh %329 : vector<4x32xf32>
    %331 = arith.mulf %326, %330 : vector<4x32xf32>
    %332 = vector.broadcast %c6_i32 : i32 to vector<4x1xi32>
    %333 = arith.cmpi slt, %332, %0 : vector<4x1xi32>
    %cst_74 = arith.constant 0.000000e+00 : f32
    %334 = vector.shape_cast %333 : vector<4x1xi1> to vector<4x1xi1>
    %335 = vector.broadcast %334 : vector<4x1xi1> to vector<4x32xi1>
    %336 = vector.broadcast %cst_74 : f32 to vector<4x32xf32>
    %337 = arith.select %335, %331, %336 : vector<4x32xi1>, vector<4x32xf32>
    %338 = arith.index_cast %c6_i32 : i32 to index
    %c0_75 = arith.constant 0 : index
    %c0_76 = arith.constant 0 : index
    %339 = vector.load %arg13[%338, %c0_75, %c0_76] : memref<8x4x32xf32, #tpu.memory_space<vmem>>, vector<1x4x32xf32>
    %340 = vector.shape_cast %339 : vector<1x4x32xf32> to vector<4x32xf32>
    %341 = vector.shape_cast %337 : vector<4x32xf32> to vector<1x4x32xf32>
    tpu.vector_store %arg13[%338, %c0_75, %c0_76], %341 {strides = array<i32>} : memref<8x4x32xf32, #tpu.memory_space<vmem>>, vector<1x4x32xf32>,
    %342 = vector.shape_cast %333 : vector<4x1xi1> to vector<4x1xi1>
    %343 = vector.broadcast %342 : vector<4x1xi1> to vector<4x32xi1>
    %344 = arith.select %343, %331, %296 : vector<4x32xi1>, vector<4x32xf32>
    %345 = vector.shape_cast %333 : vector<4x1xi1> to vector<4x1xi1>
    %346 = vector.broadcast %345 : vector<4x1xi1> to vector<4x32xi1>
    %347 = arith.select %346, %329, %299 : vector<4x32xi1>, vector<4x32xf32>
    %c7_i32 = arith.constant 7 : i32
    %c4_i32_77 = arith.constant 4 : i32
    %348 = arith.muli %c7_i32, %c4_i32_77 : i32
    %349 = tpu.assume_multiple %348, 4 : i32
    %350 = arith.index_cast %349 : i32 to index
    %c0_78 = arith.constant 0 : index
    %351 = vector.load %arg12[%350, %c0_78] : memref<32x128xf32, #tpu.memory_space<vmem>>, vector<4x128xf32>
    %352 = arith.truncf %344 : vector<4x32xf32> to vector<4x32xbf16>
    %cst_79 = arith.constant dense<0.000000e+00> : vector<4x128xf32>
    %353 = tpu.matmul %352, %1, %cst_79 {dimension_numbers = #tpu.dot_dimension_numbers<[1], [0], [0], [1], [0, 0, 1, 1], [], []>} : vector<4x32xbf16>, vector<32x128xbf16>, vector<4x128xf32> -> vector<4x128xf32>
    %354 = arith.addf %351, %353 : vector<4x128xf32>
    %355 = vector.extract_strided_slice %354 {offsets = [0, 0], sizes = [4, 32], strides = [1, 1]} : vector<4x128xf32> to vector<4x32xf32>
    %356 = arith.negf %355 : vector<4x32xf32>
    %357 = math.exp %356 : vector<4x32xf32>
    %cst_80 = arith.constant 1.000000e+00 : f32
    %358 = vector.broadcast %cst_80 : f32 to vector<4x32xf32>
    %359 = arith.addf %358, %357 : vector<4x32xf32>
    %360 = arith.divf %358, %359 : vector<4x32xf32>
    %361 = vector.extract_strided_slice %354 {offsets = [0, 32], sizes = [4, 32], strides = [1, 1]} : vector<4x128xf32> to vector<4x32xf32>
    %362 = arith.negf %361 : vector<4x32xf32>
    %363 = math.exp %362 : vector<4x32xf32>
    %cst_81 = arith.constant 1.000000e+00 : f32
    %364 = vector.broadcast %cst_81 : f32 to vector<4x32xf32>
    %365 = arith.addf %364, %363 : vector<4x32xf32>
    %366 = arith.divf %364, %365 : vector<4x32xf32>
    %367 = vector.extract_strided_slice %354 {offsets = [0, 64], sizes = [4, 32], strides = [1, 1]} : vector<4x128xf32> to vector<4x32xf32>
    %368 = math.tanh %367 : vector<4x32xf32>
    %369 = vector.extract_strided_slice %354 {offsets = [0, 96], sizes = [4, 32], strides = [1, 1]} : vector<4x128xf32> to vector<4x32xf32>
    %370 = arith.negf %369 : vector<4x32xf32>
    %371 = math.exp %370 : vector<4x32xf32>
    %cst_82 = arith.constant 1.000000e+00 : f32
    %372 = vector.broadcast %cst_82 : f32 to vector<4x32xf32>
    %373 = arith.addf %372, %371 : vector<4x32xf32>
    %374 = arith.divf %372, %373 : vector<4x32xf32>
    %375 = arith.mulf %366, %347 : vector<4x32xf32>
    %376 = arith.mulf %360, %368 : vector<4x32xf32>
    %377 = arith.addf %375, %376 : vector<4x32xf32>
    %378 = math.tanh %377 : vector<4x32xf32>
    %379 = arith.mulf %374, %378 : vector<4x32xf32>
    %380 = vector.broadcast %c7_i32 : i32 to vector<4x1xi32>
    %381 = arith.cmpi slt, %380, %0 : vector<4x1xi32>
    %cst_83 = arith.constant 0.000000e+00 : f32
    %382 = vector.shape_cast %381 : vector<4x1xi1> to vector<4x1xi1>
    %383 = vector.broadcast %382 : vector<4x1xi1> to vector<4x32xi1>
    %384 = vector.broadcast %cst_83 : f32 to vector<4x32xf32>
    %385 = arith.select %383, %379, %384 : vector<4x32xi1>, vector<4x32xf32>
    %386 = arith.index_cast %c7_i32 : i32 to index
    %c0_84 = arith.constant 0 : index
    %c0_85 = arith.constant 0 : index
    %387 = vector.load %arg13[%386, %c0_84, %c0_85] : memref<8x4x32xf32, #tpu.memory_space<vmem>>, vector<1x4x32xf32>
    %388 = vector.shape_cast %387 : vector<1x4x32xf32> to vector<4x32xf32>
    %389 = vector.shape_cast %385 : vector<4x32xf32> to vector<1x4x32xf32>
    tpu.vector_store %arg13[%386, %c0_84, %c0_85], %389 {strides = array<i32>} : memref<8x4x32xf32, #tpu.memory_space<vmem>>, vector<1x4x32xf32>,
    %390 = vector.shape_cast %381 : vector<4x1xi1> to vector<4x1xi1>
    %391 = vector.broadcast %390 : vector<4x1xi1> to vector<4x32xi1>
    %392 = arith.select %391, %379, %344 : vector<4x32xi1>, vector<4x32xf32>
    %393 = vector.shape_cast %381 : vector<4x1xi1> to vector<4x1xi1>
    %394 = vector.broadcast %393 : vector<4x1xi1> to vector<4x32xi1>
    %395 = arith.select %394, %377, %347 : vector<4x32xi1>, vector<4x32xf32>
    %c8_i32 = arith.constant 8 : i32
    %c0_86 = arith.constant 0 : index
    %c0_87 = arith.constant 0 : index
    %c0_88 = arith.constant 0 : index
    %396 = vector.load %arg13[%c0_86, %c0_87, %c0_88] : memref<8x4x32xf32, #tpu.memory_space<vmem>>, vector<8x4x32xf32>
    %c0_89 = arith.constant 0 : index
    %c0_90 = arith.constant 0 : index
    %397 = vector.load %arg6[%c0_89, %c0_90] : memref<1x32xf32, #tpu.memory_space<vmem>>, vector<1x32xf32>
    %398 = vector.shape_cast %397 : vector<1x32xf32> to vector<1x1x32xf32>
    %399 = vector.broadcast %398 : vector<1x1x32xf32> to vector<8x4x32xf32>
    %400 = arith.mulf %396, %399 : vector<8x4x32xf32>
    %cst_91 = arith.constant dense<0.000000e+00> : vector<8x4xf32>
    %401 = vector.multi_reduction <add>, %400, %cst_91 [2] : vector<8x4x32xf32> to vector<8x4xf32>
    %c0_92 = arith.constant 0 : index
    %c0_93 = arith.constant 0 : index
    %402 = vector.load %arg7[%c0_92, %c0_93] : memref<1x1xf32, #tpu.memory_space<vmem>>, vector<1x1xf32>
    %403 = vector.broadcast %402 : vector<1x1xf32> to vector<8x4xf32>
    %404 = arith.addf %401, %403 : vector<8x4xf32>
    %405 = math.tanh %404 : vector<8x4xf32>
    %406 = tpu.transpose %405, [1, 0] : vector<8x4xf32> -> vector<4x8xf32>
    %407 = tpu.iota {dimensions = array<i32: 1>} : vector<4x8xi32>
    %408 = vector.broadcast %0 : vector<4x1xi32> to vector<4x8xi32>
    %409 = arith.cmpi slt, %407, %408 : vector<4x8xi32>
    %cst_94 = arith.constant dense<0xFF800000> : vector<4xf32>
    %410 = vector.multi_reduction <maximumf>, %406, %cst_94 [1] : vector<4x8xf32> to vector<4xf32>
    %411 = vector.shape_cast %410 : vector<4xf32> to vector<4x1xf32>
    %412 = vector.broadcast %411 : vector<4x1xf32> to vector<4x8xf32>
    %413 = arith.subf %406, %412 : vector<4x8xf32>
    %414 = math.exp %413 : vector<4x8xf32>
    %cst_95 = arith.constant 0.000000e+00 : f32
    %415 = vector.broadcast %cst_95 : f32 to vector<4x8xf32>
    %416 = arith.select %409, %414, %415 : vector<4x8xi1>, vector<4x8xf32>
    %cst_96 = arith.constant dense<0.000000e+00> : vector<4xf32>
    %417 = vector.multi_reduction <add>, %416, %cst_96 [1] : vector<4x8xf32> to vector<4xf32>
    %418 = vector.shape_cast %417 : vector<4xf32> to vector<4x1xf32>
    %cst_97 = arith.constant 9.99999971E-10 : f32
    %419 = vector.broadcast %cst_97 : f32 to vector<4x1xf32>
    %420 = arith.maximumf %418, %419 : vector<4x1xf32>
    %421 = vector.broadcast %420 : vector<4x1xf32> to vector<4x8xf32>
    %422 = arith.divf %416, %421 : vector<4x8xf32>
    %c0_98 = arith.constant 0 : index
    %c0_99 = arith.constant 0 : index
    %423 = vector.load %arg11[%c0_98, %c0_99] : memref<4x8xf32, #tpu.memory_space<vmem>>, vector<4x8xf32>
    tpu.vector_store %arg11[%c0_98, %c0_99], %422 {strides = array<i32>} : memref<4x8xf32, #tpu.memory_space<vmem>>, vector<4x8xf32>,
    %424 = tpu.transpose %422, [1, 0] : vector<4x8xf32> -> vector<8x4xf32>
    %425 = vector.shape_cast %424 : vector<8x4xf32> to vector<8x4x1xf32>
    %426 = vector.broadcast %425 : vector<8x4x1xf32> to vector<8x4x32xf32>
    %427 = arith.mulf %396, %426 : vector<8x4x32xf32>
    %cst_100 = arith.constant dense<0.000000e+00> : vector<4x32xf32>
    %428 = vector.multi_reduction <add>, %427, %cst_100 [0] : vector<8x4x32xf32> to vector<4x32xf32>
    %c0_101 = arith.constant 0 : index
    %c0_102 = arith.constant 0 : index
    %429 = vector.load %arg8[%c0_101, %c0_102] : memref<32x1xf32, #tpu.memory_space<vmem>>, vector<32x1xf32>
    %cst_103 = arith.constant dense<0.000000e+00> : vector<4x1xf32>
    %430 = tpu.matmul %428, %429, %cst_103 {dimension_numbers = #tpu.dot_dimension_numbers<[1], [0], [0], [1], [0, 0, 1, 1], [], []>} : vector<4x32xf32>, vector<32x1xf32>, vector<4x1xf32> -> vector<4x1xf32>
    %c0_104 = arith.constant 0 : index
    %c0_105 = arith.constant 0 : index
    %431 = vector.load %arg9[%c0_104, %c0_105] : memref<1x1xf32, #tpu.memory_space<vmem>>, vector<1x1xf32>
    %432 = vector.broadcast %431 : vector<1x1xf32> to vector<4x1xf32>
    %433 = arith.addf %430, %432 : vector<4x1xf32>
    %c0_106 = arith.constant 0 : index
    %c0_107 = arith.constant 0 : index
    %434 = vector.load %arg10[%c0_106, %c0_107] : memref<4x1xf32, #tpu.memory_space<vmem>>, vector<4x1xf32>
    tpu.vector_store %arg10[%c0_106, %c0_107], %433 {strides = array<i32>} : memref<4x1xf32, #tpu.memory_space<vmem>>, vector<4x1xf32>,
    return
  }
  func.func @transform_0(%arg0: i32) -> (i32, i32, i32) {
    %c0_i32 = arith.constant 0 : i32
    %c0_i32_0 = arith.constant 0 : i32
    %c0_i32_1 = arith.constant 0 : i32
    return %arg0, %c0_i32, %c0_i32_0 : i32, i32, i32
  }
  func.func @transform_1(%arg0: i32) -> (i32, i32) {
    %c0_i32 = arith.constant 0 : i32
    %c0_i32_0 = arith.constant 0 : i32
    return %arg0, %c0_i32 : i32, i32
  }
  func.func @transform_2(%arg0: i32) -> (i32, i32) {
    %c0_i32 = arith.constant 0 : i32
    %c0_i32_0 = arith.constant 0 : i32
    %c0_i32_1 = arith.constant 0 : i32
    return %c0_i32, %c0_i32_0 : i32, i32
  }
  func.func @transform_3(%arg0: i32) -> (i32, i32) {
    %c0_i32 = arith.constant 0 : i32
    %c0_i32_0 = arith.constant 0 : i32
    %c0_i32_1 = arith.constant 0 : i32
    return %c0_i32, %c0_i32_0 : i32, i32
  }
  func.func @transform_4(%arg0: i32) -> (i32, i32) {
    %c0_i32 = arith.constant 0 : i32
    %c0_i32_0 = arith.constant 0 : i32
    %c0_i32_1 = arith.constant 0 : i32
    return %c0_i32, %c0_i32_0 : i32, i32
  }
  func.func @transform_5(%arg0: i32) -> (i32, i32) {
    %c0_i32 = arith.constant 0 : i32
    %c0_i32_0 = arith.constant 0 : i32
    %c0_i32_1 = arith.constant 0 : i32
    return %c0_i32, %c0_i32_0 : i32, i32
  }
  func.func @transform_6(%arg0: i32) -> (i32, i32) {
    %c0_i32 = arith.constant 0 : i32
    %c0_i32_0 = arith.constant 0 : i32
    %c0_i32_1 = arith.constant 0 : i32
    return %c0_i32, %c0_i32_0 : i32, i32
  }
  func.func @transform_7(%arg0: i32) -> (i32, i32) {
    %c0_i32 = arith.constant 0 : i32
    %c0_i32_0 = arith.constant 0 : i32
    %c0_i32_1 = arith.constant 0 : i32
    return %c0_i32, %c0_i32_0 : i32, i32
  }
  func.func @transform_8(%arg0: i32) -> (i32, i32) {
    %c0_i32 = arith.constant 0 : i32
    %c0_i32_0 = arith.constant 0 : i32
    %c0_i32_1 = arith.constant 0 : i32
    return %c0_i32, %c0_i32_0 : i32, i32
  }
  func.func @transform_9(%arg0: i32) -> (i32, i32) {
    %c0_i32 = arith.constant 0 : i32
    %c0_i32_0 = arith.constant 0 : i32
    return %arg0, %c0_i32 : i32, i32
  }
  func.func @transform_10(%arg0: i32) -> (i32, i32) {
    %c0_i32 = arith.constant 0 : i32
    %c0_i32_0 = arith.constant 0 : i32
    return %arg0, %c0_i32 : i32, i32
  }
}

module attributes {stable_mosaic.version = 11 : i64} {
  func.func @classifier_kernel(%arg0: i32, %arg1: memref<1x32x32xbf16, #tpu.memory_space<vmem>>, %arg2: memref<4x1xi32, #tpu.memory_space<vmem>>, %arg3: memref<32x128xbf16, #tpu.memory_space<vmem>>, %arg4: memref<32x128xbf16, #tpu.memory_space<vmem>>, %arg5: memref<1x128xf32, #tpu.memory_space<vmem>>, %arg6: memref<1x32xf32, #tpu.memory_space<vmem>>, %arg7: memref<1x1xf32, #tpu.memory_space<vmem>>, %arg8: memref<32x1xf32, #tpu.memory_space<vmem>>, %arg9: memref<1x1xf32, #tpu.memory_space<vmem>>, %arg10: memref<4x1xf32, #tpu.memory_space<vmem>>, %arg11: memref<4x8xf32, #tpu.memory_space<vmem>>, %arg12: memref<32x128xf32, #tpu.memory_space<vmem>>, %arg13: memref<8x4x32xf32, #tpu.memory_space<vmem>>) attributes {dimension_semantics = [#tpu.dimension_semantics<parallel>], iteration_bounds = array<i64: 1>, scalar_prefetch = 0 : i64, scratch_operands = 2 : i64, tpu.core_type = #tpu.core_type<tc>, window_params = [{transform_indices = @transform_0, window_bounds = array<i64: 1, 32, 32>}, {transform_indices = @transform_1, window_bounds = array<i64: 4, 1>}, {pipeline_mode = #tpu.pipeline_mode<synchronous>, transform_indices = @transform_2, window_bounds = array<i64: 32, 128>}, {pipeline_mode = #tpu.pipeline_mode<synchronous>, transform_indices = @transform_3, window_bounds = array<i64: 32, 128>}, {pipeline_mode = #tpu.pipeline_mode<synchronous>, transform_indices = @transform_4, window_bounds = array<i64: 1, 128>}, {pipeline_mode = #tpu.pipeline_mode<synchronous>, transform_indices = @transform_5, window_bounds = array<i64: 1, 32>}, {pipeline_mode = #tpu.pipeline_mode<synchronous>, transform_indices = @transform_6, window_bounds = array<i64: 1, 1>}, {pipeline_mode = #tpu.pipeline_mode<synchronous>, transform_indices = @transform_7, window_bounds = array<i64: 32, 1>}, {pipeline_mode = #tpu.pipeline_mode<synchronous>, transform_indices = @transform_8, window_bounds = array<i64: 1, 1>}, {transform_indices = @transform_9, window_bounds = array<i64: 4, 1>}, {transform_indices = @transform_10, window_bounds = array<i64: 4, 8>}]} {
    %c0 = arith.constant 0 : index
    %c0_0 = arith.constant 0 : index
    %0 = vector.load %arg2[%c0, %c0_0] : memref<4x1xi32, #tpu.memory_space<vmem>>, vector<4x1xi32>
    %c0_1 = arith.constant 0 : index
    %c0_2 = arith.constant 0 : index
    %1 = vector.load %arg4[%c0_1, %c0_2] : memref<32x128xbf16, #tpu.memory_space<vmem>>, vector<32x128xbf16>
    %c0_3 = arith.constant 0 : index
    %c0_4 = arith.constant 0 : index
    %c0_5 = arith.constant 0 : index
    %2 = vector.load %arg1[%c0_3, %c0_4, %c0_5] : memref<1x32x32xbf16, #tpu.memory_space<vmem>>, vector<1x32x32xbf16>
    %3 = vector.shape_cast %2 : vector<1x32x32xbf16> to vector<32x32xbf16>
    %c0_6 = arith.constant 0 : index
    %c0_7 = arith.constant 0 : index
    %4 = vector.load %arg3[%c0_6, %c0_7] : memref<32x128xbf16, #tpu.memory_space<vmem>>, vector<32x128xbf16>
    %cst = arith.constant dense<0.000000e+00> : vector<32x128xf32>
    %5 = tpu.matmul %3, %4, %cst {dimension_numbers = #tpu.dot_dimension_numbers<[1], [0], [0], [1], [0, 0, 1, 1], [], []>} : vector<32x32xbf16>, vector<32x128xbf16>, vector<32x128xf32> -> vector<32x128xf32>
    %c0_8 = arith.constant 0 : index
    %c0_9 = arith.constant 0 : index
    %6 = vector.load %arg5[%c0_8, %c0_9] : memref<1x128xf32, #tpu.memory_space<vmem>>, vector<1x128xf32>
    %7 = vector.broadcast %6 : vector<1x128xf32> to vector<32x128xf32>
    %8 = arith.addf %5, %7 : vector<32x128xf32>
    %c0_10 = arith.constant 0 : index
    %c0_11 = arith.constant 0 : index
    %9 = vector.load %arg12[%c0_10, %c0_11] : memref<32x128xf32, #tpu.memory_space<vmem>>, vector<32x128xf32>
    tpu.vector_store %arg12[%c0_10, %c0_11], %8 {strides = array<i32>} : memref<32x128xf32, #tpu.memory_space<vmem>>, vector<32x128xf32>,
    %cst_12 = arith.constant 0.000000e+00 : f32
    %10 = vector.broadcast %cst_12 : f32 to vector<4x32xf32>
    %cst_13 = arith.constant 0.000000e+00 : f32
    %11 = vector.broadcast %cst_13 : f32 to vector<4x32xf32>
    %c0_i32 = arith.constant 0 : i32
    %c4_i32 = arith.constant 4 : i32
    %12 = arith.muli %c0_i32, %c4_i32 : i32
    %13 = tpu.assume_multiple %12, 4 : i32
    %14 = arith.index_cast %13 : i32 to index
    %c0_14 = arith.constant 0 : index
    %15 = vector.load %arg12[%14, %c0_14] : memref<32x128xf32, #tpu.memory_space<vmem>>, vector<4x128xf32>
    %16 = arith.truncf %10 : vector<4x32xf32> to vector<4x32xbf16>
    %cst_15 = arith.constant dense<0.000000e+00> : vector<4x128xf32>
    %17 = tpu.matmul %16, %1, %cst_15 {dimension_numbers = #tpu.dot_dimension_numbers<[1], [0], [0], [1], [0, 0, 1, 1], [], []>} : vector<4x32xbf16>, vector<32x128xbf16>, vector<4x128xf32> -> vector<4x128xf32>
    %18 = arith.addf %15, %17 : vector<4x128xf32>
    %19 = vector.extract_strided_slice %18 {offsets = [0, 0], sizes = [4, 32], strides = [1, 1]} : vector<4x128xf32> to vector<4x32xf32>
    %20 = arith.negf %19 : vector<4x32xf32>
    %21 = math.exp %20 : vector<4x32xf32>
    %cst_16 = arith.constant 1.000000e+00 : f32
    %22 = vector.broadcast %cst_16 : f32 to vector<4x32xf32>
    %23 = arith.addf %22, %21 : vector<4x32xf32>
    %24 = arith.divf %22, %23 : vector<4x32xf32>
    %25 = vector.extract_strided_slice %18 {offsets = [0, 32], sizes = [4, 32], strides = [1, 1]} : vector<4x128xf32> to vector<4x32xf32>
    %26 = arith.negf %25 : vector<4x32xf32>
    %27 = math.exp %26 : vector<4x32xf32>
    %cst_17 = arith.constant 1.000000e+00 : f32
    %28 = vector.broadcast %cst_17 : f32 to vector<4x32xf32>
    %29 = arith.addf %28, %27 : vector<4x32xf32>
    %30 = arith.divf %28, %29 : vector<4x32xf32>
    %31 = vector.extract_strided_slice %18 {offsets = [0, 64], sizes = [4, 32], strides = [1, 1]} : vector<4x128xf32> to vector<4x32xf32>
    %32 = math.tanh %31 : vector<4x32xf32>
    %33 = vector.extract_strided_slice %18 {offsets = [0, 96], sizes = [4, 32], strides = [1, 1]} : vector<4x128xf32> to vector<4x32xf32>
    %34 = arith.negf %33 : vector<4x32xf32>
    %35 = math.exp %34 : vector<4x32xf32>
    %cst_18 = arith.constant 1.000000e+00 : f32
    %36 = vector.broadcast %cst_18 : f32 to vector<4x32xf32>
    %37 = arith.addf %36, %35 : vector<4x32xf32>
    %38 = arith.divf %36, %37 : vector<4x32xf32>
    %39 = arith.mulf %30, %11 : vector<4x32xf32>
    %40 = arith.mulf %24, %32 : vector<4x32xf32>
    %41 = arith.addf %39, %40 : vector<4x32xf32>
    %42 = math.tanh %41 : vector<4x32xf32>
    %43 = arith.mulf %38, %42 : vector<4x32xf32>
    %44 = vector.broadcast %c0_i32 : i32 to vector<4x1xi32>
    %45 = arith.cmpi slt, %44, %0 : vector<4x1xi32>
    %cst_19 = arith.constant 0.000000e+00 : f32
    %46 = vector.shape_cast %45 : vector<4x1xi1> to vector<4x1xi1>
    %47 = vector.broadcast %46 : vector<4x1xi1> to vector<4x32xi1>
    %48 = vector.broadcast %cst_19 : f32 to vector<4x32xf32>
    %49 = arith.select %47, %43, %48 : vector<4x32xi1>, vector<4x32xf32>
    %50 = arith.index_cast %c0_i32 : i32 to index
    %c0_20 = arith.constant 0 : index
    %c0_21 = arith.constant 0 : index
    %51 = vector.load %arg13[%50, %c0_20, %c0_21] : memref<8x4x32xf32, #tpu.memory_space<vmem>>, vector<1x4x32xf32>
    %52 = vector.shape_cast %51 : vector<1x4x32xf32> to vector<4x32xf32>
    %53 = vector.shape_cast %49 : vector<4x32xf32> to vector<1x4x32xf32>
    tpu.vector_store %arg13[%50, %c0_20, %c0_21], %53 {strides = array<i32>} : memref<8x4x32xf32, #tpu.memory_space<vmem>>, vector<1x4x32xf32>,
    %54 = vector.shape_cast %45 : vector<4x1xi1> to vector<4x1xi1>
    %55 = vector.broadcast %54 : vector<4x1xi1> to vector<4x32xi1>
    %56 = arith.select %55, %43, %10 : vector<4x32xi1>, vector<4x32xf32>
    %57 = vector.shape_cast %45 : vector<4x1xi1> to vector<4x1xi1>
    %58 = vector.broadcast %57 : vector<4x1xi1> to vector<4x32xi1>
    %59 = arith.select %58, %41, %11 : vector<4x32xi1>, vector<4x32xf32>
    %c1_i32 = arith.constant 1 : i32
    %c4_i32_22 = arith.constant 4 : i32
    %60 = arith.muli %c1_i32, %c4_i32_22 : i32
    %61 = tpu.assume_multiple %60, 4 : i32
    %62 = arith.index_cast %61 : i32 to index
    %c0_23 = arith.constant 0 : index
    %63 = vector.load %arg12[%62, %c0_23] : memref<32x128xf32, #tpu.memory_space<vmem>>, vector<4x128xf32>
    %64 = arith.truncf %56 : vector<4x32xf32> to vector<4x32xbf16>
    %cst_24 = arith.constant dense<0.000000e+00> : vector<4x128xf32>
    %65 = tpu.matmul %64, %1, %cst_24 {dimension_numbers = #tpu.dot_dimension_numbers<[1], [0], [0], [1], [0, 0, 1, 1], [], []>} : vector<4x32xbf16>, vector<32x128xbf16>, vector<4x128xf32> -> vector<4x128xf32>
    %66 = arith.addf %63, %65 : vector<4x128xf32>
    %67 = vector.extract_strided_slice %66 {offsets = [0, 0], sizes = [4, 32], strides = [1, 1]} : vector<4x128xf32> to vector<4x32xf32>
    %68 = arith.negf %67 : vector<4x32xf32>
    %69 = math.exp %68 : vector<4x32xf32>
    %cst_25 = arith.constant 1.000000e+00 : f32
    %70 = vector.broadcast %cst_25 : f32 to vector<4x32xf32>
    %71 = arith.addf %70, %69 : vector<4x32xf32>
    %72 = arith.divf %70, %71 : vector<4x32xf32>
    %73 = vector.extract_strided_slice %66 {offsets = [0, 32], sizes = [4, 32], strides = [1, 1]} : vector<4x128xf32> to vector<4x32xf32>
    %74 = arith.negf %73 : vector<4x32xf32>
    %75 = math.exp %74 : vector<4x32xf32>
    %cst_26 = arith.constant 1.000000e+00 : f32
    %76 = vector.broadcast %cst_26 : f32 to vector<4x32xf32>
    %77 = arith.addf %76, %75 : vector<4x32xf32>
    %78 = arith.divf %76, %77 : vector<4x32xf32>
    %79 = vector.extract_strided_slice %66 {offsets = [0, 64], sizes = [4, 32], strides = [1, 1]} : vector<4x128xf32> to vector<4x32xf32>
    %80 = math.tanh %79 : vector<4x32xf32>
    %81 = vector.extract_strided_slice %66 {offsets = [0, 96], sizes = [4, 32], strides = [1, 1]} : vector<4x128xf32> to vector<4x32xf32>
    %82 = arith.negf %81 : vector<4x32xf32>
    %83 = math.exp %82 : vector<4x32xf32>
    %cst_27 = arith.constant 1.000000e+00 : f32
    %84 = vector.broadcast %cst_27 : f32 to vector<4x32xf32>
    %85 = arith.addf %84, %83 : vector<4x32xf32>
    %86 = arith.divf %84, %85 : vector<4x32xf32>
    %87 = arith.mulf %78, %59 : vector<4x32xf32>
    %88 = arith.mulf %72, %80 : vector<4x32xf32>
    %89 = arith.addf %87, %88 : vector<4x32xf32>
    %90 = math.tanh %89 : vector<4x32xf32>
    %91 = arith.mulf %86, %90 : vector<4x32xf32>
    %92 = vector.broadcast %c1_i32 : i32 to vector<4x1xi32>
    %93 = arith.cmpi slt, %92, %0 : vector<4x1xi32>
    %cst_28 = arith.constant 0.000000e+00 : f32
    %94 = vector.shape_cast %93 : vector<4x1xi1> to vector<4x1xi1>
    %95 = vector.broadcast %94 : vector<4x1xi1> to vector<4x32xi1>
    %96 = vector.broadcast %cst_28 : f32 to vector<4x32xf32>
    %97 = arith.select %95, %91, %96 : vector<4x32xi1>, vector<4x32xf32>
    %98 = arith.index_cast %c1_i32 : i32 to index
    %c0_29 = arith.constant 0 : index
    %c0_30 = arith.constant 0 : index
    %99 = vector.load %arg13[%98, %c0_29, %c0_30] : memref<8x4x32xf32, #tpu.memory_space<vmem>>, vector<1x4x32xf32>
    %100 = vector.shape_cast %99 : vector<1x4x32xf32> to vector<4x32xf32>
    %101 = vector.shape_cast %97 : vector<4x32xf32> to vector<1x4x32xf32>
    tpu.vector_store %arg13[%98, %c0_29, %c0_30], %101 {strides = array<i32>} : memref<8x4x32xf32, #tpu.memory_space<vmem>>, vector<1x4x32xf32>,
    %102 = vector.shape_cast %93 : vector<4x1xi1> to vector<4x1xi1>
    %103 = vector.broadcast %102 : vector<4x1xi1> to vector<4x32xi1>
    %104 = arith.select %103, %91, %56 : vector<4x32xi1>, vector<4x32xf32>
    %105 = vector.shape_cast %93 : vector<4x1xi1> to vector<4x1xi1>
    %106 = vector.broadcast %105 : vector<4x1xi1> to vector<4x32xi1>
    %107 = arith.select %106, %89, %59 : vector<4x32xi1>, vector<4x32xf32>
    %c2_i32 = arith.constant 2 : i32
    %c4_i32_31 = arith.constant 4 : i32
    %108 = arith.muli %c2_i32, %c4_i32_31 : i32
    %109 = tpu.assume_multiple %108, 4 : i32
    %110 = arith.index_cast %109 : i32 to index
    %c0_32 = arith.constant 0 : index
    %111 = vector.load %arg12[%110, %c0_32] : memref<32x128xf32, #tpu.memory_space<vmem>>, vector<4x128xf32>
    %112 = arith.truncf %104 : vector<4x32xf32> to vector<4x32xbf16>
    %cst_33 = arith.constant dense<0.000000e+00> : vector<4x128xf32>
    %113 = tpu.matmul %112, %1, %cst_33 {dimension_numbers = #tpu.dot_dimension_numbers<[1], [0], [0], [1], [0, 0, 1, 1], [], []>} : vector<4x32xbf16>, vector<32x128xbf16>, vector<4x128xf32> -> vector<4x128xf32>
    %114 = arith.addf %111, %113 : vector<4x128xf32>
    %115 = vector.extract_strided_slice %114 {offsets = [0, 0], sizes = [4, 32], strides = [1, 1]} : vector<4x128xf32> to vector<4x32xf32>
    %116 = arith.negf %115 : vector<4x32xf32>
    %117 = math.exp %116 : vector<4x32xf32>
    %cst_34 = arith.constant 1.000000e+00 : f32
    %118 = vector.broadcast %cst_34 : f32 to vector<4x32xf32>
    %119 = arith.addf %118, %117 : vector<4x32xf32>
    %120 = arith.divf %118, %119 : vector<4x32xf32>
    %121 = vector.extract_strided_slice %114 {offsets = [0, 32], sizes = [4, 32], strides = [1, 1]} : vector<4x128xf32> to vector<4x32xf32>
    %122 = arith.negf %121 : vector<4x32xf32>
    %123 = math.exp %122 : vector<4x32xf32>
    %cst_35 = arith.constant 1.000000e+00 : f32
    %124 = vector.broadcast %cst_35 : f32 to vector<4x32xf32>
    %125 = arith.addf %124, %123 : vector<4x32xf32>
    %126 = arith.divf %124, %125 : vector<4x32xf32>
    %127 = vector.extract_strided_slice %114 {offsets = [0, 64], sizes = [4, 32], strides = [1, 1]} : vector<4x128xf32> to vector<4x32xf32>
    %128 = math.tanh %127 : vector<4x32xf32>
    %129 = vector.extract_strided_slice %114 {offsets = [0, 96], sizes = [4, 32], strides = [1, 1]} : vector<4x128xf32> to vector<4x32xf32>
    %130 = arith.negf %129 : vector<4x32xf32>
    %131 = math.exp %130 : vector<4x32xf32>
    %cst_36 = arith.constant 1.000000e+00 : f32
    %132 = vector.broadcast %cst_36 : f32 to vector<4x32xf32>
    %133 = arith.addf %132, %131 : vector<4x32xf32>
    %134 = arith.divf %132, %133 : vector<4x32xf32>
    %135 = arith.mulf %126, %107 : vector<4x32xf32>
    %136 = arith.mulf %120, %128 : vector<4x32xf32>
    %137 = arith.addf %135, %136 : vector<4x32xf32>
    %138 = math.tanh %137 : vector<4x32xf32>
    %139 = arith.mulf %134, %138 : vector<4x32xf32>
    %140 = vector.broadcast %c2_i32 : i32 to vector<4x1xi32>
    %141 = arith.cmpi slt, %140, %0 : vector<4x1xi32>
    %cst_37 = arith.constant 0.000000e+00 : f32
    %142 = vector.shape_cast %141 : vector<4x1xi1> to vector<4x1xi1>
    %143 = vector.broadcast %142 : vector<4x1xi1> to vector<4x32xi1>
    %144 = vector.broadcast %cst_37 : f32 to vector<4x32xf32>
    %145 = arith.select %143, %139, %144 : vector<4x32xi1>, vector<4x32xf32>
    %146 = arith.index_cast %c2_i32 : i32 to index
    %c0_38 = arith.constant 0 : index
    %c0_39 = arith.constant 0 : index
    %147 = vector.load %arg13[%146, %c0_38, %c0_39] : memref<8x4x32xf32, #tpu.memory_space<vmem>>, vector<1x4x32xf32>
    %148 = vector.shape_cast %147 : vector<1x4x32xf32> to vector<4x32xf32>
    %149 = vector.shape_cast %145 : vector<4x32xf32> to vector<1x4x32xf32>
    tpu.vector_store %arg13[%146, %c0_38, %c0_39], %149 {strides = array<i32>} : memref<8x4x32xf32, #tpu.memory_space<vmem>>, vector<1x4x32xf32>,
    %150 = vector.shape_cast %141 : vector<4x1xi1> to vector<4x1xi1>
    %151 = vector.broadcast %150 : vector<4x1xi1> to vector<4x32xi1>
    %152 = arith.select %151, %139, %104 : vector<4x32xi1>, vector<4x32xf32>
    %153 = vector.shape_cast %141 : vector<4x1xi1> to vector<4x1xi1>
    %154 = vector.broadcast %153 : vector<4x1xi1> to vector<4x32xi1>
    %155 = arith.select %154, %137, %107 : vector<4x32xi1>, vector<4x32xf32>
    %c3_i32 = arith.constant 3 : i32
    %c4_i32_40 = arith.constant 4 : i32
    %156 = arith.muli %c3_i32, %c4_i32_40 : i32
    %157 = tpu.assume_multiple %156, 4 : i32
    %158 = arith.index_cast %157 : i32 to index
    %c0_41 = arith.constant 0 : index
    %159 = vector.load %arg12[%158, %c0_41] : memref<32x128xf32, #tpu.memory_space<vmem>>, vector<4x128xf32>
    %160 = arith.truncf %152 : vector<4x32xf32> to vector<4x32xbf16>
    %cst_42 = arith.constant dense<0.000000e+00> : vector<4x128xf32>
    %161 = tpu.matmul %160, %1, %cst_42 {dimension_numbers = #tpu.dot_dimension_numbers<[1], [0], [0], [1], [0, 0, 1, 1], [], []>} : vector<4x32xbf16>, vector<32x128xbf16>, vector<4x128xf32> -> vector<4x128xf32>
    %162 = arith.addf %159, %161 : vector<4x128xf32>
    %163 = vector.extract_strided_slice %162 {offsets = [0, 0], sizes = [4, 32], strides = [1, 1]} : vector<4x128xf32> to vector<4x32xf32>
    %164 = arith.negf %163 : vector<4x32xf32>
    %165 = math.exp %164 : vector<4x32xf32>
    %cst_43 = arith.constant 1.000000e+00 : f32
    %166 = vector.broadcast %cst_43 : f32 to vector<4x32xf32>
    %167 = arith.addf %166, %165 : vector<4x32xf32>
    %168 = arith.divf %166, %167 : vector<4x32xf32>
    %169 = vector.extract_strided_slice %162 {offsets = [0, 32], sizes = [4, 32], strides = [1, 1]} : vector<4x128xf32> to vector<4x32xf32>
    %170 = arith.negf %169 : vector<4x32xf32>
    %171 = math.exp %170 : vector<4x32xf32>
    %cst_44 = arith.constant 1.000000e+00 : f32
    %172 = vector.broadcast %cst_44 : f32 to vector<4x32xf32>
    %173 = arith.addf %172, %171 : vector<4x32xf32>
    %174 = arith.divf %172, %173 : vector<4x32xf32>
    %175 = vector.extract_strided_slice %162 {offsets = [0, 64], sizes = [4, 32], strides = [1, 1]} : vector<4x128xf32> to vector<4x32xf32>
    %176 = math.tanh %175 : vector<4x32xf32>
    %177 = vector.extract_strided_slice %162 {offsets = [0, 96], sizes = [4, 32], strides = [1, 1]} : vector<4x128xf32> to vector<4x32xf32>
    %178 = arith.negf %177 : vector<4x32xf32>
    %179 = math.exp %178 : vector<4x32xf32>
    %cst_45 = arith.constant 1.000000e+00 : f32
    %180 = vector.broadcast %cst_45 : f32 to vector<4x32xf32>
    %181 = arith.addf %180, %179 : vector<4x32xf32>
    %182 = arith.divf %180, %181 : vector<4x32xf32>
    %183 = arith.mulf %174, %155 : vector<4x32xf32>
    %184 = arith.mulf %168, %176 : vector<4x32xf32>
    %185 = arith.addf %183, %184 : vector<4x32xf32>
    %186 = math.tanh %185 : vector<4x32xf32>
    %187 = arith.mulf %182, %186 : vector<4x32xf32>
    %188 = vector.broadcast %c3_i32 : i32 to vector<4x1xi32>
    %189 = arith.cmpi slt, %188, %0 : vector<4x1xi32>
    %cst_46 = arith.constant 0.000000e+00 : f32
    %190 = vector.shape_cast %189 : vector<4x1xi1> to vector<4x1xi1>
    %191 = vector.broadcast %190 : vector<4x1xi1> to vector<4x32xi1>
    %192 = vector.broadcast %cst_46 : f32 to vector<4x32xf32>
    %193 = arith.select %191, %187, %192 : vector<4x32xi1>, vector<4x32xf32>
    %194 = arith.index_cast %c3_i32 : i32 to index
    %c0_47 = arith.constant 0 : index
    %c0_48 = arith.constant 0 : index
    %195 = vector.load %arg13[%194, %c0_47, %c0_48] : memref<8x4x32xf32, #tpu.memory_space<vmem>>, vector<1x4x32xf32>
    %196 = vector.shape_cast %195 : vector<1x4x32xf32> to vector<4x32xf32>
    %197 = vector.shape_cast %193 : vector<4x32xf32> to vector<1x4x32xf32>
    tpu.vector_store %arg13[%194, %c0_47, %c0_48], %197 {strides = array<i32>} : memref<8x4x32xf32, #tpu.memory_space<vmem>>, vector<1x4x32xf32>,
    %198 = vector.shape_cast %189 : vector<4x1xi1> to vector<4x1xi1>
    %199 = vector.broadcast %198 : vector<4x1xi1> to vector<4x32xi1>
    %200 = arith.select %199, %187, %152 : vector<4x32xi1>, vector<4x32xf32>
    %201 = vector.shape_cast %189 : vector<4x1xi1> to vector<4x1xi1>
    %202 = vector.broadcast %201 : vector<4x1xi1> to vector<4x32xi1>
    %203 = arith.select %202, %185, %155 : vector<4x32xi1>, vector<4x32xf32>
    %c4_i32_49 = arith.constant 4 : i32
    %c4_i32_50 = arith.constant 4 : i32
    %204 = arith.muli %c4_i32_49, %c4_i32_50 : i32
    %205 = tpu.assume_multiple %204, 4 : i32
    %206 = arith.index_cast %205 : i32 to index
    %c0_51 = arith.constant 0 : index
    %207 = vector.load %arg12[%206, %c0_51] : memref<32x128xf32, #tpu.memory_space<vmem>>, vector<4x128xf32>
    %208 = arith.truncf %200 : vector<4x32xf32> to vector<4x32xbf16>
    %cst_52 = arith.constant dense<0.000000e+00> : vector<4x128xf32>
    %209 = tpu.matmul %208, %1, %cst_52 {dimension_numbers = #tpu.dot_dimension_numbers<[1], [0], [0], [1], [0, 0, 1, 1], [], []>} : vector<4x32xbf16>, vector<32x128xbf16>, vector<4x128xf32> -> vector<4x128xf32>
    %210 = arith.addf %207, %209 : vector<4x128xf32>
    %211 = vector.extract_strided_slice %210 {offsets = [0, 0], sizes = [4, 32], strides = [1, 1]} : vector<4x128xf32> to vector<4x32xf32>
    %212 = arith.negf %211 : vector<4x32xf32>
    %213 = math.exp %212 : vector<4x32xf32>
    %cst_53 = arith.constant 1.000000e+00 : f32
    %214 = vector.broadcast %cst_53 : f32 to vector<4x32xf32>
    %215 = arith.addf %214, %213 : vector<4x32xf32>
    %216 = arith.divf %214, %215 : vector<4x32xf32>
    %217 = vector.extract_strided_slice %210 {offsets = [0, 32], sizes = [4, 32], strides = [1, 1]} : vector<4x128xf32> to vector<4x32xf32>
    %218 = arith.negf %217 : vector<4x32xf32>
    %219 = math.exp %218 : vector<4x32xf32>
    %cst_54 = arith.constant 1.000000e+00 : f32
    %220 = vector.broadcast %cst_54 : f32 to vector<4x32xf32>
    %221 = arith.addf %220, %219 : vector<4x32xf32>
    %222 = arith.divf %220, %221 : vector<4x32xf32>
    %223 = vector.extract_strided_slice %210 {offsets = [0, 64], sizes = [4, 32], strides = [1, 1]} : vector<4x128xf32> to vector<4x32xf32>
    %224 = math.tanh %223 : vector<4x32xf32>
    %225 = vector.extract_strided_slice %210 {offsets = [0, 96], sizes = [4, 32], strides = [1, 1]} : vector<4x128xf32> to vector<4x32xf32>
    %226 = arith.negf %225 : vector<4x32xf32>
    %227 = math.exp %226 : vector<4x32xf32>
    %cst_55 = arith.constant 1.000000e+00 : f32
    %228 = vector.broadcast %cst_55 : f32 to vector<4x32xf32>
    %229 = arith.addf %228, %227 : vector<4x32xf32>
    %230 = arith.divf %228, %229 : vector<4x32xf32>
    %231 = arith.mulf %222, %203 : vector<4x32xf32>
    %232 = arith.mulf %216, %224 : vector<4x32xf32>
    %233 = arith.addf %231, %232 : vector<4x32xf32>
    %234 = math.tanh %233 : vector<4x32xf32>
    %235 = arith.mulf %230, %234 : vector<4x32xf32>
    %236 = vector.broadcast %c4_i32_49 : i32 to vector<4x1xi32>
    %237 = arith.cmpi slt, %236, %0 : vector<4x1xi32>
    %cst_56 = arith.constant 0.000000e+00 : f32
    %238 = vector.shape_cast %237 : vector<4x1xi1> to vector<4x1xi1>
    %239 = vector.broadcast %238 : vector<4x1xi1> to vector<4x32xi1>
    %240 = vector.broadcast %cst_56 : f32 to vector<4x32xf32>
    %241 = arith.select %239, %235, %240 : vector<4x32xi1>, vector<4x32xf32>
    %242 = arith.index_cast %c4_i32_49 : i32 to index
    %c0_57 = arith.constant 0 : index
    %c0_58 = arith.constant 0 : index
    %243 = vector.load %arg13[%242, %c0_57, %c0_58] : memref<8x4x32xf32, #tpu.memory_space<vmem>>, vector<1x4x32xf32>
    %244 = vector.shape_cast %243 : vector<1x4x32xf32> to vector<4x32xf32>
    %245 = vector.shape_cast %241 : vector<4x32xf32> to vector<1x4x32xf32>
    tpu.vector_store %arg13[%242, %c0_57, %c0_58], %245 {strides = array<i32>} : memref<8x4x32xf32, #tpu.memory_space<vmem>>, vector<1x4x32xf32>,
    %246 = vector.shape_cast %237 : vector<4x1xi1> to vector<4x1xi1>
    %247 = vector.broadcast %246 : vector<4x1xi1> to vector<4x32xi1>
    %248 = arith.select %247, %235, %200 : vector<4x32xi1>, vector<4x32xf32>
    %249 = vector.shape_cast %237 : vector<4x1xi1> to vector<4x1xi1>
    %250 = vector.broadcast %249 : vector<4x1xi1> to vector<4x32xi1>
    %251 = arith.select %250, %233, %203 : vector<4x32xi1>, vector<4x32xf32>
    %c5_i32 = arith.constant 5 : i32
    %c4_i32_59 = arith.constant 4 : i32
    %252 = arith.muli %c5_i32, %c4_i32_59 : i32
    %253 = tpu.assume_multiple %252, 4 : i32
    %254 = arith.index_cast %253 : i32 to index
    %c0_60 = arith.constant 0 : index
    %255 = vector.load %arg12[%254, %c0_60] : memref<32x128xf32, #tpu.memory_space<vmem>>, vector<4x128xf32>
    %256 = arith.truncf %248 : vector<4x32xf32> to vector<4x32xbf16>
    %cst_61 = arith.constant dense<0.000000e+00> : vector<4x128xf32>
    %257 = tpu.matmul %256, %1, %cst_61 {dimension_numbers = #tpu.dot_dimension_numbers<[1], [0], [0], [1], [0, 0, 1, 1], [], []>} : vector<4x32xbf16>, vector<32x128xbf16>, vector<4x128xf32> -> vector<4x128xf32>
    %258 = arith.addf %255, %257 : vector<4x128xf32>
    %259 = vector.extract_strided_slice %258 {offsets = [0, 0], sizes = [4, 32], strides = [1, 1]} : vector<4x128xf32> to vector<4x32xf32>
    %260 = arith.negf %259 : vector<4x32xf32>
    %261 = math.exp %260 : vector<4x32xf32>
    %cst_62 = arith.constant 1.000000e+00 : f32
    %262 = vector.broadcast %cst_62 : f32 to vector<4x32xf32>
    %263 = arith.addf %262, %261 : vector<4x32xf32>
    %264 = arith.divf %262, %263 : vector<4x32xf32>
    %265 = vector.extract_strided_slice %258 {offsets = [0, 32], sizes = [4, 32], strides = [1, 1]} : vector<4x128xf32> to vector<4x32xf32>
    %266 = arith.negf %265 : vector<4x32xf32>
    %267 = math.exp %266 : vector<4x32xf32>
    %cst_63 = arith.constant 1.000000e+00 : f32
    %268 = vector.broadcast %cst_63 : f32 to vector<4x32xf32>
    %269 = arith.addf %268, %267 : vector<4x32xf32>
    %270 = arith.divf %268, %269 : vector<4x32xf32>
    %271 = vector.extract_strided_slice %258 {offsets = [0, 64], sizes = [4, 32], strides = [1, 1]} : vector<4x128xf32> to vector<4x32xf32>
    %272 = math.tanh %271 : vector<4x32xf32>
    %273 = vector.extract_strided_slice %258 {offsets = [0, 96], sizes = [4, 32], strides = [1, 1]} : vector<4x128xf32> to vector<4x32xf32>
    %274 = arith.negf %273 : vector<4x32xf32>
    %275 = math.exp %274 : vector<4x32xf32>
    %cst_64 = arith.constant 1.000000e+00 : f32
    %276 = vector.broadcast %cst_64 : f32 to vector<4x32xf32>
    %277 = arith.addf %276, %275 : vector<4x32xf32>
    %278 = arith.divf %276, %277 : vector<4x32xf32>
    %279 = arith.mulf %270, %251 : vector<4x32xf32>
    %280 = arith.mulf %264, %272 : vector<4x32xf32>
    %281 = arith.addf %279, %280 : vector<4x32xf32>
    %282 = math.tanh %281 : vector<4x32xf32>
    %283 = arith.mulf %278, %282 : vector<4x32xf32>
    %284 = vector.broadcast %c5_i32 : i32 to vector<4x1xi32>
    %285 = arith.cmpi slt, %284, %0 : vector<4x1xi32>
    %cst_65 = arith.constant 0.000000e+00 : f32
    %286 = vector.shape_cast %285 : vector<4x1xi1> to vector<4x1xi1>
    %287 = vector.broadcast %286 : vector<4x1xi1> to vector<4x32xi1>
    %288 = vector.broadcast %cst_65 : f32 to vector<4x32xf32>
    %289 = arith.select %287, %283, %288 : vector<4x32xi1>, vector<4x32xf32>
    %290 = arith.index_cast %c5_i32 : i32 to index
    %c0_66 = arith.constant 0 : index
    %c0_67 = arith.constant 0 : index
    %291 = vector.load %arg13[%290, %c0_66, %c0_67] : memref<8x4x32xf32, #tpu.memory_space<vmem>>, vector<1x4x32xf32>
    %292 = vector.shape_cast %291 : vector<1x4x32xf32> to vector<4x32xf32>
    %293 = vector.shape_cast %289 : vector<4x32xf32> to vector<1x4x32xf32>
    tpu.vector_store %arg13[%290, %c0_66, %c0_67], %293 {strides = array<i32>} : memref<8x4x32xf32, #tpu.memory_space<vmem>>, vector<1x4x32xf32>,
    %294 = vector.shape_cast %285 : vector<4x1xi1> to vector<4x1xi1>
    %295 = vector.broadcast %294 : vector<4x1xi1> to vector<4x32xi1>
    %296 = arith.select %295, %283, %248 : vector<4x32xi1>, vector<4x32xf32>
    %297 = vector.shape_cast %285 : vector<4x1xi1> to vector<4x1xi1>
    %298 = vector.broadcast %297 : vector<4x1xi1> to vector<4x32xi1>
    %299 = arith.select %298, %281, %251 : vector<4x32xi1>, vector<4x32xf32>
    %c6_i32 = arith.constant 6 : i32
    %c4_i32_68 = arith.constant 4 : i32
    %300 = arith.muli %c6_i32, %c4_i32_68 : i32
    %301 = tpu.assume_multiple %300, 4 : i32
    %302 = arith.index_cast %301 : i32 to index
    %c0_69 = arith.constant 0 : index
    %303 = vector.load %arg12[%302, %c0_69] : memref<32x128xf32, #tpu.memory_space<vmem>>, vector<4x128xf32>
    %304 = arith.truncf %296 : vector<4x32xf32> to vector<4x32xbf16>
    %cst_70 = arith.constant dense<0.000000e+00> : vector<4x128xf32>
    %305 = tpu.matmul %304, %1, %cst_70 {dimension_numbers = #tpu.dot_dimension_numbers<[1], [0], [0], [1], [0, 0, 1, 1], [], []>} : vector<4x32xbf16>, vector<32x128xbf16>, vector<4x128xf32> -> vector<4x128xf32>
    %306 = arith.addf %303, %305 : vector<4x128xf32>
    %307 = vector.extract_strided_slice %306 {offsets = [0, 0], sizes = [4, 32], strides = [1, 1]} : vector<4x128xf32> to vector<4x32xf32>
    %308 = arith.negf %307 : vector<4x32xf32>
    %309 = math.exp %308 : vector<4x32xf32>
    %cst_71 = arith.constant 1.000000e+00 : f32
    %310 = vector.broadcast %cst_71 : f32 to vector<4x32xf32>
    %311 = arith.addf %310, %309 : vector<4x32xf32>
    %312 = arith.divf %310, %311 : vector<4x32xf32>
    %313 = vector.extract_strided_slice %306 {offsets = [0, 32], sizes = [4, 32], strides = [1, 1]} : vector<4x128xf32> to vector<4x32xf32>
    %314 = arith.negf %313 : vector<4x32xf32>
    %315 = math.exp %314 : vector<4x32xf32>
    %cst_72 = arith.constant 1.000000e+00 : f32
    %316 = vector.broadcast %cst_72 : f32 to vector<4x32xf32>
    %317 = arith.addf %316, %315 : vector<4x32xf32>
    %318 = arith.divf %316, %317 : vector<4x32xf32>
    %319 = vector.extract_strided_slice %306 {offsets = [0, 64], sizes = [4, 32], strides = [1, 1]} : vector<4x128xf32> to vector<4x32xf32>
    %320 = math.tanh %319 : vector<4x32xf32>
    %321 = vector.extract_strided_slice %306 {offsets = [0, 96], sizes = [4, 32], strides = [1, 1]} : vector<4x128xf32> to vector<4x32xf32>
    %322 = arith.negf %321 : vector<4x32xf32>
    %323 = math.exp %322 : vector<4x32xf32>
    %cst_73 = arith.constant 1.000000e+00 : f32
    %324 = vector.broadcast %cst_73 : f32 to vector<4x32xf32>
    %325 = arith.addf %324, %323 : vector<4x32xf32>
    %326 = arith.divf %324, %325 : vector<4x32xf32>
    %327 = arith.mulf %318, %299 : vector<4x32xf32>
    %328 = arith.mulf %312, %320 : vector<4x32xf32>
    %329 = arith.addf %327, %328 : vector<4x32xf32>
    %330 = math.tanh %329 : vector<4x32xf32>
    %331 = arith.mulf %326, %330 : vector<4x32xf32>
    %332 = vector.broadcast %c6_i32 : i32 to vector<4x1xi32>
    %333 = arith.cmpi slt, %332, %0 : vector<4x1xi32>
    %cst_74 = arith.constant 0.000000e+00 : f32
    %334 = vector.shape_cast %333 : vector<4x1xi1> to vector<4x1xi1>
    %335 = vector.broadcast %334 : vector<4x1xi1> to vector<4x32xi1>
    %336 = vector.broadcast %cst_74 : f32 to vector<4x32xf32>
    %337 = arith.select %335, %331, %336 : vector<4x32xi1>, vector<4x32xf32>
    %338 = arith.index_cast %c6_i32 : i32 to index
    %c0_75 = arith.constant 0 : index
    %c0_76 = arith.constant 0 : index
    %339 = vector.load %arg13[%338, %c0_75, %c0_76] : memref<8x4x32xf32, #tpu.memory_space<vmem>>, vector<1x4x32xf32>
    %340 = vector.shape_cast %339 : vector<1x4x32xf32> to vector<4x32xf32>
    %341 = vector.shape_cast %337 : vector<4x32xf32> to vector<1x4x32xf32>
    tpu.vector_store %arg13[%338, %c0_75, %c0_76], %341 {strides = array<i32>} : memref<8x4x32xf32, #tpu.memory_space<vmem>>, vector<1x4x32xf32>,
    %342 = vector.shape_cast %333 : vector<4x1xi1> to vector<4x1xi1>
    %343 = vector.broadcast %342 : vector<4x1xi1> to vector<4x32xi1>
    %344 = arith.select %343, %331, %296 : vector<4x32xi1>, vector<4x32xf32>
    %345 = vector.shape_cast %333 : vector<4x1xi1> to vector<4x1xi1>
    %346 = vector.broadcast %345 : vector<4x1xi1> to vector<4x32xi1>
    %347 = arith.select %346, %329, %299 : vector<4x32xi1>, vector<4x32xf32>
    %c7_i32 = arith.constant 7 : i32
    %c4_i32_77 = arith.constant 4 : i32
    %348 = arith.muli %c7_i32, %c4_i32_77 : i32
    %349 = tpu.assume_multiple %348, 4 : i32
    %350 = arith.index_cast %349 : i32 to index
    %c0_78 = arith.constant 0 : index
    %351 = vector.load %arg12[%350, %c0_78] : memref<32x128xf32, #tpu.memory_space<vmem>>, vector<4x128xf32>
    %352 = arith.truncf %344 : vector<4x32xf32> to vector<4x32xbf16>
    %cst_79 = arith.constant dense<0.000000e+00> : vector<4x128xf32>
    %353 = tpu.matmul %352, %1, %cst_79 {dimension_numbers = #tpu.dot_dimension_numbers<[1], [0], [0], [1], [0, 0, 1, 1], [], []>} : vector<4x32xbf16>, vector<32x128xbf16>, vector<4x128xf32> -> vector<4x128xf32>
    %354 = arith.addf %351, %353 : vector<4x128xf32>
    %355 = vector.extract_strided_slice %354 {offsets = [0, 0], sizes = [4, 32], strides = [1, 1]} : vector<4x128xf32> to vector<4x32xf32>
    %356 = arith.negf %355 : vector<4x32xf32>
    %357 = math.exp %356 : vector<4x32xf32>
    %cst_80 = arith.constant 1.000000e+00 : f32
    %358 = vector.broadcast %cst_80 : f32 to vector<4x32xf32>
    %359 = arith.addf %358, %357 : vector<4x32xf32>
    %360 = arith.divf %358, %359 : vector<4x32xf32>
    %361 = vector.extract_strided_slice %354 {offsets = [0, 32], sizes = [4, 32], strides = [1, 1]} : vector<4x128xf32> to vector<4x32xf32>
    %362 = arith.negf %361 : vector<4x32xf32>
    %363 = math.exp %362 : vector<4x32xf32>
    %cst_81 = arith.constant 1.000000e+00 : f32
    %364 = vector.broadcast %cst_81 : f32 to vector<4x32xf32>
    %365 = arith.addf %364, %363 : vector<4x32xf32>
    %366 = arith.divf %364, %365 : vector<4x32xf32>
    %367 = vector.extract_strided_slice %354 {offsets = [0, 64], sizes = [4, 32], strides = [1, 1]} : vector<4x128xf32> to vector<4x32xf32>
    %368 = math.tanh %367 : vector<4x32xf32>
    %369 = vector.extract_strided_slice %354 {offsets = [0, 96], sizes = [4, 32], strides = [1, 1]} : vector<4x128xf32> to vector<4x32xf32>
    %370 = arith.negf %369 : vector<4x32xf32>
    %371 = math.exp %370 : vector<4x32xf32>
    %cst_82 = arith.constant 1.000000e+00 : f32
    %372 = vector.broadcast %cst_82 : f32 to vector<4x32xf32>
    %373 = arith.addf %372, %371 : vector<4x32xf32>
    %374 = arith.divf %372, %373 : vector<4x32xf32>
    %375 = arith.mulf %366, %347 : vector<4x32xf32>
    %376 = arith.mulf %360, %368 : vector<4x32xf32>
    %377 = arith.addf %375, %376 : vector<4x32xf32>
    %378 = math.tanh %377 : vector<4x32xf32>
    %379 = arith.mulf %374, %378 : vector<4x32xf32>
    %380 = vector.broadcast %c7_i32 : i32 to vector<4x1xi32>
    %381 = arith.cmpi slt, %380, %0 : vector<4x1xi32>
    %cst_83 = arith.constant 0.000000e+00 : f32
    %382 = vector.shape_cast %381 : vector<4x1xi1> to vector<4x1xi1>
    %383 = vector.broadcast %382 : vector<4x1xi1> to vector<4x32xi1>
    %384 = vector.broadcast %cst_83 : f32 to vector<4x32xf32>
    %385 = arith.select %383, %379, %384 : vector<4x32xi1>, vector<4x32xf32>
    %386 = arith.index_cast %c7_i32 : i32 to index
    %c0_84 = arith.constant 0 : index
    %c0_85 = arith.constant 0 : index
    %387 = vector.load %arg13[%386, %c0_84, %c0_85] : memref<8x4x32xf32, #tpu.memory_space<vmem>>, vector<1x4x32xf32>
    %388 = vector.shape_cast %387 : vector<1x4x32xf32> to vector<4x32xf32>
    %389 = vector.shape_cast %385 : vector<4x32xf32> to vector<1x4x32xf32>
    tpu.vector_store %arg13[%386, %c0_84, %c0_85], %389 {strides = array<i32>} : memref<8x4x32xf32, #tpu.memory_space<vmem>>, vector<1x4x32xf32>,
    %390 = vector.shape_cast %381 : vector<4x1xi1> to vector<4x1xi1>
    %391 = vector.broadcast %390 : vector<4x1xi1> to vector<4x32xi1>
    %392 = arith.select %391, %379, %344 : vector<4x32xi1>, vector<4x32xf32>
    %393 = vector.shape_cast %381 : vector<4x1xi1> to vector<4x1xi1>
    %394 = vector.broadcast %393 : vector<4x1xi1> to vector<4x32xi1>
    %395 = arith.select %394, %377, %347 : vector<4x32xi1>, vector<4x32xf32>
    %c8_i32 = arith.constant 8 : i32
    %c0_86 = arith.constant 0 : index
    %c0_87 = arith.constant 0 : index
    %c0_88 = arith.constant 0 : index
    %396 = vector.load %arg13[%c0_86, %c0_87, %c0_88] : memref<8x4x32xf32, #tpu.memory_space<vmem>>, vector<8x4x32xf32>
    %c0_89 = arith.constant 0 : index
    %c0_90 = arith.constant 0 : index
    %397 = vector.load %arg6[%c0_89, %c0_90] : memref<1x32xf32, #tpu.memory_space<vmem>>, vector<1x32xf32>
    %398 = vector.shape_cast %397 : vector<1x32xf32> to vector<1x1x32xf32>
    %399 = vector.broadcast %398 : vector<1x1x32xf32> to vector<8x4x32xf32>
    %400 = arith.mulf %396, %399 : vector<8x4x32xf32>
    %cst_91 = arith.constant dense<0.000000e+00> : vector<8x4xf32>
    %401 = vector.multi_reduction <add>, %400, %cst_91 [2] : vector<8x4x32xf32> to vector<8x4xf32>
    %c0_92 = arith.constant 0 : index
    %c0_93 = arith.constant 0 : index
    %402 = vector.load %arg7[%c0_92, %c0_93] : memref<1x1xf32, #tpu.memory_space<vmem>>, vector<1x1xf32>
    %403 = vector.broadcast %402 : vector<1x1xf32> to vector<8x4xf32>
    %404 = arith.addf %401, %403 : vector<8x4xf32>
    %405 = math.tanh %404 : vector<8x4xf32>
    %406 = tpu.transpose %405, [1, 0] : vector<8x4xf32> -> vector<4x8xf32>
    %407 = tpu.iota {dimensions = array<i32: 1>} : vector<4x8xi32>
    %408 = vector.broadcast %0 : vector<4x1xi32> to vector<4x8xi32>
    %409 = arith.cmpi slt, %407, %408 : vector<4x8xi32>
    %cst_94 = arith.constant dense<0xFF800000> : vector<4xf32>
    %410 = vector.multi_reduction <maximumf>, %406, %cst_94 [1] : vector<4x8xf32> to vector<4xf32>
    %411 = vector.shape_cast %410 : vector<4xf32> to vector<4x1xf32>
    %412 = vector.broadcast %411 : vector<4x1xf32> to vector<4x8xf32>
    %413 = arith.subf %406, %412 : vector<4x8xf32>
    %414 = math.exp %413 : vector<4x8xf32>
    %cst_95 = arith.constant 0.000000e+00 : f32
    %415 = vector.broadcast %cst_95 : f32 to vector<4x8xf32>
    %416 = arith.select %409, %414, %415 : vector<4x8xi1>, vector<4x8xf32>
    %cst_96 = arith.constant dense<0.000000e+00> : vector<4xf32>
    %417 = vector.multi_reduction <add>, %416, %cst_96 [1] : vector<4x8xf32> to vector<4xf32>
    %418 = vector.shape_cast %417 : vector<4xf32> to vector<4x1xf32>
    %cst_97 = arith.constant 9.99999971E-10 : f32
    %419 = vector.broadcast %cst_97 : f32 to vector<4x1xf32>
    %420 = arith.maximumf %418, %419 : vector<4x1xf32>
    %421 = vector.broadcast %420 : vector<4x1xf32> to vector<4x8xf32>
    %422 = arith.divf %416, %421 : vector<4x8xf32>
    %c0_98 = arith.constant 0 : index
    %c0_99 = arith.constant 0 : index
    %423 = vector.load %arg11[%c0_98, %c0_99] : memref<4x8xf32, #tpu.memory_space<vmem>>, vector<4x8xf32>
    tpu.vector_store %arg11[%c0_98, %c0_99], %422 {strides = array<i32>} : memref<4x8xf32, #tpu.memory_space<vmem>>, vector<4x8xf32>,
    %424 = tpu.transpose %422, [1, 0] : vector<4x8xf32> -> vector<8x4xf32>
    %425 = vector.shape_cast %424 : vector<8x4xf32> to vector<8x4x1xf32>
    %426 = vector.broadcast %425 : vector<8x4x1xf32> to vector<8x4x32xf32>
    %427 = arith.mulf %396, %426 : vector<8x4x32xf32>
    %cst_100 = arith.constant dense<0.000000e+00> : vector<4x32xf32>
    %428 = vector.multi_reduction <add>, %427, %cst_100 [0] : vector<8x4x32xf32> to vector<4x32xf32>
    %c0_101 = arith.constant 0 : index
    %c0_102 = arith.constant 0 : index
    %429 = vector.load %arg8[%c0_101, %c0_102] : memref<32x1xf32, #tpu.memory_space<vmem>>, vector<32x1xf32>
    %cst_103 = arith.constant dense<0.000000e+00> : vector<4x1xf32>
    %430 = tpu.matmul %428, %429, %cst_103 {dimension_numbers = #tpu.dot_dimension_numbers<[1], [0], [0], [1], [0, 0, 1, 1], [], []>} : vector<4x32xf32>, vector<32x1xf32>, vector<4x1xf32> -> vector<4x1xf32>
    %c0_104 = arith.constant 0 : index
    %c0_105 = arith.constant 0 : index
    %431 = vector.load %arg9[%c0_104, %c0_105] : memref<1x1xf32, #tpu.memory_space<vmem>>, vector<1x1xf32>
    %432 = vector.broadcast %431 : vector<1x1xf32> to vector<4x1xf32>
    %433 = arith.addf %430, %432 : vector<4x1xf32>
    %c0_106 = arith.constant 0 : index
    %c0_107 = arith.constant 0 : index
    %434 = vector.load %arg10[%c0_106, %c0_107] : memref<4x1xf32, #tpu.memory_space<vmem>>, vector<4x1xf32>
    tpu.vector_store %arg10[%c0_106, %c0_107], %433 {strides = array<i32>} : memref<4x1xf32, #tpu.memory_space<vmem>>, vector<4x1xf32>,
    return
  }
  func.func @transform_0(%arg0: i32) -> (i32, i32, i32) {
    %c0_i32 = arith.constant 0 : i32
    %c0_i32_0 = arith.constant 0 : i32
    %c0_i32_1 = arith.constant 0 : i32
    return %arg0, %c0_i32, %c0_i32_0 : i32, i32, i32
  }
  func.func @transform_1(%arg0: i32) -> (i32, i32) {
    %c0_i32 = arith.constant 0 : i32
    %c0_i32_0 = arith.constant 0 : i32
    return %arg0, %c0_i32 : i32, i32
  }
  func.func @transform_2(%arg0: i32) -> (i32, i32) {
    %c0_i32 = arith.constant 0 : i32
    %c0_i32_0 = arith.constant 0 : i32
    %c0_i32_1 = arith.constant 0 : i32
    return %c0_i32, %c0_i32_0 : i32, i32
  }
  func.func @transform_3(%arg0: i32) -> (i32, i32) {
    %c0_i32 = arith.constant 0 : i32
    %c0_i32_0 = arith.constant 0 : i32
    %c0_i32_1 = arith.constant 0 : i32
    return %c0_i32, %c0_i32_0 : i32, i32
  }
  func.func @transform_4(%arg0: i32) -> (i32, i32) {
    %c0_i32 = arith.constant 0 : i32
    %c0_i32_0 = arith.constant 0 : i32
    %c0_i32_1 = arith.constant 0 : i32
    return %c0_i32, %c0_i32_0 : i32, i32
  }
  func.func @transform_5(%arg0: i32) -> (i32, i32) {
    %c0_i32 = arith.constant 0 : i32
    %c0_i32_0 = arith.constant 0 : i32
    %c0_i32_1 = arith.constant 0 : i32
    return %c0_i32, %c0_i32_0 : i32, i32
  }
  func.func @transform_6(%arg0: i32) -> (i32, i32) {
    %c0_i32 = arith.constant 0 : i32
    %c0_i32_0 = arith.constant 0 : i32
    %c0_i32_1 = arith.constant 0 : i32
    return %c0_i32, %c0_i32_0 : i32, i32
  }
  func.func @transform_7(%arg0: i32) -> (i32, i32) {
    %c0_i32 = arith.constant 0 : i32
    %c0_i32_0 = arith.constant 0 : i32
    %c0_i32_1 = arith.constant 0 : i32
    return %c0_i32, %c0_i32_0 : i32, i32
  }
  func.func @transform_8(%arg0: i32) -> (i32, i32) {
    %c0_i32 = arith.constant 0 : i32
    %c0_i32_0 = arith.constant 0 : i32
    %c0_i32_1 = arith.constant 0 : i32
    return %c0_i32, %c0_i32_0 : i32, i32
  }
  func.func @transform_9(%arg0: i32) -> (i32, i32) {
    %c0_i32 = arith.constant 0 : i32
    %c0_i32_0 = arith.constant 0 : i32
    return %arg0, %c0_i32 : i32, i32
  }
  func.func @transform_10(%arg0: i32) -> (i32, i32) {
    %c0_i32 = arith.constant 0 : i32
    %c0_i32_0 = arith.constant 0 : i32
    return %arg0, %c0_i32 : i32, i32
  }
}

</mosaic_0001>

<bundles_post_ra>
// kernel: tpu_custom_call.1
= control target key start
LH: loop header
LB: loop body
LE: loop exit
PB: predicated region body
PF: predicated region fallthrough
CT: control target
= control target key end

     0   :  { %s1587_s0 = inlined_call_operand.vmem [shape: bf16[1,32,32], index: 0, kind: input, shape index: {}]   ;;  %s1588_s1 = inlined_call_operand.vmem [shape: s32[4,1], index: 1, kind: input, shape index: {}]   ;;  %s1589_s2 = inlined_call_operand.vmem [shape: bf16[32,128], index: 2, kind: input, shape index: {}]   ;;  %s1590_s3 = inlined_call_operand.hbm [shape: bf16[32,128], index: 3, kind: input, shape index: {}]   ;;  %s1591_s4 = inlined_call_operand.vmem [shape: f32[1,128], index: 4, kind: input, shape index: {}]   ;;  %s1592_s5 = inlined_call_operand.vmem [shape: f32[1,32], index: 5, kind: input, shape index: {}]   ;;  %s1593_s6 = inlined_call_operand.<no memory space> [shape: f32[1,1], index: 6, kind: input, shape index: {}]   ;;  %s1594_s7 = inlined_call_operand.vmem [shape: f32[32,1], index: 7, kind: input, shape index: {}]   ;;  %s1595_s9 = inlined_call_operand.vmem [shape: f32[4,1], index: 9, kind: output, shape index: {0}]   ;;  %s1596_s10 = inlined_call_operand.hbm [shape: f32[4,8], index: 10, kind: output, shape index: {1}]   ;;  %s1597_s8 = inlined_call_operand.<no memory space> [shape: f32[1,1], index: 8, kind: input, shape index: {}]  }
   0x1   :  { %v16_v0 = vstv %s1593_s6  ;;  %v18_v1 = vstv %s1597_s8 }
   0x2   :  { %17 = vst [vmem:[#allocation4] sm:$0x1] %v16_v0 }
   0x3   :  { %19 = vst [vmem:[#allocation5] sm:$0x1] %v18_v1 }
   0x4   :  { %20 = vsyncpa [#allocation7], 0 }
   0x5   :  { %21 = vsyncpa [#allocation8], 0  ;;  %s32_s19 = sshll.u32 %s1590_s3, 4  ;;  %s1259_s20 = smov [#allocation6]   ;;  %s33_s19 = int_to_ptr.hbm [resolvable:$true] %s32_s19 }
   0x6   :  { %s34_s21 = sshll.u32 %s1259_s20, 4  ;;  %s1260_s22 = smov 64   ;;  %s35_s21 = int_to_ptr.vmem [resolvable:$true] %s34_s21 }
   0x7   :  { %s1261_s23 = smov 4  }
   0x8   :  { %40 = dma.hbm_to_vmem [thread:$0]  %s33_s19, 256, %s35_s21, [#allocation7], %s1260_s22, %s1260_s22, %s1261_s23  }
   0x9   :  { %1255 = dma.done.wait [#allocation7], 256  }
   0xa   :  { %1256 = vsyncadd [#allocation7], 4294967040  ;;  %v1262_v2 = vmov 0   ;;  %v1105_v3 = vld [vmem:[%s1589_s2 + $0x8] sm:$0xff]  ;;  %v1104_v5 = vld [vmem:[%s1589_s2] sm:$0xff]  ;;  %vm95_vm0 = vcmask 261120  }
   0xb   :  { %1113 = vset.pattern.permute.xlu1 %v1262_v2  ;;  %1114 = vset.pattern.permute.xlu2 %v1262_v2  ;;  %v1101_v4 = vld [vmem:[#allocation6 + $0x8] sm:$0xff]  ;;  %v1100_v6 = vld [vmem:[#allocation6] sm:$0xff]  ;;  %v1348_v8 = vld [vmem:[%s1591_s4] ss:$0 sm:$0xff]  ;;  %s1263_s4 = smov 32   ;;  %s1046_s20 = sshll.u32 %s1596_s10, 4  ;;  %s1047_s20 = int_to_ptr.hbm [resolvable:$true] %s1046_s20 }
   0xc   :  { %1115 = vset.pattern.permute.xlu0 %v1262_v2  ;;  %108 = vmatpush.bf16.msra.mxu0 %v1105_v3  ;;  %v1102_v7 = vld [vmem:[%s1587_s0] sm:$0xff]  ;;  %s1264_s21 = smov [#allocation9]  }
   0xd   :  { %147 = vmatpush.bf16.msra.mxu1 %v1101_v4  ;;  %221 = vmatpush.bf16.msra.mxu2 %v1101_v4  ;;  %v1357_v37 = vld [vmem:[%s1588_s1] sm:$0xf] }
   0xe   :  { %296 = vmatpush.bf16.msra.mxu3 %v1101_v4  ;;  %vm192_vm5 = vcmp.gt.s32.totalorder %v1357_v37, 0  ;;  %vm266_vm7 = vcmp.gt.s32.totalorder %v1357_v37, 1  ;;  %vm341_vm13 = vcmp.gt.s32.totalorder %v1357_v37, 2 }
   0xf   :  { %v193_v38 = vsel %vm192_vm5, 1, %v1262_v2  ;;  %v267_v53 = vsel %vm266_vm7, 1, %v1262_v2  ;;  %vm491_vm5 = vcmp.gt.s32.totalorder %v1357_v37, 4 }
  0x10   :  { %109 = vmatpush.bf16.msra.mxu0 %v1104_v5 }
  0x11   :  { %148 = vmatpush.bf16.msra.mxu1 %v1100_v6  ;;  %222 = vmatpush.bf16.msra.mxu2 %v1100_v6 }
  0x12   :  { %297 = vmatpush.bf16.msra.mxu3 %v1100_v6 }
  0x13   :  { %1074 = vmatmul.msk.bf16.vlgmr.msra.gmra.mxu0 %vm95_vm0, %v1102_v7 }
  0x14   :  { %149 = vmatmul.bf16.vlgmr.msra.gmra.mxu1 %v1262_v2  ;;  %596 = vmatpush.bf16.msrb.mxu0 %v1101_v4 }
  0x15   :  { %371 = vmatpush.bf16.msrb.mxu1 %v1101_v4  ;;  %446 = vmatpush.bf16.msrb.mxu2 %v1101_v4 }
  0x16   :  { %521 = vmatpush.bf16.msrb.mxu3 %v1101_v4 }
  0x18   :  { %597 = vmatpush.bf16.msrb.mxu0 %v1100_v6 }
  0x19   :  { %372 = vmatpush.bf16.msrb.mxu1 %v1100_v6  ;;  %447 = vmatpush.bf16.msrb.mxu2 %v1100_v6 }
  0x1a   :  { %522 = vmatpush.bf16.msrb.mxu3 %v1100_v6 }
  0x1d   :  { %671 = vmatpush.bf16.msra.mxu1 %v1101_v4 }
  0x21   :  { %672 = vmatpush.bf16.msra.mxu1 %v1100_v6 }
  0x90   :  { %v111_v9 = vpop.f32.mrf.mxu0 }
  0x91   :  { %v150_v10 = vpop.f32.mrf.mxu1  ;;  %v112_v11 = vadd.f32 %v1348_v8, %v111_v9 }
  0x93   :  { %121 = vst [vmem:[#allocation2] sm:$0xff] %v112_v11 }
  0x98   :  { %v113_v12 = vpop.f32.mrf.mxu0 }
  0x99   :  { %v152_v13 = vpop.f32.mrf.mxu1  ;;  %v114_v14 = vadd.f32 %v1348_v8, %v113_v12 }
  0x9a   :  { %v125_v15 = vld [vmem:[#allocation2] sm:$0xf]  ;;  %v207_v45 = vld [vmem:[#allocation2 + $0x4] sm:$0xf] }
  0x9b   :  { %v154_v16 = vadd.f32 %v150_v10, %v125_v15  ;;  %122 = vst [vmem:[#allocation2 + $0x8] sm:$0xff] %v114_v14 }
  0x9d   :  { %1123 = vtanh.f32 %v154_v16  ;;  %v1084_v18 = vmul.f32 -1.442695, %v154_v16 }
  0x9f   :  { %1125 = vpow2.f32 %v1084_v18 }
  0xa2   :  { %v282_v15 = vld [vmem:[#allocation2 + $0x8] sm:$0xf] }
  0xa3   :  { %v1124_v17 = vpop.eup %1123 }
  0xa4   :  { %177 = vrot.lane.b32.xlu0 %v1124_v17, %s1260_s22 }
  0xa5   :  { %v1126_v19 = vpop.eup %1125 }
  0xa6   :  { %v158_v20 = vadd.f32 1.0, %v1126_v19 }
  0xa8   :  { %1127 = vrcp.f32 %v158_v20  ;;  %v170_v26 = vand.u32 2147483648, %v158_v20  ;;  %vm164_vm2 = vweird.f32 %v158_v20  ;;  %v168_v27 = vand.u32 2147483647, %v158_v20 }
  0xaa   :  { %v171_v29 = vor.u32 1.1754944e-38, %v170_v26  ;;  %vm169_vm4 = vcmp.eq.f32.partialorder %v168_v27, 8.507059e+37 }
  0xae   :  { %v1128_v21 = vpop.eup %1127 }
  0xaf   :  { %v160_v22 = vmul.f32 %v1128_v21, %v158_v20  ;;  %vm165_vm1 = vweird.f32 %v1128_v21  ;;  %v342_v20 = vsel %vm341_vm13, 1, %v1262_v2 }
  0xb0   :  { %vm166_vm3 = vmor %vm164_vm2, %vm165_vm1 }
  0xb1   :  { %v161_v23 = vsub.f32 1.0, %v160_v22 }
  0xb3   :  { %v162_v24 = vmul.f32 %v1128_v21, %v161_v23 }
  0xb5   :  { %v163_v25 = vadd.f32 %v1128_v21, %v162_v24 }
  0xb7   :  { %v167_v28 = vsel %vm166_vm3, %v1128_v21, %v163_v25 }
  0xb8   :  { %v172_v31 = vsel %vm169_vm4, %v171_v29, %v167_v28  ;;  %vm416_vm4 = vcmp.gt.s32.totalorder %v1357_v37, 3 }
  0xb9   :  { %v175_v33 = vmul.f32 0.0, %v172_v31 }
 0x116   :  { %v178_v30 = vpop.permute.xlu0 %177 }
 0x117   :  { %v180_v32 = vmul.f32 %v178_v30, %v172_v31 }
 0x119   :  { %182 = vrot.lane.b32.xlu0 %v180_v32, %s1263_s4 }
 0x18b   :  { %v183_v34 = vpop.permute.xlu0 %182 }
 0x18c   :  { %v185_v35 = vadd.f32 %v183_v34, %v175_v33 }
 0x18e   :  { %1129 = vtanh.f32 %v185_v35 }
 0x194   :  { %v1130_v36 = vpop.eup %1129 }
 0x195   :  { %188 = vrot.lane.b32.xlu1 %v1130_v36, %s1260_s22 }
 0x19d   :  { %195 = vperm.xlu1 %1113, %v193_v38  }
 0x207   :  { %v189_v39 = vpop.permute.xlu1 %188 }
 0x208   :  { %v191_v40 = vmul.f32 %v189_v39, %v172_v31 }
 0x20f   :  { %v196_v41 = vpop.permute.xlu1 %195 }
 0x210   :  { %vm197_vm6 = vcmp.eq.s32.totalorder %v196_v41, 1 }
 0x211   :  { %v1363_v42 = vsel %vm197_vm6, %v191_v40, 0.0  ;;  %v205_v3 = vsel %vm197_vm6, %v185_v35, 0.0 }
 0x212   :  { %v208_v43 = vpack.c.bf16 %v1363_v42, %v1363_v42 }
 0x214   :  { %210 = vrot.lane.b32.xlu2 %v208_v43, %s1263_s4 }
 0x26e   :  { %v211_v44 = vpop.permute.xlu2 %210 }
 0x26f   :  { %1085 = vmatmul.msk.bf16.vlgmr.msra.gmra.mxu2 %vm95_vm0, %v211_v44 }
 0x2f2   :  { %v224_v46 = vpop.f32.mrf.mxu2 }
 0x2f3   :  { %v228_v47 = vadd.f32 %v224_v46, %v207_v45 }
 0x2f5   :  { %1131 = vtanh.f32 %v228_v47  ;;  %v1086_v50 = vmul.f32 -1.442695, %v228_v47 }
 0x2f7   :  { %1133 = vpow2.f32 %v1086_v50 }
 0x2fa   :  { %v226_v48 = vpop.f32.mrf.mxu2 }
 0x2fb   :  { %v1132_v49 = vpop.eup %1131 }
 0x2fc   :  { %251 = vrot.lane.b32.xlu2 %v1132_v49, %s1260_s22  ;;  %v357_v49 = vld [vmem:[#allocation2 + $0xc] sm:$0xf] }
 0x2fd   :  { %v1134_v51 = vpop.eup %1133 }
 0x2fe   :  { %v232_v52 = vadd.f32 1.0, %v1134_v51 }
 0x300   :  { %1135 = vrcp.f32 %v232_v52  ;;  %v244_v59 = vand.u32 2147483648, %v232_v52  ;;  %vm238_vm9 = vweird.f32 %v232_v52  ;;  %v242_v60 = vand.u32 2147483647, %v232_v52 }
 0x302   :  { %v245_v62 = vor.u32 1.1754944e-38, %v244_v59  ;;  %vm243_vm11 = vcmp.eq.f32.partialorder %v242_v60, 8.507059e+37 }
 0x304   :  { %269 = vperm.xlu2 %1114, %v267_v53  }
 0x306   :  { %v1136_v54 = vpop.eup %1135 }
 0x307   :  { %v234_v55 = vmul.f32 %v1136_v54, %v232_v52  ;;  %vm239_vm8 = vweird.f32 %v1136_v54 }
 0x308   :  { %vm240_vm10 = vmor %vm238_vm9, %vm239_vm8 }
 0x309   :  { %v235_v56 = vsub.f32 1.0, %v234_v55 }
 0x30b   :  { %v236_v57 = vmul.f32 %v1136_v54, %v235_v56 }
 0x30d   :  { %v237_v58 = vadd.f32 %v1136_v54, %v236_v57  ;;  %v417_v57 = vsel %vm416_vm4, 1, %v1262_v2 }
 0x30f   :  { %v241_v61 = vsel %vm240_vm10, %v1136_v54, %v237_v58  ;;  %v492_v58 = vsel %vm491_vm5, 1, %v1262_v2 }
 0x310   :  { %v246_v0 = vsel %vm243_vm11, %v245_v62, %v241_v61 }
 0x311   :  { %v249_v4 = vmul.f32 %v246_v0, %v205_v3 }
 0x356   :  { %v252_v63 = vpop.permute.xlu2 %251 }
 0x357   :  { %v254_v1 = vmul.f32 %v252_v63, %v246_v0 }
 0x359   :  { %256 = vrot.lane.b32.xlu0 %v254_v1, %s1263_s4 }
 0x35e   :  { %v1375_v9 = vpop.permute.xlu2 %269 }
 0x35f   :  { %vm271_vm12 = vcmp.eq.s32.totalorder %v1375_v9, 1 }
 0x3cb   :  { %v257_v5 = vpop.permute.xlu0 %256 }
 0x3cc   :  { %v259_v6 = vadd.f32 %v257_v5, %v249_v4 }
 0x3ce   :  { %1137 = vtanh.f32 %v259_v6  ;;  %v280_v36 = vsel %vm271_vm12, %v259_v6, %v205_v3 }
 0x3d4   :  { %v1138_v7 = vpop.eup %1137 }
 0x3d5   :  { %262 = vrot.lane.b32.xlu1 %v1138_v7, %s1260_s22 }
 0x447   :  { %v263_v10 = vpop.permute.xlu1 %262 }
 0x448   :  { %v1377_v11 = vmul.f32 %v263_v10, %v246_v0 }
 0x44a   :  { %v279_v12 = vsel %vm271_vm12, %v1377_v11, %v1363_v42 }
 0x44b   :  { %v283_v13 = vpack.c.bf16 %v279_v12, %v279_v12 }
 0x44d   :  { %285 = vrot.lane.b32.xlu0 %v283_v13, %s1263_s4 }
 0x4bf   :  { %v286_v14 = vpop.permute.xlu0 %285 }
 0x4c0   :  { %1087 = vmatmul.msk.bf16.vlgmr.msra.gmra.mxu3 %vm95_vm0, %v286_v14 }
 0x543   :  { %v299_v16 = vpop.f32.mrf.mxu3 }
 0x544   :  { %v303_v17 = vadd.f32 %v299_v16, %v282_v15  ;;  %v1103_v16 = vld [vmem:[%s1587_s0 + $0x8] sm:$0xff] }
 0x545   :  { %1075 = vmatmul.msk.bf16.gmra.mxu0 %vm95_vm0, %v1103_v16 }
 0x546   :  { %1139 = vtanh.f32 %v303_v17  ;;  %v1088_v21 = vmul.f32 -1.442695, %v303_v17 }
 0x548   :  { %1141 = vpow2.f32 %v1088_v21 }
 0x54b   :  { %v301_v18 = vpop.f32.mrf.mxu3 }
 0x54c   :  { %v1140_v19 = vpop.eup %1139 }
 0x54d   :  { %326 = vrot.lane.b32.xlu1 %v1140_v19, %s1260_s22 }
 0x54e   :  { %v1142_v22 = vpop.eup %1141 }
 0x54f   :  { %v307_v23 = vadd.f32 1.0, %v1142_v22 }
 0x551   :  { %1143 = vrcp.f32 %v307_v23  ;;  %v319_v29 = vand.u32 2147483648, %v307_v23  ;;  %vm313_vm15 = vweird.f32 %v307_v23  ;;  %v317_v30 = vand.u32 2147483647, %v307_v23 }
 0x553   :  { %v320_v32 = vor.u32 1.1754944e-38, %v319_v29  ;;  %vm318_vm2 = vcmp.eq.f32.partialorder %v317_v30, 8.507059e+37 }
 0x555   :  { %344 = vperm.xlu1 %1113, %v342_v20  }
 0x557   :  { %v1144_v24 = vpop.eup %1143 }
 0x558   :  { %v309_v25 = vmul.f32 %v1144_v24, %v307_v23  ;;  %vm314_vm14 = vweird.f32 %v1144_v24 }
 0x559   :  { %vm315_vm1 = vmor %vm313_vm15, %vm314_vm14 }
 0x55a   :  { %v310_v26 = vsub.f32 1.0, %v309_v25 }
 0x55c   :  { %v311_v27 = vmul.f32 %v1144_v24, %v310_v26 }
 0x55e   :  { %v312_v28 = vadd.f32 %v1144_v24, %v311_v27 }
 0x560   :  { %v316_v31 = vsel %vm315_vm1, %v1144_v24, %v312_v28 }
 0x561   :  { %v321_v34 = vsel %vm318_vm2, %v320_v32, %v316_v31  ;;  %vm566_vm2 = vcmp.gt.s32.totalorder %v1357_v37, 5 }
 0x562   :  { %v324_v38 = vmul.f32 %v321_v34, %v280_v36 }
 0x5bf   :  { %v327_v33 = vpop.permute.xlu1 %326 }
 0x5c0   :  { %v329_v35 = vmul.f32 %v327_v33, %v321_v34 }
 0x5c2   :  { %331 = vrot.lane.b32.xlu2 %v329_v35, %s1263_s4  ;;  %v116_v22 = vpop.f32.mrf.mxu0 }
 0x5c3   :  { %v117_v23 = vadd.f32 %v1348_v8, %v116_v22 }
 0x5c5   :  { %123 = vst [vmem:[#allocation2 + $0x10] sm:$0xff] %v117_v23 }
 0x5c7   :  { %v1393_v43 = vpop.permute.xlu1 %344 }
 0x5c8   :  { %vm346_vm3 = vcmp.eq.s32.totalorder %v1393_v43, 1 }
 0x5ca   :  { %v118_v24 = vpop.f32.mrf.mxu0 }
 0x5cb   :  { %v119_v25 = vadd.f32 %v1348_v8, %v118_v24 }
 0x5cc   :  { %v432_v27 = vld [vmem:[#allocation2 + $0x10] sm:$0xf] }
 0x5cd   :  { %124 = vst [vmem:[#allocation2 + $0x18] sm:$0xff] %v119_v25 }
 0x61c   :  { %v332_v39 = vpop.permute.xlu2 %331 }
 0x61d   :  { %v334_v40 = vadd.f32 %v332_v39, %v324_v38 }
 0x61f   :  { %1145 = vtanh.f32 %v334_v40  ;;  %v355_v10 = vsel %vm346_vm3, %v334_v40, %v280_v36 }
 0x625   :  { %v1146_v41 = vpop.eup %1145 }
 0x626   :  { %337 = vrot.lane.b32.xlu0 %v1146_v41, %s1260_s22 }
 0x698   :  { %v338_v44 = vpop.permute.xlu0 %337 }
 0x699   :  { %v1395_v45 = vmul.f32 %v338_v44, %v321_v34 }
 0x69b   :  { %v354_v46 = vsel %vm346_vm3, %v1395_v45, %v279_v12 }
 0x69c   :  { %v358_v47 = vpack.c.bf16 %v354_v46, %v354_v46 }
 0x69e   :  { %360 = vrot.lane.b32.xlu2 %v358_v47, %s1263_s4 }
 0x6f8   :  { %v361_v48 = vpop.permute.xlu2 %360 }
 0x6f9   :  { %1089 = vmatmul.msk.bf16.vlgmr.msrb.gmra.mxu1 %vm95_vm0, %v361_v48 }
 0x776   :  { %v374_v50 = vpop.f32.mrf.mxu1 }
 0x777   :  { %v378_v51 = vadd.f32 %v374_v50, %v357_v49 }
 0x779   :  { %1147 = vtanh.f32 %v378_v51  ;;  %v1090_v54 = vmul.f32 -1.442695, %v378_v51 }
 0x77b   :  { %1149 = vpow2.f32 %v1090_v54 }
 0x77e   :  { %v376_v52 = vpop.f32.mrf.mxu1 }
 0x77f   :  { %v1148_v53 = vpop.eup %1147 }
 0x780   :  { %401 = vrot.lane.b32.xlu0 %v1148_v53, %s1260_s22 }
 0x781   :  { %v1150_v55 = vpop.eup %1149 }
 0x782   :  { %v382_v56 = vadd.f32 1.0, %v1150_v55 }
 0x784   :  { %1151 = vrcp.f32 %v382_v56  ;;  %v394_v0 = vand.u32 2147483648, %v382_v56  ;;  %vm388_vm7 = vweird.f32 %v382_v56  ;;  %v392_v1 = vand.u32 2147483647, %v382_v56 }
 0x786   :  { %v395_v4 = vor.u32 1.1754944e-38, %v394_v0  ;;  %vm393_vm9 = vcmp.eq.f32.partialorder %v392_v1, 8.507059e+37 }
 0x788   :  { %419 = vperm.xlu0 %1115, %v417_v57  }
 0x78a   :  { %v1152_v59 = vpop.eup %1151 }
 0x78b   :  { %v384_v60 = vmul.f32 %v1152_v59, %v382_v56  ;;  %vm389_vm6 = vweird.f32 %v1152_v59 }
 0x78c   :  { %vm390_vm8 = vmor %vm388_vm7, %vm389_vm6 }
 0x78d   :  { %v385_v61 = vsub.f32 1.0, %v384_v60 }
 0x78f   :  { %v386_v62 = vmul.f32 %v1152_v59, %v385_v61  ;;  %v507_v61 = vld [vmem:[#allocation2 + $0x14] sm:$0xf] }
 0x790   :  { %494 = vperm.xlu0 %1115, %v492_v58  }
 0x791   :  { %v387_v63 = vadd.f32 %v1152_v59, %v386_v62 }
 0x793   :  { %v391_v3 = vsel %vm390_vm8, %v1152_v59, %v387_v63 }
 0x794   :  { %v396_v6 = vsel %vm393_vm9, %v395_v4, %v391_v3  ;;  %v567_v3 = vsel %vm566_vm2, 1, %v1262_v2  ;;  %vm641_vm9 = vcmp.gt.s32.totalorder %v1357_v37, 6 }
 0x795   :  { %v399_v12 = vmul.f32 %v396_v6, %v355_v10 }
 0x7f2   :  { %v402_v5 = vpop.permute.xlu0 %401 }
 0x7f3   :  { %v404_v7 = vmul.f32 %v402_v5, %v396_v6 }
 0x7f5   :  { %406 = vrot.lane.b32.xlu1 %v404_v7, %s1263_s4 }
 0x7fa   :  { %v1416_v17 = vpop.permute.xlu0 %419 }
 0x7fb   :  { %vm421_vm10 = vcmp.eq.s32.totalorder %v1416_v17, 1  ;;  %v1120_v17 = vld [vmem:[%s1592_s5] ss:$0 sm:$0xff] }
 0x802   :  { %v1433_v55 = vpop.permute.xlu0 %494 }
 0x803   :  { %vm496_vm1 = vcmp.eq.s32.totalorder %v1433_v55, 1 }
 0x867   :  { %v407_v13 = vpop.permute.xlu1 %406 }
 0x868   :  { %v409_v14 = vadd.f32 %v407_v13, %v399_v12 }
 0x86a   :  { %1153 = vtanh.f32 %v409_v14  ;;  %v430_v50 = vsel %vm421_vm10, %v409_v14, %v355_v10 }
 0x870   :  { %v1154_v15 = vpop.eup %1153 }
 0x871   :  { %412 = vrot.lane.b32.xlu2 %v1154_v15, %s1260_s22 }
 0x8cb   :  { %v413_v18 = vpop.permute.xlu2 %412 }
 0x8cc   :  { %v1418_v19 = vmul.f32 %v413_v18, %v396_v6 }
 0x8ce   :  { %v429_v20 = vsel %vm421_vm10, %v1418_v19, %v354_v46 }
 0x8cf   :  { %v433_v21 = vpack.c.bf16 %v429_v20, %v429_v20 }
 0x8d1   :  { %435 = vrot.lane.b32.xlu1 %v433_v21, %s1263_s4 }
 0x943   :  { %v436_v26 = vpop.permute.xlu1 %435 }
 0x944   :  { %1091 = vmatmul.msk.bf16.vlgmr.msrb.gmra.mxu2 %vm95_vm0, %v436_v26 }
 0x9c7   :  { %v449_v28 = vpop.f32.mrf.mxu2 }
 0x9c8   :  { %v453_v29 = vadd.f32 %v449_v28, %v432_v27 }
 0x9ca   :  { %1155 = vtanh.f32 %v453_v29  ;;  %v1092_v32 = vmul.f32 -1.442695, %v453_v29 }
 0x9cc   :  { %1157 = vpow2.f32 %v1092_v32 }
 0x9cf   :  { %v451_v30 = vpop.f32.mrf.mxu2 }
 0x9d0   :  { %v1156_v31 = vpop.eup %1155 }
 0x9d1   :  { %476 = vrot.lane.b32.xlu2 %v1156_v31, %s1260_s22 }
 0x9d2   :  { %v1158_v33 = vpop.eup %1157 }
 0x9d3   :  { %v457_v34 = vadd.f32 1.0, %v1158_v33 }
 0x9d5   :  { %1159 = vrcp.f32 %v457_v34  ;;  %v469_v40 = vand.u32 2147483648, %v457_v34  ;;  %vm463_vm13 = vweird.f32 %v457_v34  ;;  %v467_v41 = vand.u32 2147483647, %v457_v34 }
 0x9d7   :  { %v470_v46 = vor.u32 1.1754944e-38, %v469_v40  ;;  %vm468_vm15 = vcmp.eq.f32.partialorder %v467_v41, 8.507059e+37  ;;  %v642_v40 = vsel %vm641_vm9, 1, %v1262_v2  ;;  %vm818_vm9 = vcmask 1043459  }
 0x9db   :  { %v1160_v35 = vpop.eup %1159 }
 0x9dc   :  { %v459_v36 = vmul.f32 %v1160_v35, %v457_v34  ;;  %vm464_vm11 = vweird.f32 %v1160_v35 }
 0x9dd   :  { %vm465_vm14 = vmor %vm463_vm13, %vm464_vm11 }
 0x9de   :  { %v460_v8 = vsub.f32 1.0, %v459_v36 }
 0x9e0   :  { %v461_v38 = vmul.f32 %v1160_v35, %v460_v8 }
 0x9e2   :  { %v462_v39 = vadd.f32 %v1160_v35, %v461_v38 }
 0x9e4   :  { %v466_v44 = vsel %vm465_vm14, %v1160_v35, %v462_v39  ;;  %v582_v35 = vld [vmem:[#allocation2 + $0x18] sm:$0xf] }
 0x9e5   :  { %v471_v48 = vsel %vm468_vm15, %v470_v46, %v466_v44 }
 0x9e6   :  { %v474_v51 = vmul.f32 %v471_v48, %v430_v50 }
 0xa2b   :  { %v477_v47 = vpop.permute.xlu2 %476 }
 0xa2c   :  { %v479_v49 = vmul.f32 %v477_v47, %v471_v48 }
 0xa2e   :  { %481 = vrot.lane.b32.xlu1 %v479_v49, %s1263_s4 }
 0xaa0   :  { %v482_v52 = vpop.permute.xlu1 %481 }
 0xaa1   :  { %v484_v53 = vadd.f32 %v482_v52, %v474_v51 }
 0xaa3   :  { %1161 = vtanh.f32 %v484_v53  ;;  %v505_v24 = vsel %vm496_vm1, %v484_v53, %v430_v50 }
 0xaa9   :  { %v1162_v54 = vpop.eup %1161 }
 0xaaa   :  { %487 = vrot.lane.b32.xlu2 %v1162_v54, %s1260_s22 }
 0xb04   :  { %v488_v56 = vpop.permute.xlu2 %487 }
 0xb05   :  { %v1435_v57 = vmul.f32 %v488_v56, %v471_v48 }
 0xb07   :  { %v504_v58 = vsel %vm496_vm1, %v1435_v57, %v429_v20 }
 0xb08   :  { %v508_v59 = vpack.c.bf16 %v504_v58, %v504_v58 }
 0xb0a   :  { %510 = vrot.lane.b32.xlu1 %v508_v59, %s1263_s4 }
 0xb7c   :  { %v511_v60 = vpop.permute.xlu1 %510 }
 0xb7d   :  { %1093 = vmatmul.msk.bf16.vlgmr.msrb.gmra.mxu3 %vm95_vm0, %v511_v60 }
 0xc00   :  { %v524_v62 = vpop.f32.mrf.mxu3 }
 0xc01   :  { %v528_v63 = vadd.f32 %v524_v62, %v507_v61 }
 0xc03   :  { %1163 = vtanh.f32 %v528_v63  ;;  %v1094_v4 = vmul.f32 -1.442695, %v528_v63 }
 0xc05   :  { %1165 = vpow2.f32 %v1094_v4 }
 0xc08   :  { %v526_v0 = vpop.f32.mrf.mxu3 }
 0xc09   :  { %v1164_v1 = vpop.eup %1163 }
 0xc0a   :  { %551 = vrot.lane.b32.xlu2 %v1164_v1, %s1260_s22 }
 0xc0b   :  { %v1166_v5 = vpop.eup %1165 }
 0xc0c   :  { %v532_v6 = vadd.f32 1.0, %v1166_v5 }
 0xc0e   :  { %1167 = vrcp.f32 %v532_v6  ;;  %v544_v15 = vand.u32 2147483648, %v532_v6  ;;  %vm538_vm5 = vweird.f32 %v532_v6  ;;  %v542_v16 = vand.u32 2147483647, %v532_v6 }
 0xc10   :  { %v545_v20 = vor.u32 1.1754944e-38, %v544_v15  ;;  %vm543_vm7 = vcmp.eq.f32.partialorder %v542_v16, 8.507059e+37 }
 0xc12   :  { %569 = vperm.xlu2 %1114, %v567_v3  }
 0xc14   :  { %v1168_v7 = vpop.eup %1167 }
 0xc15   :  { %v534_v10 = vmul.f32 %v1168_v7, %v532_v6  ;;  %vm539_vm4 = vweird.f32 %v1168_v7 }
 0xc16   :  { %vm540_vm6 = vmor %vm538_vm5, %vm539_vm4  ;;  %vm716_vm4 = vcmp.gt.s32.totalorder %v1357_v37, 7 }
 0xc17   :  { %v535_v12 = vsub.f32 1.0, %v534_v10 }
 0xc19   :  { %v536_v13 = vmul.f32 %v1168_v7, %v535_v12  ;;  %v657_v12 = vld [vmem:[#allocation2 + $0x1c] sm:$0xf] }
 0xc1b   :  { %v537_v14 = vadd.f32 %v1168_v7, %v536_v13 }
 0xc1d   :  { %v541_v18 = vsel %vm540_vm6, %v1168_v7, %v537_v14 }
 0xc1e   :  { %v546_v22 = vsel %vm543_vm7, %v545_v20, %v541_v18  ;;  %v717_v18 = vsel %vm716_vm4, 1, %v1262_v2  ;;  %v347_v20 = vsel %vm346_vm3, %v1395_v45, 0.0 }
 0xc1f   :  { %v549_v25 = vmul.f32 %v546_v22, %v505_v24 }
 0xc64   :  { %v552_v21 = vpop.permute.xlu2 %551 }
 0xc65   :  { %v554_v23 = vmul.f32 %v552_v21, %v546_v22 }
 0xc67   :  { %556 = vrot.lane.b32.xlu0 %v554_v23, %s1263_s4 }
 0xc6c   :  { %v1450_v29 = vpop.permute.xlu2 %569 }
 0xc6d   :  { %vm571_vm8 = vcmp.eq.s32.totalorder %v1450_v29, 1 }
 0xcd9   :  { %v557_v26 = vpop.permute.xlu0 %556 }
 0xcda   :  { %v559_v27 = vadd.f32 %v557_v26, %v549_v25 }
 0xcdc   :  { %1169 = vtanh.f32 %v559_v27  ;;  %v1466_v61 = vsel %vm571_vm8, %v559_v27, %v505_v24 }
 0xce2   :  { %v1170_v28 = vpop.eup %1169 }
 0xce3   :  { %562 = vrot.lane.b32.xlu1 %v1170_v28, %s1260_s22 }
 0xd55   :  { %v563_v30 = vpop.permute.xlu1 %562 }
 0xd56   :  { %v1452_v31 = vmul.f32 %v563_v30, %v546_v22 }
 0xd58   :  { %v579_v32 = vsel %vm571_vm8, %v1452_v31, %v504_v58  ;;  %v572_v21 = vsel %vm571_vm8, %v1452_v31, 0.0  ;;  %vm203_vm8 = vcmask 257024  }
 0xd59   :  { %v583_v33 = vpack.c.bf16 %v579_v32, %v579_v32 }
 0xd5b   :  { %585 = vrot.lane.b32.xlu0 %v583_v33, %s1263_s4 }
 0xdcd   :  { %v586_v34 = vpop.permute.xlu0 %585 }
 0xdce   :  { %1095 = vmatmul.msk.bf16.vlgmr.msrb.gmra.mxu0 %vm95_vm0, %v586_v34 }
 0xe4b   :  { %v599_v36 = vpop.f32.mrf.mxu0 }
 0xe4c   :  { %v603_v8 = vadd.f32 %v599_v36, %v582_v35  ;;  %v422_v36 = vsel %vm421_vm10, %v1418_v19, 0.0  ;;  %vm814_vm10 = vcmask 1041409  }
 0xe4e   :  { %1171 = vtanh.f32 %v603_v8  ;;  %v1096_v41 = vmul.f32 -1.442695, %v603_v8 }
 0xe50   :  { %1173 = vpow2.f32 %v1096_v41 }
 0xe53   :  { %v601_v38 = vpop.f32.mrf.mxu0 }
 0xe54   :  { %v1172_v39 = vpop.eup %1171 }
 0xe55   :  { %626 = vrot.lane.b32.xlu1 %v1172_v39, %s1260_s22 }
 0xe56   :  { %v1174_v44 = vpop.eup %1173 }
 0xe57   :  { %v607_v46 = vadd.f32 1.0, %v1174_v44 }
 0xe59   :  { %1175 = vrcp.f32 %v607_v46  ;;  %v619_v52 = vand.u32 2147483648, %v607_v46  ;;  %vm613_vm13 = vweird.f32 %v607_v46  ;;  %v617_v53 = vand.u32 2147483647, %v607_v46 }
 0xe5b   :  { %v620_v56 = vor.u32 1.1754944e-38, %v619_v52  ;;  %vm618_vm15 = vcmp.eq.f32.partialorder %v617_v53, 8.507059e+37  ;;  %v497_v53 = vsel %vm496_vm1, %v1435_v57, 0.0  ;;  %vm816_vm1 = vcmask 1042434  }
 0xe5d   :  { %644 = vperm.xlu1 %1113, %v642_v40  }
 0xe5f   :  { %v1176_v47 = vpop.eup %1175 }
 0xe60   :  { %v609_v48 = vmul.f32 %v1176_v47, %v607_v46  ;;  %vm614_vm11 = vweird.f32 %v1176_v47 }
 0xe61   :  { %vm615_vm14 = vmor %vm613_vm13, %vm614_vm11  ;;  %vm820_vm11 = vcmask 1044484   ;;  %vm822_vm13 = vcmask 1045509  }
 0xe62   :  { %v610_v49 = vsub.f32 1.0, %v609_v48  ;;  %v272_v48 = vsel %vm271_vm12, %v1377_v11, 0.0 }
 0xe64   :  { %v611_v50 = vmul.f32 %v1176_v47, %v610_v49 }
 0xe66   :  { %v612_v51 = vadd.f32 %v1176_v47, %v611_v50 }
 0xe68   :  { %v616_v54 = vsel %vm615_vm14, %v1176_v47, %v612_v51  ;;  %vm824_vm14 = vcmask 1046534  }
 0xe69   :  { %v621_v59 = vsel %vm618_vm15, %v620_v56, %v616_v54  ;;  %vm826_vm15 = vcmask 1047559  }
 0xe6a   :  { %v624_v62 = vmul.f32 %v621_v59, %v1466_v61 }
 0xec7   :  { %v627_v58 = vpop.permute.xlu1 %626 }
 0xec8   :  { %v629_v60 = vmul.f32 %v627_v58, %v621_v59 }
 0xeca   :  { %631 = vrot.lane.b32.xlu2 %v629_v60, %s1263_s4 }
 0xecf   :  { %v645_v3 = vpop.permute.xlu1 %644 }
 0xed0   :  { %vm646_vm2 = vcmp.eq.s32.totalorder %v645_v3, 1 }
 0xf24   :  { %v632_v63 = vpop.permute.xlu2 %631 }
 0xf25   :  { %v634_v0 = vadd.f32 %v632_v63, %v624_v62 }
 0xf27   :  { %1177 = vtanh.f32 %v634_v0 }
 0xf2d   :  { %v1178_v1 = vpop.eup %1177 }
 0xf2e   :  { %637 = vrot.lane.b32.xlu0 %v1178_v1, %s1260_s22 }
 0xfa0   :  { %v638_v4 = vpop.permute.xlu0 %637 }
 0xfa1   :  { %v640_v5 = vmul.f32 %v638_v4, %v621_v59 }
 0xfa3   :  { %v654_v6 = vsel %vm646_vm2, %v640_v5, %v579_v32  ;;  %v647_v38 = vsel %vm646_vm2, %v640_v5, 0.0 }
 0xfa4   :  { %v658_v7 = vpack.c.bf16 %v654_v6, %v654_v6 }
 0xfa6   :  { %660 = vrot.lane.b32.xlu2 %v658_v7, %s1263_s4 }
0x1000   :  { %v661_v10 = vpop.permute.xlu2 %660 }
0x1001   :  { %1097 = vmatmul.msk.bf16.vlgmr.msra.gmra.mxu1 %vm95_vm0, %v661_v10 }
0x107e   :  { %v674_v13 = vpop.f32.mrf.mxu1 }
0x107f   :  { %v678_v14 = vadd.f32 %v674_v13, %v657_v12 }
0x1081   :  { %1179 = vtanh.f32 %v678_v14  ;;  %v1098_v22 = vmul.f32 -1.442695, %v678_v14  ;;  %v1121_v14 = vld [vmem:[#allocation4] ss:$0 sm:$0xff] }
0x1083   :  { %1181 = vpow2.f32 %v1098_v22 }
0x1086   :  { %v676_v15 = vpop.f32.mrf.mxu1 }
0x1087   :  { %v1180_v16 = vpop.eup %1179 }
0x1088   :  { %701 = vrot.lane.b32.xlu0 %v1180_v16, %s1260_s22 }
0x1089   :  { %v1182_v23 = vpop.eup %1181 }
0x108a   :  { %v682_v24 = vadd.f32 1.0, %v1182_v23 }
0x108c   :  { %1183 = vrcp.f32 %v682_v24  ;;  %v694_v43 = vand.u32 2147483648, %v682_v24  ;;  %vm688_vm3 = vweird.f32 %v682_v24  ;;  %v692_v45 = vand.u32 2147483647, %v682_v24 }
0x108e   :  { %v695_v29 = vor.u32 1.1754944e-38, %v694_v43  ;;  %vm693_vm7 = vcmp.eq.f32.partialorder %v692_v45, 8.507059e+37 }
0x1090   :  { %719 = vperm.xlu0 %1115, %v717_v18  }
0x1092   :  { %v1184_v25 = vpop.eup %1183 }
0x1093   :  { %v684_v2 = vmul.f32 %v1184_v25, %v682_v24  ;;  %vm689_vm5 = vweird.f32 %v1184_v25 }
0x1094   :  { %vm690_vm6 = vmor %vm688_vm3, %vm689_vm5 }
0x1095   :  { %v685_v26 = vsub.f32 1.0, %v684_v2 }
0x1097   :  { %v686_v27 = vmul.f32 %v1184_v25, %v685_v26 }
0x1098   :  { %349 = vrot.lane.b32.xlu0 %v347_v20, %s1263_s4 }
0x1099   :  { %v687_v28 = vadd.f32 %v1184_v25, %v686_v27 }
0x109b   :  { %v691_v30 = vsel %vm690_vm6, %v1184_v25, %v687_v28  ;;  %v804_v28 = vlaneseq }
0x109c   :  { %v696_v32 = vsel %vm693_vm7, %v695_v29, %v691_v30 }
0x109d   :  { %v805_v29 = vand.u32 127, %v804_v28 }
0x10a0   :  { %574 = vrot.lane.b32.xlu0 %v572_v21, %s1263_s4 }
0x10fa   :  { %v702_v31 = vpop.permute.xlu0 %701 }
0x10fb   :  { %v704_v33 = vmul.f32 %v702_v31, %v696_v32 }
0x10fd   :  { %706 = vrot.lane.b32.xlu1 %v704_v33, %s1263_s4 }
0x1102   :  { %v720_v34 = vpop.permute.xlu0 %719 }
0x1103   :  { %vm721_vm12 = vcmp.eq.s32.totalorder %v720_v34, 1 }
0x1105   :  { %200 = vrot.lane.b32.xlu1 %v1363_v42, %s1263_s4  ;;  %v655_v42 = vsel %vm646_vm2, %v634_v0, %v1466_v61  ;;  %vm865_vm2 = vcmask 60416  }
0x1106   :  { %v699_v39 = vmul.f32 %v696_v32, %v655_v42 }
0x110a   :  { %v350_v35 = vpop.permute.xlu0 %349 }
0x110b   :  { %353 = vst.msk [vmem:[#allocation3 + $0x8] sm:$0xf] %vm203_vm8, %v350_v35 }
0x110d   :  { %424 = vrot.lane.b32.xlu1 %v422_v36, %s1263_s4 }
0x1112   :  { %v575_v8 = vpop.permute.xlu0 %574  ;;  %v1539_v10 = vld [vmem:[#allocation3 + $0x8] sm:$0xf] }
0x1113   :  { %578 = vst.msk [vmem:[#allocation3 + $0x14] sm:$0xf] %vm203_vm8, %v575_v8  ;;  %v743_v12 = vmul.f32 %v1120_v17, %v1539_v10 }
0x1115   :  { %649 = vrot.lane.b32.xlu1 %v647_v38, %s1263_s4  ;;  %v755_v13 = vsel %vm203_vm8, %v743_v12, 0.0 }
0x111a   :  { %v1520_v11 = vld [vmem:[#allocation3 + $0x14] sm:$0xf] }
0x111b   :  { %v746_v56 = vmul.f32 %v1120_v17, %v1520_v11 }
0x111d   :  { %v764_v58 = vsel %vm203_vm8, %v746_v56, 0.0 }
0x116f   :  { %v707_v40 = vpop.permute.xlu1 %706 }
0x1170   :  { %v709_v41 = vadd.f32 %v707_v40, %v699_v39 }
0x1172   :  { %1185 = vtanh.f32 %v709_v41 }
0x1177   :  { %v201_v44 = vpop.permute.xlu1 %200 }
0x1178   :  { %v1186_v46 = vpop.eup %1185  ;;  %204 = vst.msk [vmem:[#allocation3] sm:$0xf] %vm203_vm8, %v201_v44 }
0x1179   :  { %712 = vrot.lane.b32.xlu2 %v1186_v46, %s1260_s22  ;;  %s1044_s22 = sshll.u32 %s1264_s21, 4  ;;  %s1045_s22 = int_to_ptr.vmem [resolvable:$true] %s1044_s22 }
0x117f   :  { %v425_v19 = vpop.permute.xlu1 %424  ;;  %v1502_v47 = vld [vmem:[#allocation3] sm:$0xf] }
0x1180   :  { %428 = vst.msk [vmem:[#allocation3 + $0xc] sm:$0xf] %vm203_vm8, %v425_v19  ;;  %v741_v49 = vmul.f32 %v1120_v17, %v1502_v47 }
0x1181   :  { %274 = vrot.lane.b32.xlu2 %v272_v48, %s1263_s4 }
0x1182   :  { %v749_v50 = vsel %vm203_vm8, %v741_v49, 0.0 }
0x1183   :  { %750 = vadd.xlane.f32.xlu0 %v749_v50 }
0x1187   :  { %v650_v51 = vpop.permute.xlu1 %649  ;;  %v1511_v52 = vld [vmem:[#allocation3 + $0xc] sm:$0xf] }
0x1188   :  { %653 = vst.msk [vmem:[#allocation3 + $0x18] sm:$0xf] %vm203_vm8, %v650_v51  ;;  %v744_v54 = vmul.f32 %v1120_v17, %v1511_v52 }
0x1189   :  { %499 = vrot.lane.b32.xlu2 %v497_v53, %s1263_s4 }
0x118a   :  { %v758_v9 = vsel %vm203_vm8, %v744_v54, 0.0 }
0x118b   :  { %759 = vadd.xlane.f32.xlu0 %v758_v9 }
0x118f   :  { %v1535_v5 = vld [vmem:[#allocation3 + $0x18] sm:$0xf] }
0x1190   :  { %v747_v6 = vmul.f32 %v1120_v17, %v1535_v5 }
0x1192   :  { %v767_v7 = vsel %vm203_vm8, %v747_v6, 0.0 }
0x1193   :  { %765 = vadd.xlane.f32.xlu0 %v764_v58 }
0x11d3   :  { %v713_v59 = vpop.permute.xlu2 %712 }
0x11d4   :  { %v715_v60 = vmul.f32 %v713_v59, %v696_v32 }
0x11d6   :  { %v722_v61 = vsel %vm721_vm12, %v715_v60, 0.0  ;;  %vm1035_vm12 = vcmask 3072  }
0x11d7   :  { %724 = vrot.lane.b32.xlu2 %v722_v61, %s1263_s4 }
0x11db   :  { %v275_v55 = vpop.permute.xlu2 %274 }
0x11dc   :  { %278 = vst.msk [vmem:[#allocation3 + $0x4] sm:$0xf] %vm203_vm8, %v275_v55 }
0x11e3   :  { %v500_v57 = vpop.permute.xlu2 %499  ;;  %v1526_v62 = vld [vmem:[#allocation3 + $0x4] sm:$0xf] }
0x11e4   :  { %503 = vst.msk [vmem:[#allocation3 + $0x10] sm:$0xf] %vm203_vm8, %v500_v57  ;;  %v742_v63 = vmul.f32 %v1120_v17, %v1526_v62 }
0x11e6   :  { %v752_v0 = vsel %vm203_vm8, %v742_v63, 0.0 }
0x11e7   :  { %753 = vadd.xlane.f32.xlu1 %v752_v0 }
0x11eb   :  { %v1531_v1 = vld [vmem:[#allocation3 + $0x10] sm:$0xf] }
0x11ec   :  { %v745_v3 = vmul.f32 %v1120_v17, %v1531_v1 }
0x11ee   :  { %v761_v4 = vsel %vm203_vm8, %v745_v3, 0.0 }
0x11ef   :  { %762 = vadd.xlane.f32.xlu1 %v761_v4 }
0x11f6   :  { %v751_v22 = vpop.xlane.xlu0 %750 }
0x11f7   :  { %768 = vadd.xlane.f32.xlu1 %v767_v7 }
0x11fe   :  { %v760_v26 = vpop.xlane.xlu0 %759 }
0x1200   :  { %756 = vadd.xlane.f32.xlu2 %v755_v13  ;;  %v927_v13 = vshrl.u32 %v804_v28, 7 }
0x1206   :  { %v766_v33 = vpop.xlane.xlu0 %765 }
0x1218   :  { %777 = vperm.xlu2 %1114, %v1121_v14  }
0x1231   :  { %v725_v15 = vpop.permute.xlu2 %724 }
0x1232   :  { %728 = vst.msk [vmem:[#allocation3 + $0x1c] sm:$0xf] %vm203_vm8, %v725_v15 }
0x1239   :  { %v1544_v16 = vld [vmem:[#allocation3 + $0x1c] sm:$0xf] }
0x123a   :  { %v748_v18 = vmul.f32 %v1120_v17, %v1544_v16 }
0x123c   :  { %v770_v20 = vsel %vm203_vm8, %v748_v18, 0.0 }
0x123d   :  { %771 = vadd.xlane.f32.xlu0 %v770_v20 }
0x1251   :  { %862 = vperm.xlu0 %1115, %v1357_v37  }
0x1259   :  { %1117 = vset.pattern.permute.xlu0 %v927_v13 }
0x125a   :  { %v754_v23 = vpop.xlane.xlu1 %753 }
0x1262   :  { %v763_v43 = vpop.xlane.xlu1 %762 }
0x126a   :  { %v769_v8 = vpop.xlane.xlu1 %768 }
0x1273   :  { %v757_v21 = vpop.xlane.xlu2 %756 }
0x127b   :  { %v778_v24 = vpop.permute.xlu2 %777 }
0x127c   :  { %v780_v25 = vadd.f32 %v778_v24, %v751_v22  ;;  %v781_v2 = vadd.f32 %v778_v24, %v754_v23  ;;  %v782_v27 = vadd.f32 %v778_v24, %v757_v21  ;;  %v783_v45 = vadd.f32 %v778_v24, %v760_v26 }
0x127d   :  { %v784_v32 = vadd.f32 %v778_v24, %v763_v43  ;;  %v785_v36 = vadd.f32 %v778_v24, %v766_v33  ;;  %v786_v42 = vadd.f32 %v778_v24, %v769_v8  ;;  %v1006_v8 = vld [vmem:[%s1594_s7 + $0x10] sm:$0xff] }
0x127e   :  { %1187 = vtanh.f32 %v780_v25 }
0x127f   :  { %1189 = vtanh.f32 %v781_v2 }
0x1280   :  { %1191 = vtanh.f32 %v782_v27 }
0x1281   :  { %1193 = vtanh.f32 %v783_v45 }
0x1282   :  { %1195 = vtanh.f32 %v784_v32 }
0x1283   :  { %1197 = vtanh.f32 %v785_v36 }
0x1284   :  { %v1188_v30 = vpop.eup %1187  ;;  %1199 = vtanh.f32 %v786_v42 }
0x1285   :  { %v1190_v31 = vpop.eup %1189  ;;  %v806_v34 = vperm.slane %v1188_v30, %v805_v29 }
0x1286   :  { %v1192_v37 = vpop.eup %1191  ;;  %v807_v35 = vperm.slane %v1190_v31, %v805_v29 }
0x1287   :  { %v808_v38 = vperm.slane %v1192_v37, %v805_v29  ;;  %v1194_v40 = vpop.eup %1193 }
0x1288   :  { %v815_v39 = vsel %vm814_vm10, %v807_v35, %v806_v34  ;;  %v1196_v44 = vpop.eup %1195  ;;  %v809_v17 = vperm.slane %v1194_v40, %v805_v29  ;;  %v1007_v35 = vld [vmem:[%s1594_s7 + $0x18] sm:$0xff] }
0x1289   :  { %v817_v41 = vsel %vm816_vm1, %v808_v38, %v815_v39  ;;  %v1198_v49 = vpop.eup %1197  ;;  %v810_v50 = vperm.slane %v1196_v44, %v805_v29  ;;  %1027 = vmatpush.msra.mxu2 %v1007_v35  ;;  %v1005_v38 = vld [vmem:[%s1594_s7 + $0x8] sm:$0xff]  ;;  %v1004_v39 = vld [vmem:[%s1594_s7] sm:$0xff] }
0x128a   :  { %v819_v48 = vsel %vm818_vm9, %v809_v17, %v817_v41  ;;  %v1200_v53 = vpop.eup %1199  ;;  %v811_v54 = vperm.slane %v1198_v49, %v805_v29 }
0x128b   :  { %v821_v51 = vsel %vm820_vm11, %v810_v50, %v819_v48  ;;  %v812_v58 = vperm.slane %v1200_v53, %v805_v29  ;;  %1028 = vmatpush.msra.mxu2 %v1006_v8 }
0x128c   :  { %v823_v9 = vsel %vm822_vm13, %v811_v54, %v821_v51 }
0x128d   :  { %v825_v60 = vsel %vm824_vm14, %v812_v58, %v823_v9  ;;  %1029 = vmatpush.msra.mxu2 %v1005_v38 }
0x128f   :  { %1030 = vmatpush.msra.mxu2 %v1004_v39 }
0x12b0   :  { %v772_v46 = vpop.xlane.xlu0 %771 }
0x12b1   :  { %v787_v19 = vadd.f32 %v778_v24, %v772_v46 }
0x12b3   :  { %1201 = vtanh.f32 %v787_v19 }
0x12b9   :  { %v1202_v56 = vpop.eup %1201 }
0x12ba   :  { %v813_v59 = vperm.slane %v1202_v56, %v805_v29 }
0x12bc   :  { %v827_v61 = vsel %vm826_vm15, %v813_v59, %v825_v60 }
0x12bd   :  { %829 = vxpose.xlu1.b32.start.end [1/1] (short) (narrow) %v827_v61, 8 }
0x12c3   :  { %v863_v4 = vpop.permute.xlu0 %862 }
0x12c4   :  { %vm864_vm4 = vcmp.lt.s32.totalorder %v805_v29, %v863_v4 }
0x1310   :  { %1116 = vset.pattern.permute.xlu1 %v927_v13 }
0x1361   :  { %v845_v55 = vpop.trf.xlu1 }
0x1362   :  { %v866_v57 = vsel %vm865_vm2, %v845_v55, -inf }
0x1363   :  { %867 = vmax.xlane.f32.xlu2 %v866_v57 }
0x13d6   :  { %v868_v63 = vpop.xlane.xlu2 %867 }
0x13d7   :  { %v869_v0 = vsub.f32 %v845_v55, %v868_v63 }
0x13d9   :  { %v870_v3 = vmul.f32 1.442695, %v869_v0 }
0x13db   :  { %1203 = vpow2.f32 %v870_v3 }
0x13e1   :  { %v1204_v6 = vpop.eup %1203 }
0x13e2   :  { %v872_v7 = vsel %vm864_vm4, %v1204_v6, 0.0 }
0x13e3   :  { %v873_v12 = vsel %vm865_vm2, %v872_v7, 0.0 }
0x13e4   :  { %874 = vadd.xlane.f32.xlu0 %v873_v12 }
0x1457   :  { %v875_v14 = vpop.xlane.xlu0 %874 }
0x1458   :  { %v876_v15 = vmax.f32 %v875_v14, 1e-09 }
0x145a   :  { %1205 = vrcp.f32 %v876_v15  ;;  %v888_v22 = vand.u32 2147483648, %v876_v15  ;;  %v886_v24 = vand.u32 2147483647, %v876_v15  ;;  %vm882_vm3 = vweird.f32 %v876_v15 }
0x145c   :  { %v889_v2 = vor.u32 1.1754944e-38, %v888_v22  ;;  %vm887_vm7 = vcmp.eq.f32.partialorder %v886_v24, 8.507059e+37 }
0x1460   :  { %v1206_v18 = vpop.eup %1205 }
0x1461   :  { %v878_v20 = vmul.f32 %v1206_v18, %v876_v15  ;;  %vm883_vm5 = vweird.f32 %v1206_v18 }
0x1462   :  { %vm884_vm6 = vmor %vm882_vm3, %vm883_vm5 }
0x1463   :  { %v879_v21 = vsub.f32 1.0, %v878_v20 }
0x1465   :  { %v880_v23 = vmul.f32 %v1206_v18, %v879_v21 }
0x1467   :  { %v881_v25 = vadd.f32 %v1206_v18, %v880_v23 }
0x1469   :  { %v885_v26 = vsel %vm884_vm6, %v1206_v18, %v881_v25 }
0x146a   :  { %v890_v27 = vsel %vm887_vm7, %v889_v2, %v885_v26 }
0x146b   :  { %v891_v28 = vmul.f32 %v890_v27, %v872_v7 }
0x146d   :  { %893 = vxpose.xlu2.b32.start.end [1/1] (short) (narrow) %v891_v28, 8  ;;  %892 = vst.msk [vmem:[#allocation9] sm:$0xf] %vm865_vm2, %v891_v28 }
0x146e   :  { %1049 = dma.vmem_to_hbm [thread:$0]  %s1045_s22, 64, %s1047_s20, [#allocation8]  }
0x14cf   :  { %1118 = vset.pattern.permute.xlu2 %v927_v13 }
0x1506   :  { %v909_v43 = vpop.trf.xlu2 }
0x1507   :  { %v939_v45 = vperm.slane %v909_v43, 2  ;;  %v932_v30 = vperm.slane %v909_v43, 1  ;;  %v925_v29 = vperm.slane %v909_v43, 0  ;;  %v946_v31 = vperm.slane %v909_v43, 3 }
0x1508   :  { %v953_v32 = vperm.slane %v909_v43, 4  ;;  %v960_v37 = vperm.slane %v909_v43, 5  ;;  %v967_v33 = vperm.slane %v909_v43, 6  ;;  %v974_v34 = vperm.slane %v909_v43, 7 }
0x1509   :  { %944 = vperm.xlu2 %1118, %v939_v45   ;;  %937 = vperm.xlu0 %1117, %v932_v30  }
0x150a   :  { %930 = vperm.xlu1 %1116, %v925_v29  }
0x1511   :  { %951 = vperm.xlu0 %1117, %v946_v31  }
0x1519   :  { %958 = vperm.xlu0 %1117, %v953_v32  }
0x1521   :  { %965 = vperm.xlu0 %1117, %v960_v37  }
0x1529   :  { %972 = vperm.xlu0 %1117, %v967_v33  }
0x1531   :  { %979 = vperm.xlu0 %1117, %v974_v34  }
0x1563   :  { %v945_v19 = vpop.permute.xlu2 %944 }
0x1564   :  { %v983_v50 = vmul.f32 %v945_v19, %v1539_v10 }
0x1566   :  { %v992_v56 = vsel %vm203_vm8, %v983_v50, 0.0 }
0x157b   :  { %v938_v36 = vpop.permute.xlu0 %937 }
0x157c   :  { %v931_v41 = vpop.permute.xlu1 %930  ;;  %v982_v44 = vmul.f32 %v938_v36, %v1526_v62 }
0x157d   :  { %v981_v46 = vmul.f32 %v931_v41, %v1502_v47 }
0x157e   :  { %v990_v48 = vsel %vm203_vm8, %v982_v44, 0.0 }
0x157f   :  { %v989_v49 = vsel %vm203_vm8, %v981_v46, 0.0 }
0x1580   :  { %v991_v53 = vadd.f32 %v990_v48, %v989_v49 }
0x1582   :  { %v993_v58 = vadd.f32 %v992_v56, %v991_v53 }
0x1583   :  { %v952_v42 = vpop.permute.xlu0 %951 }
0x1584   :  { %v984_v51 = vmul.f32 %v952_v42, %v1511_v52 }
0x1586   :  { %v994_v62 = vsel %vm203_vm8, %v984_v51, 0.0 }
0x1587   :  { %v995_v61 = vadd.f32 %v994_v62, %v993_v58 }
0x158b   :  { %v959_v40 = vpop.permute.xlu0 %958 }
0x158c   :  { %v985_v54 = vmul.f32 %v959_v40, %v1531_v1 }
0x158e   :  { %v996_v59 = vsel %vm203_vm8, %v985_v54, 0.0 }
0x158f   :  { %v997_v55 = vadd.f32 %v996_v59, %v995_v61 }
0x1593   :  { %v966_v17 = vpop.permute.xlu0 %965 }
0x1594   :  { %v986_v47 = vmul.f32 %v966_v17, %v1520_v11  ;;  %v1122_v11 = vld [vmem:[#allocation5] ss:$0 sm:$0xff] }
0x1596   :  { %v998_v10 = vsel %vm203_vm8, %v986_v47, 0.0 }
0x1597   :  { %v999_v57 = vadd.f32 %v998_v10, %v997_v55 }
0x159b   :  { %v973_v9 = vpop.permute.xlu0 %972 }
0x159c   :  { %v987_v60 = vmul.f32 %v973_v9, %v1535_v5 }
0x159e   :  { %v1000_v52 = vsel %vm203_vm8, %v987_v60, 0.0 }
0x159f   :  { %v1001_v0 = vadd.f32 %v1000_v52, %v999_v57 }
0x15a3   :  { %v980_v1 = vpop.permute.xlu0 %979 }
0x15a4   :  { %v988_v63 = vmul.f32 %v980_v1, %v1544_v16 }
0x15a6   :  { %v1002_v3 = vsel %vm203_vm8, %v988_v63, 0.0 }
0x15a7   :  { %v1003_v4 = vadd.f32 %v1002_v3, %v1001_v0 }
0x15a9   :  { %1099 = vmatmul.msk.f32.vlgmr.msra.gmra.mxu2 %vm95_vm0, %v1003_v4 }
0x162c   :  { %v1032_v5 = vpop.f32.mrf.mxu2 }
0x162d   :  { %v1033_v6 = vadd.f32 %v1122_v11, %v1032_v5 }
0x162f   :  { %1036 = vst.msk [vmem:[%s1595_s9] sm:$0xf] %vm1035_vm12, %v1033_v6 }
0x1630   :  { %1257 = dma.done.wait [#allocation8], 64  }
0x1631   :  { %1258 = vsyncadd [#allocation8], 4294967232 }
0x1632   :  { %1056 = vsyncpa [#allocation7], 1 }
0x1633   :  { %1057 = vsyncpa [#allocation8], 1 }

// kernel: tpu_custom_call.1
= control target key start
LH: loop header
LB: loop body
LE: loop exit
PB: predicated region body
PF: predicated region fallthrough
CT: control target
= control target key end

     0   :  { %s1587_s0 = inlined_call_operand.vmem [shape: bf16[1,32,32], index: 0, kind: input, shape index: {}]   ;;  %s1588_s1 = inlined_call_operand.vmem [shape: s32[4,1], index: 1, kind: input, shape index: {}]   ;;  %s1589_s2 = inlined_call_operand.vmem [shape: bf16[32,128], index: 2, kind: input, shape index: {}]   ;;  %s1590_s3 = inlined_call_operand.hbm [shape: bf16[32,128], index: 3, kind: input, shape index: {}]   ;;  %s1591_s4 = inlined_call_operand.vmem [shape: f32[1,128], index: 4, kind: input, shape index: {}]   ;;  %s1592_s5 = inlined_call_operand.vmem [shape: f32[1,32], index: 5, kind: input, shape index: {}]   ;;  %s1593_s6 = inlined_call_operand.<no memory space> [shape: f32[1,1], index: 6, kind: input, shape index: {}]   ;;  %s1594_s7 = inlined_call_operand.vmem [shape: f32[32,1], index: 7, kind: input, shape index: {}]   ;;  %s1595_s9 = inlined_call_operand.vmem [shape: f32[4,1], index: 9, kind: output, shape index: {0}]   ;;  %s1596_s10 = inlined_call_operand.hbm [shape: f32[4,8], index: 10, kind: output, shape index: {1}]   ;;  %s1597_s8 = inlined_call_operand.<no memory space> [shape: f32[1,1], index: 8, kind: input, shape index: {}]  }
   0x1   :  { %v16_v0 = vstv %s1593_s6  ;;  %v18_v1 = vstv %s1597_s8 }
   0x2   :  { %17 = vst [vmem:[#allocation4] sm:$0x1] %v16_v0 }
   0x3   :  { %19 = vst [vmem:[#allocation5] sm:$0x1] %v18_v1 }
   0x4   :  { %20 = vsyncpa [#allocation7], 0 }
   0x5   :  { %21 = vsyncpa [#allocation8], 0  ;;  %s32_s19 = sshll.u32 %s1590_s3, 4  ;;  %s1259_s20 = smov [#allocation6]   ;;  %s33_s19 = int_to_ptr.hbm [resolvable:$true] %s32_s19 }
   0x6   :  { %s34_s21 = sshll.u32 %s1259_s20, 4  ;;  %s1260_s22 = smov 64   ;;  %s35_s21 = int_to_ptr.vmem [resolvable:$true] %s34_s21 }
   0x7   :  { %s1261_s23 = smov 4  }
   0x8   :  { %40 = dma.hbm_to_vmem [thread:$0]  %s33_s19, 256, %s35_s21, [#allocation7], %s1260_s22, %s1260_s22, %s1261_s23  }
   0x9   :  { %1255 = dma.done.wait [#allocation7], 256  }
   0xa   :  { %1256 = vsyncadd [#allocation7], 4294967040  ;;  %v1262_v2 = vmov 0   ;;  %v1105_v3 = vld [vmem:[%s1589_s2 + $0x8] sm:$0xff]  ;;  %v1104_v5 = vld [vmem:[%s1589_s2] sm:$0xff]  ;;  %vm95_vm0 = vcmask 261120  }
   0xb   :  { %1113 = vset.pattern.permute.xlu1 %v1262_v2  ;;  %1114 = vset.pattern.permute.xlu2 %v1262_v2  ;;  %v1101_v4 = vld [vmem:[#allocation6 + $0x8] sm:$0xff]  ;;  %v1100_v6 = vld [vmem:[#allocation6] sm:$0xff]  ;;  %v1348_v8 = vld [vmem:[%s1591_s4] ss:$0 sm:$0xff]  ;;  %s1263_s4 = smov 32   ;;  %s1046_s20 = sshll.u32 %s1596_s10, 4  ;;  %s1047_s20 = int_to_ptr.hbm [resolvable:$true] %s1046_s20 }
   0xc   :  { %1115 = vset.pattern.permute.xlu0 %v1262_v2  ;;  %108 = vmatpush.bf16.msra.mxu0 %v1105_v3  ;;  %v1102_v7 = vld [vmem:[%s1587_s0] sm:$0xff]  ;;  %s1264_s21 = smov [#allocation9]  }
   0xd   :  { %147 = vmatpush.bf16.msra.mxu1 %v1101_v4  ;;  %221 = vmatpush.bf16.msra.mxu2 %v1101_v4  ;;  %v1357_v37 = vld [vmem:[%s1588_s1] sm:$0xf] }
   0xe   :  { %296 = vmatpush.bf16.msra.mxu3 %v1101_v4  ;;  %vm192_vm5 = vcmp.gt.s32.totalorder %v1357_v37, 0  ;;  %vm266_vm7 = vcmp.gt.s32.totalorder %v1357_v37, 1  ;;  %vm341_vm13 = vcmp.gt.s32.totalorder %v1357_v37, 2 }
   0xf   :  { %v193_v38 = vsel %vm192_vm5, 1, %v1262_v2  ;;  %v267_v53 = vsel %vm266_vm7, 1, %v1262_v2  ;;  %vm491_vm5 = vcmp.gt.s32.totalorder %v1357_v37, 4 }
  0x10   :  { %109 = vmatpush.bf16.msra.mxu0 %v1104_v5 }
  0x11   :  { %148 = vmatpush.bf16.msra.mxu1 %v1100_v6  ;;  %222 = vmatpush.bf16.msra.mxu2 %v1100_v6 }
  0x12   :  { %297 = vmatpush.bf16.msra.mxu3 %v1100_v6 }
  0x13   :  { %1074 = vmatmul.msk.bf16.vlgmr.msra.gmra.mxu0 %vm95_vm0, %v1102_v7 }
  0x14   :  { %149 = vmatmul.bf16.vlgmr.msra.gmra.mxu1 %v1262_v2  ;;  %596 = vmatpush.bf16.msrb.mxu0 %v1101_v4 }
  0x15   :  { %371 = vmatpush.bf16.msrb.mxu1 %v1101_v4  ;;  %446 = vmatpush.bf16.msrb.mxu2 %v1101_v4 }
  0x16   :  { %521 = vmatpush.bf16.msrb.mxu3 %v1101_v4 }
  0x18   :  { %597 = vmatpush.bf16.msrb.mxu0 %v1100_v6 }
  0x19   :  { %372 = vmatpush.bf16.msrb.mxu1 %v1100_v6  ;;  %447 = vmatpush.bf16.msrb.mxu2 %v1100_v6 }
  0x1a   :  { %522 = vmatpush.bf16.msrb.mxu3 %v1100_v6 }
  0x1d   :  { %671 = vmatpush.bf16.msra.mxu1 %v1101_v4 }
  0x21   :  { %672 = vmatpush.bf16.msra.mxu1 %v1100_v6 }
  0x90   :  { %v111_v9 = vpop.f32.mrf.mxu0 }
  0x91   :  { %v150_v10 = vpop.f32.mrf.mxu1  ;;  %v112_v11 = vadd.f32 %v1348_v8, %v111_v9 }
  0x93   :  { %121 = vst [vmem:[#allocation2] sm:$0xff] %v112_v11 }
  0x98   :  { %v113_v12 = vpop.f32.mrf.mxu0 }
  0x99   :  { %v152_v13 = vpop.f32.mrf.mxu1  ;;  %v114_v14 = vadd.f32 %v1348_v8, %v113_v12 }
  0x9a   :  { %v125_v15 = vld [vmem:[#allocation2] sm:$0xf]  ;;  %v207_v45 = vld [vmem:[#allocation2 + $0x4] sm:$0xf] }
  0x9b   :  { %v154_v16 = vadd.f32 %v150_v10, %v125_v15  ;;  %122 = vst [vmem:[#allocation2 + $0x8] sm:$0xff] %v114_v14 }
  0x9d   :  { %1123 = vtanh.f32 %v154_v16  ;;  %v1084_v18 = vmul.f32 -1.442695, %v154_v16 }
  0x9f   :  { %1125 = vpow2.f32 %v1084_v18 }
  0xa2   :  { %v282_v15 = vld [vmem:[#allocation2 + $0x8] sm:$0xf] }
  0xa3   :  { %v1124_v17 = vpop.eup %1123 }
  0xa4   :  { %177 = vrot.lane.b32.xlu0 %v1124_v17, %s1260_s22 }
  0xa5   :  { %v1126_v19 = vpop.eup %1125 }
  0xa6   :  { %v158_v20 = vadd.f32 1.0, %v1126_v19 }
  0xa8   :  { %1127 = vrcp.f32 %v158_v20  ;;  %v170_v26 = vand.u32 2147483648, %v158_v20  ;;  %vm164_vm2 = vweird.f32 %v158_v20  ;;  %v168_v27 = vand.u32 2147483647, %v158_v20 }
  0xaa   :  { %v171_v29 = vor.u32 1.1754944e-38, %v170_v26  ;;  %vm169_vm4 = vcmp.eq.f32.partialorder %v168_v27, 8.507059e+37 }
  0xae   :  { %v1128_v21 = vpop.eup %1127 }
  0xaf   :  { %v160_v22 = vmul.f32 %v1128_v21, %v158_v20  ;;  %vm165_vm1 = vweird.f32 %v1128_v21  ;;  %v342_v20 = vsel %vm341_vm13, 1, %v1262_v2 }
  0xb0   :  { %vm166_vm3 = vmor %vm164_vm2, %vm165_vm1 }
  0xb1   :  { %v161_v23 = vsub.f32 1.0, %v160_v22 }
  0xb3   :  { %v162_v24 = vmul.f32 %v1128_v21, %v161_v23 }
  0xb5   :  { %v163_v25 = vadd.f32 %v1128_v21, %v162_v24 }
  0xb7   :  { %v167_v28 = vsel %vm166_vm3, %v1128_v21, %v163_v25 }
  0xb8   :  { %v172_v31 = vsel %vm169_vm4, %v171_v29, %v167_v28  ;;  %vm416_vm4 = vcmp.gt.s32.totalorder %v1357_v37, 3 }
  0xb9   :  { %v175_v33 = vmul.f32 0.0, %v172_v31 }
 0x116   :  { %v178_v30 = vpop.permute.xlu0 %177 }
 0x117   :  { %v180_v32 = vmul.f32 %v178_v30, %v172_v31 }
 0x119   :  { %182 = vrot.lane.b32.xlu0 %v180_v32, %s1263_s4 }
 0x18b   :  { %v183_v34 = vpop.permute.xlu0 %182 }
 0x18c   :  { %v185_v35 = vadd.f32 %v183_v34, %v175_v33 }
 0x18e   :  { %1129 = vtanh.f32 %v185_v35 }
 0x194   :  { %v1130_v36 = vpop.eup %1129 }
 0x195   :  { %188 = vrot.lane.b32.xlu1 %v1130_v36, %s1260_s22 }
 0x19d   :  { %195 = vperm.xlu1 %1113, %v193_v38  }
 0x207   :  { %v189_v39 = vpop.permute.xlu1 %188 }
 0x208   :  { %v191_v40 = vmul.f32 %v189_v39, %v172_v31 }
 0x20f   :  { %v196_v41 = vpop.permute.xlu1 %195 }
 0x210   :  { %vm197_vm6 = vcmp.eq.s32.totalorder %v196_v41, 1 }
 0x211   :  { %v1363_v42 = vsel %vm197_vm6, %v191_v40, 0.0  ;;  %v205_v3 = vsel %vm197_vm6, %v185_v35, 0.0 }
 0x212   :  { %v208_v43 = vpack.c.bf16 %v1363_v42, %v1363_v42 }
 0x214   :  { %210 = vrot.lane.b32.xlu2 %v208_v43, %s1263_s4 }
 0x26e   :  { %v211_v44 = vpop.permute.xlu2 %210 }
 0x26f   :  { %1085 = vmatmul.msk.bf16.vlgmr.msra.gmra.mxu2 %vm95_vm0, %v211_v44 }
 0x2f2   :  { %v224_v46 = vpop.f32.mrf.mxu2 }
 0x2f3   :  { %v228_v47 = vadd.f32 %v224_v46, %v207_v45 }
 0x2f5   :  { %1131 = vtanh.f32 %v228_v47  ;;  %v1086_v50 = vmul.f32 -1.442695, %v228_v47 }
 0x2f7   :  { %1133 = vpow2.f32 %v1086_v50 }
 0x2fa   :  { %v226_v48 = vpop.f32.mrf.mxu2 }
 0x2fb   :  { %v1132_v49 = vpop.eup %1131 }
 0x2fc   :  { %251 = vrot.lane.b32.xlu2 %v1132_v49, %s1260_s22  ;;  %v357_v49 = vld [vmem:[#allocation2 + $0xc] sm:$0xf] }
 0x2fd   :  { %v1134_v51 = vpop.eup %1133 }
 0x2fe   :  { %v232_v52 = vadd.f32 1.0, %v1134_v51 }
 0x300   :  { %1135 = vrcp.f32 %v232_v52  ;;  %v244_v59 = vand.u32 2147483648, %v232_v52  ;;  %vm238_vm9 = vweird.f32 %v232_v52  ;;  %v242_v60 = vand.u32 2147483647, %v232_v52 }
 0x302   :  { %v245_v62 = vor.u32 1.1754944e-38, %v244_v59  ;;  %vm243_vm11 = vcmp.eq.f32.partialorder %v242_v60, 8.507059e+37 }
 0x304   :  { %269 = vperm.xlu2 %1114, %v267_v53  }
 0x306   :  { %v1136_v54 = vpop.eup %1135 }
 0x307   :  { %v234_v55 = vmul.f32 %v1136_v54, %v232_v52  ;;  %vm239_vm8 = vweird.f32 %v1136_v54 }
 0x308   :  { %vm240_vm10 = vmor %vm238_vm9, %vm239_vm8 }
 0x309   :  { %v235_v56 = vsub.f32 1.0, %v234_v55 }
 0x30b   :  { %v236_v57 = vmul.f32 %v1136_v54, %v235_v56 }
 0x30d   :  { %v237_v58 = vadd.f32 %v1136_v54, %v236_v57  ;;  %v417_v57 = vsel %vm416_vm4, 1, %v1262_v2 }
 0x30f   :  { %v241_v61 = vsel %vm240_vm10, %v1136_v54, %v237_v58  ;;  %v492_v58 = vsel %vm491_vm5, 1, %v1262_v2 }
 0x310   :  { %v246_v0 = vsel %vm243_vm11, %v245_v62, %v241_v61 }
 0x311   :  { %v249_v4 = vmul.f32 %v246_v0, %v205_v3 }
 0x356   :  { %v252_v63 = vpop.permute.xlu2 %251 }
 0x357   :  { %v254_v1 = vmul.f32 %v252_v63, %v246_v0 }
 0x359   :  { %256 = vrot.lane.b32.xlu0 %v254_v1, %s1263_s4 }
 0x35e   :  { %v1375_v9 = vpop.permute.xlu2 %269 }
 0x35f   :  { %vm271_vm12 = vcmp.eq.s32.totalorder %v1375_v9, 1 }
 0x3cb   :  { %v257_v5 = vpop.permute.xlu0 %256 }
 0x3cc   :  { %v259_v6 = vadd.f32 %v257_v5, %v249_v4 }
 0x3ce   :  { %1137 = vtanh.f32 %v259_v6  ;;  %v280_v36 = vsel %vm271_vm12, %v259_v6, %v205_v3 }
 0x3d4   :  { %v1138_v7 = vpop.eup %1137 }
 0x3d5   :  { %262 = vrot.lane.b32.xlu1 %v1138_v7, %s1260_s22 }
 0x447   :  { %v263_v10 = vpop.permute.xlu1 %262 }
 0x448   :  { %v1377_v11 = vmul.f32 %v263_v10, %v246_v0 }
 0x44a   :  { %v279_v12 = vsel %vm271_vm12, %v1377_v11, %v1363_v42 }
 0x44b   :  { %v283_v13 = vpack.c.bf16 %v279_v12, %v279_v12 }
 0x44d   :  { %285 = vrot.lane.b32.xlu0 %v283_v13, %s1263_s4 }
 0x4bf   :  { %v286_v14 = vpop.permute.xlu0 %285 }
 0x4c0   :  { %1087 = vmatmul.msk.bf16.vlgmr.msra.gmra.mxu3 %vm95_vm0, %v286_v14 }
 0x543   :  { %v299_v16 = vpop.f32.mrf.mxu3 }
 0x544   :  { %v303_v17 = vadd.f32 %v299_v16, %v282_v15  ;;  %v1103_v16 = vld [vmem:[%s1587_s0 + $0x8] sm:$0xff] }
 0x545   :  { %1075 = vmatmul.msk.bf16.gmra.mxu0 %vm95_vm0, %v1103_v16 }
 0x546   :  { %1139 = vtanh.f32 %v303_v17  ;;  %v1088_v21 = vmul.f32 -1.442695, %v303_v17 }
 0x548   :  { %1141 = vpow2.f32 %v1088_v21 }
 0x54b   :  { %v301_v18 = vpop.f32.mrf.mxu3 }
 0x54c   :  { %v1140_v19 = vpop.eup %1139 }
 0x54d   :  { %326 = vrot.lane.b32.xlu1 %v1140_v19, %s1260_s22 }
 0x54e   :  { %v1142_v22 = vpop.eup %1141 }
 0x54f   :  { %v307_v23 = vadd.f32 1.0, %v1142_v22 }
 0x551   :  { %1143 = vrcp.f32 %v307_v23  ;;  %v319_v29 = vand.u32 2147483648, %v307_v23  ;;  %vm313_vm15 = vweird.f32 %v307_v23  ;;  %v317_v30 = vand.u32 2147483647, %v307_v23 }
 0x553   :  { %v320_v32 = vor.u32 1.1754944e-38, %v319_v29  ;;  %vm318_vm2 = vcmp.eq.f32.partialorder %v317_v30, 8.507059e+37 }
 0x555   :  { %344 = vperm.xlu1 %1113, %v342_v20  }
 0x557   :  { %v1144_v24 = vpop.eup %1143 }
 0x558   :  { %v309_v25 = vmul.f32 %v1144_v24, %v307_v23  ;;  %vm314_vm14 = vweird.f32 %v1144_v24 }
 0x559   :  { %vm315_vm1 = vmor %vm313_vm15, %vm314_vm14 }
 0x55a   :  { %v310_v26 = vsub.f32 1.0, %v309_v25 }
 0x55c   :  { %v311_v27 = vmul.f32 %v1144_v24, %v310_v26 }
 0x55e   :  { %v312_v28 = vadd.f32 %v1144_v24, %v311_v27 }
 0x560   :  { %v316_v31 = vsel %vm315_vm1, %v1144_v24, %v312_v28 }
 0x561   :  { %v321_v34 = vsel %vm318_vm2, %v320_v32, %v316_v31  ;;  %vm566_vm2 = vcmp.gt.s32.totalorder %v1357_v37, 5 }
 0x562   :  { %v324_v38 = vmul.f32 %v321_v34, %v280_v36 }
 0x5bf   :  { %v327_v33 = vpop.permute.xlu1 %326 }
 0x5c0   :  { %v329_v35 = vmul.f32 %v327_v33, %v321_v34 }
 0x5c2   :  { %331 = vrot.lane.b32.xlu2 %v329_v35, %s1263_s4  ;;  %v116_v22 = vpop.f32.mrf.mxu0 }
 0x5c3   :  { %v117_v23 = vadd.f32 %v1348_v8, %v116_v22 }
 0x5c5   :  { %123 = vst [vmem:[#allocation2 + $0x10] sm:$0xff] %v117_v23 }
 0x5c7   :  { %v1393_v43 = vpop.permute.xlu1 %344 }
 0x5c8   :  { %vm346_vm3 = vcmp.eq.s32.totalorder %v1393_v43, 1 }
 0x5ca   :  { %v118_v24 = vpop.f32.mrf.mxu0 }
 0x5cb   :  { %v119_v25 = vadd.f32 %v1348_v8, %v118_v24 }
 0x5cc   :  { %v432_v27 = vld [vmem:[#allocation2 + $0x10] sm:$0xf] }
 0x5cd   :  { %124 = vst [vmem:[#allocation2 + $0x18] sm:$0xff] %v119_v25 }
 0x61c   :  { %v332_v39 = vpop.permute.xlu2 %331 }
 0x61d   :  { %v334_v40 = vadd.f32 %v332_v39, %v324_v38 }
 0x61f   :  { %1145 = vtanh.f32 %v334_v40  ;;  %v355_v10 = vsel %vm346_vm3, %v334_v40, %v280_v36 }
 0x625   :  { %v1146_v41 = vpop.eup %1145 }
 0x626   :  { %337 = vrot.lane.b32.xlu0 %v1146_v41, %s1260_s22 }
 0x698   :  { %v338_v44 = vpop.permute.xlu0 %337 }
 0x699   :  { %v1395_v45 = vmul.f32 %v338_v44, %v321_v34 }
 0x69b   :  { %v354_v46 = vsel %vm346_vm3, %v1395_v45, %v279_v12 }
 0x69c   :  { %v358_v47 = vpack.c.bf16 %v354_v46, %v354_v46 }
 0x69e   :  { %360 = vrot.lane.b32.xlu2 %v358_v47, %s1263_s4 }
 0x6f8   :  { %v361_v48 = vpop.permute.xlu2 %360 }
 0x6f9   :  { %1089 = vmatmul.msk.bf16.vlgmr.msrb.gmra.mxu1 %vm95_vm0, %v361_v48 }
 0x776   :  { %v374_v50 = vpop.f32.mrf.mxu1 }
 0x777   :  { %v378_v51 = vadd.f32 %v374_v50, %v357_v49 }
 0x779   :  { %1147 = vtanh.f32 %v378_v51  ;;  %v1090_v54 = vmul.f32 -1.442695, %v378_v51 }
 0x77b   :  { %1149 = vpow2.f32 %v1090_v54 }
 0x77e   :  { %v376_v52 = vpop.f32.mrf.mxu1 }
 0x77f   :  { %v1148_v53 = vpop.eup %1147 }
 0x780   :  { %401 = vrot.lane.b32.xlu0 %v1148_v53, %s1260_s22 }
 0x781   :  { %v1150_v55 = vpop.eup %1149 }
 0x782   :  { %v382_v56 = vadd.f32 1.0, %v1150_v55 }
 0x784   :  { %1151 = vrcp.f32 %v382_v56  ;;  %v394_v0 = vand.u32 2147483648, %v382_v56  ;;  %vm388_vm7 = vweird.f32 %v382_v56  ;;  %v392_v1 = vand.u32 2147483647, %v382_v56 }
 0x786   :  { %v395_v4 = vor.u32 1.1754944e-38, %v394_v0  ;;  %vm393_vm9 = vcmp.eq.f32.partialorder %v392_v1, 8.507059e+37 }
 0x788   :  { %419 = vperm.xlu0 %1115, %v417_v57  }
 0x78a   :  { %v1152_v59 = vpop.eup %1151 }
 0x78b   :  { %v384_v60 = vmul.f32 %v1152_v59, %v382_v56  ;;  %vm389_vm6 = vweird.f32 %v1152_v59 }
 0x78c   :  { %vm390_vm8 = vmor %vm388_vm7, %vm389_vm6 }
 0x78d   :  { %v385_v61 = vsub.f32 1.0, %v384_v60 }
 0x78f   :  { %v386_v62 = vmul.f32 %v1152_v59, %v385_v61  ;;  %v507_v61 = vld [vmem:[#allocation2 + $0x14] sm:$0xf] }
 0x790   :  { %494 = vperm.xlu0 %1115, %v492_v58  }
 0x791   :  { %v387_v63 = vadd.f32 %v1152_v59, %v386_v62 }
 0x793   :  { %v391_v3 = vsel %vm390_vm8, %v1152_v59, %v387_v63 }
 0x794   :  { %v396_v6 = vsel %vm393_vm9, %v395_v4, %v391_v3  ;;  %v567_v3 = vsel %vm566_vm2, 1, %v1262_v2  ;;  %vm641_vm9 = vcmp.gt.s32.totalorder %v1357_v37, 6 }
 0x795   :  { %v399_v12 = vmul.f32 %v396_v6, %v355_v10 }
 0x7f2   :  { %v402_v5 = vpop.permute.xlu0 %401 }
 0x7f3   :  { %v404_v7 = vmul.f32 %v402_v5, %v396_v6 }
 0x7f5   :  { %406 = vrot.lane.b32.xlu1 %v404_v7, %s1263_s4 }
 0x7fa   :  { %v1416_v17 = vpop.permute.xlu0 %419 }
 0x7fb   :  { %vm421_vm10 = vcmp.eq.s32.totalorder %v1416_v17, 1  ;;  %v1120_v17 = vld [vmem:[%s1592_s5] ss:$0 sm:$0xff] }
 0x802   :  { %v1433_v55 = vpop.permute.xlu0 %494 }
 0x803   :  { %vm496_vm1 = vcmp.eq.s32.totalorder %v1433_v55, 1 }
 0x867   :  { %v407_v13 = vpop.permute.xlu1 %406 }
 0x868   :  { %v409_v14 = vadd.f32 %v407_v13, %v399_v12 }
 0x86a   :  { %1153 = vtanh.f32 %v409_v14  ;;  %v430_v50 = vsel %vm421_vm10, %v409_v14, %v355_v10 }
 0x870   :  { %v1154_v15 = vpop.eup %1153 }
 0x871   :  { %412 = vrot.lane.b32.xlu2 %v1154_v15, %s1260_s22 }
 0x8cb   :  { %v413_v18 = vpop.permute.xlu2 %412 }
 0x8cc   :  { %v1418_v19 = vmul.f32 %v413_v18, %v396_v6 }
 0x8ce   :  { %v429_v20 = vsel %vm421_vm10, %v1418_v19, %v354_v46 }
 0x8cf   :  { %v433_v21 = vpack.c.bf16 %v429_v20, %v429_v20 }
 0x8d1   :  { %435 = vrot.lane.b32.xlu1 %v433_v21, %s1263_s4 }
 0x943   :  { %v436_v26 = vpop.permute.xlu1 %435 }
 0x944   :  { %1091 = vmatmul.msk.bf16.vlgmr.msrb.gmra.mxu2 %vm95_vm0, %v436_v26 }
 0x9c7   :  { %v449_v28 = vpop.f32.mrf.mxu2 }
 0x9c8   :  { %v453_v29 = vadd.f32 %v449_v28, %v432_v27 }
 0x9ca   :  { %1155 = vtanh.f32 %v453_v29  ;;  %v1092_v32 = vmul.f32 -1.442695, %v453_v29 }
 0x9cc   :  { %1157 = vpow2.f32 %v1092_v32 }
 0x9cf   :  { %v451_v30 = vpop.f32.mrf.mxu2 }
 0x9d0   :  { %v1156_v31 = vpop.eup %1155 }
 0x9d1   :  { %476 = vrot.lane.b32.xlu2 %v1156_v31, %s1260_s22 }
 0x9d2   :  { %v1158_v33 = vpop.eup %1157 }
 0x9d3   :  { %v457_v34 = vadd.f32 1.0, %v1158_v33 }
 0x9d5   :  { %1159 = vrcp.f32 %v457_v34  ;;  %v469_v40 = vand.u32 2147483648, %v457_v34  ;;  %vm463_vm13 = vweird.f32 %v457_v34  ;;  %v467_v41 = vand.u32 2147483647, %v457_v34 }
 0x9d7   :  { %v470_v46 = vor.u32 1.1754944e-38, %v469_v40  ;;  %vm468_vm15 = vcmp.eq.f32.partialorder %v467_v41, 8.507059e+37  ;;  %v642_v40 = vsel %vm641_vm9, 1, %v1262_v2  ;;  %vm818_vm9 = vcmask 1043459  }
 0x9db   :  { %v1160_v35 = vpop.eup %1159 }
 0x9dc   :  { %v459_v36 = vmul.f32 %v1160_v35, %v457_v34  ;;  %vm464_vm11 = vweird.f32 %v1160_v35 }
 0x9dd   :  { %vm465_vm14 = vmor %vm463_vm13, %vm464_vm11 }
 0x9de   :  { %v460_v8 = vsub.f32 1.0, %v459_v36 }
 0x9e0   :  { %v461_v38 = vmul.f32 %v1160_v35, %v460_v8 }
 0x9e2   :  { %v462_v39 = vadd.f32 %v1160_v35, %v461_v38 }
 0x9e4   :  { %v466_v44 = vsel %vm465_vm14, %v1160_v35, %v462_v39  ;;  %v582_v35 = vld [vmem:[#allocation2 + $0x18] sm:$0xf] }
 0x9e5   :  { %v471_v48 = vsel %vm468_vm15, %v470_v46, %v466_v44 }
 0x9e6   :  { %v474_v51 = vmul.f32 %v471_v48, %v430_v50 }
 0xa2b   :  { %v477_v47 = vpop.permute.xlu2 %476 }
 0xa2c   :  { %v479_v49 = vmul.f32 %v477_v47, %v471_v48 }
 0xa2e   :  { %481 = vrot.lane.b32.xlu1 %v479_v49, %s1263_s4 }
 0xaa0   :  { %v482_v52 = vpop.permute.xlu1 %481 }
 0xaa1   :  { %v484_v53 = vadd.f32 %v482_v52, %v474_v51 }
 0xaa3   :  { %1161 = vtanh.f32 %v484_v53  ;;  %v505_v24 = vsel %vm496_vm1, %v484_v53, %v430_v50 }
 0xaa9   :  { %v1162_v54 = vpop.eup %1161 }
 0xaaa   :  { %487 = vrot.lane.b32.xlu2 %v1162_v54, %s1260_s22 }
 0xb04   :  { %v488_v56 = vpop.permute.xlu2 %487 }
 0xb05   :  { %v1435_v57 = vmul.f32 %v488_v56, %v471_v48 }
 0xb07   :  { %v504_v58 = vsel %vm496_vm1, %v1435_v57, %v429_v20 }
 0xb08   :  { %v508_v59 = vpack.c.bf16 %v504_v58, %v504_v58 }
 0xb0a   :  { %510 = vrot.lane.b32.xlu1 %v508_v59, %s1263_s4 }
 0xb7c   :  { %v511_v60 = vpop.permute.xlu1 %510 }
 0xb7d   :  { %1093 = vmatmul.msk.bf16.vlgmr.msrb.gmra.mxu3 %vm95_vm0, %v511_v60 }
 0xc00   :  { %v524_v62 = vpop.f32.mrf.mxu3 }
 0xc01   :  { %v528_v63 = vadd.f32 %v524_v62, %v507_v61 }
 0xc03   :  { %1163 = vtanh.f32 %v528_v63  ;;  %v1094_v4 = vmul.f32 -1.442695, %v528_v63 }
 0xc05   :  { %1165 = vpow2.f32 %v1094_v4 }
 0xc08   :  { %v526_v0 = vpop.f32.mrf.mxu3 }
 0xc09   :  { %v1164_v1 = vpop.eup %1163 }
 0xc0a   :  { %551 = vrot.lane.b32.xlu2 %v1164_v1, %s1260_s22 }
 0xc0b   :  { %v1166_v5 = vpop.eup %1165 }
 0xc0c   :  { %v532_v6 = vadd.f32 1.0, %v1166_v5 }
 0xc0e   :  { %1167 = vrcp.f32 %v532_v6  ;;  %v544_v15 = vand.u32 2147483648, %v532_v6  ;;  %vm538_vm5 = vweird.f32 %v532_v6  ;;  %v542_v16 = vand.u32 2147483647, %v532_v6 }
 0xc10   :  { %v545_v20 = vor.u32 1.1754944e-38, %v544_v15  ;;  %vm543_vm7 = vcmp.eq.f32.partialorder %v542_v16, 8.507059e+37 }
 0xc12   :  { %569 = vperm.xlu2 %1114, %v567_v3  }
 0xc14   :  { %v1168_v7 = vpop.eup %1167 }
 0xc15   :  { %v534_v10 = vmul.f32 %v1168_v7, %v532_v6  ;;  %vm539_vm4 = vweird.f32 %v1168_v7 }
 0xc16   :  { %vm540_vm6 = vmor %vm538_vm5, %vm539_vm4  ;;  %vm716_vm4 = vcmp.gt.s32.totalorder %v1357_v37, 7 }
 0xc17   :  { %v535_v12 = vsub.f32 1.0, %v534_v10 }
 0xc19   :  { %v536_v13 = vmul.f32 %v1168_v7, %v535_v12  ;;  %v657_v12 = vld [vmem:[#allocation2 + $0x1c] sm:$0xf] }
 0xc1b   :  { %v537_v14 = vadd.f32 %v1168_v7, %v536_v13 }
 0xc1d   :  { %v541_v18 = vsel %vm540_vm6, %v1168_v7, %v537_v14 }
 0xc1e   :  { %v546_v22 = vsel %vm543_vm7, %v545_v20, %v541_v18  ;;  %v717_v18 = vsel %vm716_vm4, 1, %v1262_v2  ;;  %v347_v20 = vsel %vm346_vm3, %v1395_v45, 0.0 }
 0xc1f   :  { %v549_v25 = vmul.f32 %v546_v22, %v505_v24 }
 0xc64   :  { %v552_v21 = vpop.permute.xlu2 %551 }
 0xc65   :  { %v554_v23 = vmul.f32 %v552_v21, %v546_v22 }
 0xc67   :  { %556 = vrot.lane.b32.xlu0 %v554_v23, %s1263_s4 }
 0xc6c   :  { %v1450_v29 = vpop.permute.xlu2 %569 }
 0xc6d   :  { %vm571_vm8 = vcmp.eq.s32.totalorder %v1450_v29, 1 }
 0xcd9   :  { %v557_v26 = vpop.permute.xlu0 %556 }
 0xcda   :  { %v559_v27 = vadd.f32 %v557_v26, %v549_v25 }
 0xcdc   :  { %1169 = vtanh.f32 %v559_v27  ;;  %v1466_v61 = vsel %vm571_vm8, %v559_v27, %v505_v24 }
 0xce2   :  { %v1170_v28 = vpop.eup %1169 }
 0xce3   :  { %562 = vrot.lane.b32.xlu1 %v1170_v28, %s1260_s22 }
 0xd55   :  { %v563_v30 = vpop.permute.xlu1 %562 }
 0xd56   :  { %v1452_v31 = vmul.f32 %v563_v30, %v546_v22 }
 0xd58   :  { %v579_v32 = vsel %vm571_vm8, %v1452_v31, %v504_v58  ;;  %v572_v21 = vsel %vm571_vm8, %v1452_v31, 0.0  ;;  %vm203_vm8 = vcmask 257024  }
 0xd59   :  { %v583_v33 = vpack.c.bf16 %v579_v32, %v579_v32 }
 0xd5b   :  { %585 = vrot.lane.b32.xlu0 %v583_v33, %s1263_s4 }
 0xdcd   :  { %v586_v34 = vpop.permute.xlu0 %585 }
 0xdce   :  { %1095 = vmatmul.msk.bf16.vlgmr.msrb.gmra.mxu0 %vm95_vm0, %v586_v34 }
 0xe4b   :  { %v599_v36 = vpop.f32.mrf.mxu0 }
 0xe4c   :  { %v603_v8 = vadd.f32 %v599_v36, %v582_v35  ;;  %v422_v36 = vsel %vm421_vm10, %v1418_v19, 0.0  ;;  %vm814_vm10 = vcmask 1041409  }
 0xe4e   :  { %1171 = vtanh.f32 %v603_v8  ;;  %v1096_v41 = vmul.f32 -1.442695, %v603_v8 }
 0xe50   :  { %1173 = vpow2.f32 %v1096_v41 }
 0xe53   :  { %v601_v38 = vpop.f32.mrf.mxu0 }
 0xe54   :  { %v1172_v39 = vpop.eup %1171 }
 0xe55   :  { %626 = vrot.lane.b32.xlu1 %v1172_v39, %s1260_s22 }
 0xe56   :  { %v1174_v44 = vpop.eup %1173 }
 0xe57   :  { %v607_v46 = vadd.f32 1.0, %v1174_v44 }
 0xe59   :  { %1175 = vrcp.f32 %v607_v46  ;;  %v619_v52 = vand.u32 2147483648, %v607_v46  ;;  %vm613_vm13 = vweird.f32 %v607_v46  ;;  %v617_v53 = vand.u32 2147483647, %v607_v46 }
 0xe5b   :  { %v620_v56 = vor.u32 1.1754944e-38, %v619_v52  ;;  %vm618_vm15 = vcmp.eq.f32.partialorder %v617_v53, 8.507059e+37  ;;  %v497_v53 = vsel %vm496_vm1, %v1435_v57, 0.0  ;;  %vm816_vm1 = vcmask 1042434  }
 0xe5d   :  { %644 = vperm.xlu1 %1113, %v642_v40  }
 0xe5f   :  { %v1176_v47 = vpop.eup %1175 }
 0xe60   :  { %v609_v48 = vmul.f32 %v1176_v47, %v607_v46  ;;  %vm614_vm11 = vweird.f32 %v1176_v47 }
 0xe61   :  { %vm615_vm14 = vmor %vm613_vm13, %vm614_vm11  ;;  %vm820_vm11 = vcmask 1044484   ;;  %vm822_vm13 = vcmask 1045509  }
 0xe62   :  { %v610_v49 = vsub.f32 1.0, %v609_v48  ;;  %v272_v48 = vsel %vm271_vm12, %v1377_v11, 0.0 }
 0xe64   :  { %v611_v50 = vmul.f32 %v1176_v47, %v610_v49 }
 0xe66   :  { %v612_v51 = vadd.f32 %v1176_v47, %v611_v50 }
 0xe68   :  { %v616_v54 = vsel %vm615_vm14, %v1176_v47, %v612_v51  ;;  %vm824_vm14 = vcmask 1046534  }
 0xe69   :  { %v621_v59 = vsel %vm618_vm15, %v620_v56, %v616_v54  ;;  %vm826_vm15 = vcmask 1047559  }
 0xe6a   :  { %v624_v62 = vmul.f32 %v621_v59, %v1466_v61 }
 0xec7   :  { %v627_v58 = vpop.permute.xlu1 %626 }
 0xec8   :  { %v629_v60 = vmul.f32 %v627_v58, %v621_v59 }
 0xeca   :  { %631 = vrot.lane.b32.xlu2 %v629_v60, %s1263_s4 }
 0xecf   :  { %v645_v3 = vpop.permute.xlu1 %644 }
 0xed0   :  { %vm646_vm2 = vcmp.eq.s32.totalorder %v645_v3, 1 }
 0xf24   :  { %v632_v63 = vpop.permute.xlu2 %631 }
 0xf25   :  { %v634_v0 = vadd.f32 %v632_v63, %v624_v62 }
 0xf27   :  { %1177 = vtanh.f32 %v634_v0 }
 0xf2d   :  { %v1178_v1 = vpop.eup %1177 }
 0xf2e   :  { %637 = vrot.lane.b32.xlu0 %v1178_v1, %s1260_s22 }
 0xfa0   :  { %v638_v4 = vpop.permute.xlu0 %637 }
 0xfa1   :  { %v640_v5 = vmul.f32 %v638_v4, %v621_v59 }
 0xfa3   :  { %v654_v6 = vsel %vm646_vm2, %v640_v5, %v579_v32  ;;  %v647_v38 = vsel %vm646_vm2, %v640_v5, 0.0 }
 0xfa4   :  { %v658_v7 = vpack.c.bf16 %v654_v6, %v654_v6 }
 0xfa6   :  { %660 = vrot.lane.b32.xlu2 %v658_v7, %s1263_s4 }
0x1000   :  { %v661_v10 = vpop.permute.xlu2 %660 }
0x1001   :  { %1097 = vmatmul.msk.bf16.vlgmr.msra.gmra.mxu1 %vm95_vm0, %v661_v10 }
0x107e   :  { %v674_v13 = vpop.f32.mrf.mxu1 }
0x107f   :  { %v678_v14 = vadd.f32 %v674_v13, %v657_v12 }
0x1081   :  { %1179 = vtanh.f32 %v678_v14  ;;  %v1098_v22 = vmul.f32 -1.442695, %v678_v14  ;;  %v1121_v14 = vld [vmem:[#allocation4] ss:$0 sm:$0xff] }
0x1083   :  { %1181 = vpow2.f32 %v1098_v22 }
0x1086   :  { %v676_v15 = vpop.f32.mrf.mxu1 }
0x1087   :  { %v1180_v16 = vpop.eup %1179 }
0x1088   :  { %701 = vrot.lane.b32.xlu0 %v1180_v16, %s1260_s22 }
0x1089   :  { %v1182_v23 = vpop.eup %1181 }
0x108a   :  { %v682_v24 = vadd.f32 1.0, %v1182_v23 }
0x108c   :  { %1183 = vrcp.f32 %v682_v24  ;;  %v694_v43 = vand.u32 2147483648, %v682_v24  ;;  %vm688_vm3 = vweird.f32 %v682_v24  ;;  %v692_v45 = vand.u32 2147483647, %v682_v24 }
0x108e   :  { %v695_v29 = vor.u32 1.1754944e-38, %v694_v43  ;;  %vm693_vm7 = vcmp.eq.f32.partialorder %v692_v45, 8.507059e+37 }
0x1090   :  { %719 = vperm.xlu0 %1115, %v717_v18  }
0x1092   :  { %v1184_v25 = vpop.eup %1183 }
0x1093   :  { %v684_v2 = vmul.f32 %v1184_v25, %v682_v24  ;;  %vm689_vm5 = vweird.f32 %v1184_v25 }
0x1094   :  { %vm690_vm6 = vmor %vm688_vm3, %vm689_vm5 }
0x1095   :  { %v685_v26 = vsub.f32 1.0, %v684_v2 }
0x1097   :  { %v686_v27 = vmul.f32 %v1184_v25, %v685_v26 }
0x1098   :  { %349 = vrot.lane.b32.xlu0 %v347_v20, %s1263_s4 }
0x1099   :  { %v687_v28 = vadd.f32 %v1184_v25, %v686_v27 }
0x109b   :  { %v691_v30 = vsel %vm690_vm6, %v1184_v25, %v687_v28  ;;  %v804_v28 = vlaneseq }
0x109c   :  { %v696_v32 = vsel %vm693_vm7, %v695_v29, %v691_v30 }
0x109d   :  { %v805_v29 = vand.u32 127, %v804_v28 }
0x10a0   :  { %574 = vrot.lane.b32.xlu0 %v572_v21, %s1263_s4 }
0x10fa   :  { %v702_v31 = vpop.permute.xlu0 %701 }
0x10fb   :  { %v704_v33 = vmul.f32 %v702_v31, %v696_v32 }
0x10fd   :  { %706 = vrot.lane.b32.xlu1 %v704_v33, %s1263_s4 }
0x1102   :  { %v720_v34 = vpop.permute.xlu0 %719 }
0x1103   :  { %vm721_vm12 = vcmp.eq.s32.totalorder %v720_v34, 1 }
0x1105   :  { %200 = vrot.lane.b32.xlu1 %v1363_v42, %s1263_s4  ;;  %v655_v42 = vsel %vm646_vm2, %v634_v0, %v1466_v61  ;;  %vm865_vm2 = vcmask 60416  }
0x1106   :  { %v699_v39 = vmul.f32 %v696_v32, %v655_v42 }
0x110a   :  { %v350_v35 = vpop.permute.xlu0 %349 }
0x110b   :  { %353 = vst.msk [vmem:[#allocation3 + $0x8] sm:$0xf] %vm203_vm8, %v350_v35 }
0x110d   :  { %424 = vrot.lane.b32.xlu1 %v422_v36, %s1263_s4 }
0x1112   :  { %v575_v8 = vpop.permute.xlu0 %574  ;;  %v1539_v10 = vld [vmem:[#allocation3 + $0x8] sm:$0xf] }
0x1113   :  { %578 = vst.msk [vmem:[#allocation3 + $0x14] sm:$0xf] %vm203_vm8, %v575_v8  ;;  %v743_v12 = vmul.f32 %v1120_v17, %v1539_v10 }
0x1115   :  { %649 = vrot.lane.b32.xlu1 %v647_v38, %s1263_s4  ;;  %v755_v13 = vsel %vm203_vm8, %v743_v12, 0.0 }
0x111a   :  { %v1520_v11 = vld [vmem:[#allocation3 + $0x14] sm:$0xf] }
0x111b   :  { %v746_v56 = vmul.f32 %v1120_v17, %v1520_v11 }
0x111d   :  { %v764_v58 = vsel %vm203_vm8, %v746_v56, 0.0 }
0x116f   :  { %v707_v40 = vpop.permute.xlu1 %706 }
0x1170   :  { %v709_v41 = vadd.f32 %v707_v40, %v699_v39 }
0x1172   :  { %1185 = vtanh.f32 %v709_v41 }
0x1177   :  { %v201_v44 = vpop.permute.xlu1 %200 }
0x1178   :  { %v1186_v46 = vpop.eup %1185  ;;  %204 = vst.msk [vmem:[#allocation3] sm:$0xf] %vm203_vm8, %v201_v44 }
0x1179   :  { %712 = vrot.lane.b32.xlu2 %v1186_v46, %s1260_s22  ;;  %s1044_s22 = sshll.u32 %s1264_s21, 4  ;;  %s1045_s22 = int_to_ptr.vmem [resolvable:$true] %s1044_s22 }
0x117f   :  { %v425_v19 = vpop.permute.xlu1 %424  ;;  %v1502_v47 = vld [vmem:[#allocation3] sm:$0xf] }
0x1180   :  { %428 = vst.msk [vmem:[#allocation3 + $0xc] sm:$0xf] %vm203_vm8, %v425_v19  ;;  %v741_v49 = vmul.f32 %v1120_v17, %v1502_v47 }
0x1181   :  { %274 = vrot.lane.b32.xlu2 %v272_v48, %s1263_s4 }
0x1182   :  { %v749_v50 = vsel %vm203_vm8, %v741_v49, 0.0 }
0x1183   :  { %750 = vadd.xlane.f32.xlu0 %v749_v50 }
0x1187   :  { %v650_v51 = vpop.permute.xlu1 %649  ;;  %v1511_v52 = vld [vmem:[#allocation3 + $0xc] sm:$0xf] }
0x1188   :  { %653 = vst.msk [vmem:[#allocation3 + $0x18] sm:$0xf] %vm203_vm8, %v650_v51  ;;  %v744_v54 = vmul.f32 %v1120_v17, %v1511_v52 }
0x1189   :  { %499 = vrot.lane.b32.xlu2 %v497_v53, %s1263_s4 }
0x118a   :  { %v758_v9 = vsel %vm203_vm8, %v744_v54, 0.0 }
0x118b   :  { %759 = vadd.xlane.f32.xlu0 %v758_v9 }
0x118f   :  { %v1535_v5 = vld [vmem:[#allocation3 + $0x18] sm:$0xf] }
0x1190   :  { %v747_v6 = vmul.f32 %v1120_v17, %v1535_v5 }
0x1192   :  { %v767_v7 = vsel %vm203_vm8, %v747_v6, 0.0 }
0x1193   :  { %765 = vadd.xlane.f32.xlu0 %v764_v58 }
0x11d3   :  { %v713_v59 = vpop.permute.xlu2 %712 }
0x11d4   :  { %v715_v60 = vmul.f32 %v713_v59, %v696_v32 }
0x11d6   :  { %v722_v61 = vsel %vm721_vm12, %v715_v60, 0.0  ;;  %vm1035_vm12 = vcmask 3072  }
0x11d7   :  { %724 = vrot.lane.b32.xlu2 %v722_v61, %s1263_s4 }
0x11db   :  { %v275_v55 = vpop.permute.xlu2 %274 }
0x11dc   :  { %278 = vst.msk [vmem:[#allocation3 + $0x4] sm:$0xf] %vm203_vm8, %v275_v55 }
0x11e3   :  { %v500_v57 = vpop.permute.xlu2 %499  ;;  %v1526_v62 = vld [vmem:[#allocation3 + $0x4] sm:$0xf] }
0x11e4   :  { %503 = vst.msk [vmem:[#allocation3 + $0x10] sm:$0xf] %vm203_vm8, %v500_v57  ;;  %v742_v63 = vmul.f32 %v1120_v17, %v1526_v62 }
0x11e6   :  { %v752_v0 = vsel %vm203_vm8, %v742_v63, 0.0 }
0x11e7   :  { %753 = vadd.xlane.f32.xlu1 %v752_v0 }
0x11eb   :  { %v1531_v1 = vld [vmem:[#allocation3 + $0x10] sm:$0xf] }
0x11ec   :  { %v745_v3 = vmul.f32 %v1120_v17, %v1531_v1 }
0x11ee   :  { %v761_v4 = vsel %vm203_vm8, %v745_v3, 0.0 }
0x11ef   :  { %762 = vadd.xlane.f32.xlu1 %v761_v4 }
0x11f6   :  { %v751_v22 = vpop.xlane.xlu0 %750 }
0x11f7   :  { %768 = vadd.xlane.f32.xlu1 %v767_v7 }
0x11fe   :  { %v760_v26 = vpop.xlane.xlu0 %759 }
0x1200   :  { %756 = vadd.xlane.f32.xlu2 %v755_v13  ;;  %v927_v13 = vshrl.u32 %v804_v28, 7 }
0x1206   :  { %v766_v33 = vpop.xlane.xlu0 %765 }
0x1218   :  { %777 = vperm.xlu2 %1114, %v1121_v14  }
0x1231   :  { %v725_v15 = vpop.permute.xlu2 %724 }
0x1232   :  { %728 = vst.msk [vmem:[#allocation3 + $0x1c] sm:$0xf] %vm203_vm8, %v725_v15 }
0x1239   :  { %v1544_v16 = vld [vmem:[#allocation3 + $0x1c] sm:$0xf] }
0x123a   :  { %v748_v18 = vmul.f32 %v1120_v17, %v1544_v16 }
0x123c   :  { %v770_v20 = vsel %vm203_vm8, %v748_v18, 0.0 }
0x123d   :  { %771 = vadd.xlane.f32.xlu0 %v770_v20 }
0x1251   :  { %862 = vperm.xlu0 %1115, %v1357_v37  }
0x1259   :  { %1117 = vset.pattern.permute.xlu0 %v927_v13 }
0x125a   :  { %v754_v23 = vpop.xlane.xlu1 %753 }
0x1262   :  { %v763_v43 = vpop.xlane.xlu1 %762 }
0x126a   :  { %v769_v8 = vpop.xlane.xlu1 %768 }
0x1273   :  { %v757_v21 = vpop.xlane.xlu2 %756 }
0x127b   :  { %v778_v24 = vpop.permute.xlu2 %777 }
0x127c   :  { %v780_v25 = vadd.f32 %v778_v24, %v751_v22  ;;  %v781_v2 = vadd.f32 %v778_v24, %v754_v23  ;;  %v782_v27 = vadd.f32 %v778_v24, %v757_v21  ;;  %v783_v45 = vadd.f32 %v778_v24, %v760_v26 }
0x127d   :  { %v784_v32 = vadd.f32 %v778_v24, %v763_v43  ;;  %v785_v36 = vadd.f32 %v778_v24, %v766_v33  ;;  %v786_v42 = vadd.f32 %v778_v24, %v769_v8  ;;  %v1006_v8 = vld [vmem:[%s1594_s7 + $0x10] sm:$0xff] }
0x127e   :  { %1187 = vtanh.f32 %v780_v25 }
0x127f   :  { %1189 = vtanh.f32 %v781_v2 }
0x1280   :  { %1191 = vtanh.f32 %v782_v27 }
0x1281   :  { %1193 = vtanh.f32 %v783_v45 }
0x1282   :  { %1195 = vtanh.f32 %v784_v32 }
0x1283   :  { %1197 = vtanh.f32 %v785_v36 }
0x1284   :  { %v1188_v30 = vpop.eup %1187  ;;  %1199 = vtanh.f32 %v786_v42 }
0x1285   :  { %v1190_v31 = vpop.eup %1189  ;;  %v806_v34 = vperm.slane %v1188_v30, %v805_v29 }
0x1286   :  { %v1192_v37 = vpop.eup %1191  ;;  %v807_v35 = vperm.slane %v1190_v31, %v805_v29 }
0x1287   :  { %v808_v38 = vperm.slane %v1192_v37, %v805_v29  ;;  %v1194_v40 = vpop.eup %1193 }
0x1288   :  { %v815_v39 = vsel %vm814_vm10, %v807_v35, %v806_v34  ;;  %v1196_v44 = vpop.eup %1195  ;;  %v809_v17 = vperm.slane %v1194_v40, %v805_v29  ;;  %v1007_v35 = vld [vmem:[%s1594_s7 + $0x18] sm:$0xff] }
0x1289   :  { %v817_v41 = vsel %vm816_vm1, %v808_v38, %v815_v39  ;;  %v1198_v49 = vpop.eup %1197  ;;  %v810_v50 = vperm.slane %v1196_v44, %v805_v29  ;;  %1027 = vmatpush.msra.mxu2 %v1007_v35  ;;  %v1005_v38 = vld [vmem:[%s1594_s7 + $0x8] sm:$0xff]  ;;  %v1004_v39 = vld [vmem:[%s1594_s7] sm:$0xff] }
0x128a   :  { %v819_v48 = vsel %vm818_vm9, %v809_v17, %v817_v41  ;;  %v1200_v53 = vpop.eup %1199  ;;  %v811_v54 = vperm.slane %v1198_v49, %v805_v29 }
0x128b   :  { %v821_v51 = vsel %vm820_vm11, %v810_v50, %v819_v48  ;;  %v812_v58 = vperm.slane %v1200_v53, %v805_v29  ;;  %1028 = vmatpush.msra.mxu2 %v1006_v8 }
0x128c   :  { %v823_v9 = vsel %vm822_vm13, %v811_v54, %v821_v51 }
0x128d   :  { %v825_v60 = vsel %vm824_vm14, %v812_v58, %v823_v9  ;;  %1029 = vmatpush.msra.mxu2 %v1005_v38 }
0x128f   :  { %1030 = vmatpush.msra.mxu2 %v1004_v39 }
0x12b0   :  { %v772_v46 = vpop.xlane.xlu0 %771 }
0x12b1   :  { %v787_v19 = vadd.f32 %v778_v24, %v772_v46 }
0x12b3   :  { %1201 = vtanh.f32 %v787_v19 }
0x12b9   :  { %v1202_v56 = vpop.eup %1201 }
0x12ba   :  { %v813_v59 = vperm.slane %v1202_v56, %v805_v29 }
0x12bc   :  { %v827_v61 = vsel %vm826_vm15, %v813_v59, %v825_v60 }
0x12bd   :  { %829 = vxpose.xlu1.b32.start.end [1/1] (short) (narrow) %v827_v61, 8 }
0x12c3   :  { %v863_v4 = vpop.permute.xlu0 %862 }
0x12c4   :  { %vm864_vm4 = vcmp.lt.s32.totalorder %v805_v29, %v863_v4 }
0x1310   :  { %1116 = vset.pattern.permute.xlu1 %v927_v13 }
0x1361   :  { %v845_v55 = vpop.trf.xlu1 }
0x1362   :  { %v866_v57 = vsel %vm865_vm2, %v845_v55, -inf }
0x1363   :  { %867 = vmax.xlane.f32.xlu2 %v866_v57 }
0x13d6   :  { %v868_v63 = vpop.xlane.xlu2 %867 }
0x13d7   :  { %v869_v0 = vsub.f32 %v845_v55, %v868_v63 }
0x13d9   :  { %v870_v3 = vmul.f32 1.442695, %v869_v0 }
0x13db   :  { %1203 = vpow2.f32 %v870_v3 }
0x13e1   :  { %v1204_v6 = vpop.eup %1203 }
0x13e2   :  { %v872_v7 = vsel %vm864_vm4, %v1204_v6, 0.0 }
0x13e3   :  { %v873_v12 = vsel %vm865_vm2, %v872_v7, 0.0 }
0x13e4   :  { %874 = vadd.xlane.f32.xlu0 %v873_v12 }
0x1457   :  { %v875_v14 = vpop.xlane.xlu0 %874 }
0x1458   :  { %v876_v15 = vmax.f32 %v875_v14, 1e-09 }
0x145a   :  { %1205 = vrcp.f32 %v876_v15  ;;  %v888_v22 = vand.u32 2147483648, %v876_v15  ;;  %v886_v24 = vand.u32 2147483647, %v876_v15  ;;  %vm882_vm3 = vweird.f32 %v876_v15 }
0x145c   :  { %v889_v2 = vor.u32 1.1754944e-38, %v888_v22  ;;  %vm887_vm7 = vcmp.eq.f32.partialorder %v886_v24, 8.507059e+37 }
0x1460   :  { %v1206_v18 = vpop.eup %1205 }
0x1461   :  { %v878_v20 = vmul.f32 %v1206_v18, %v876_v15  ;;  %vm883_vm5 = vweird.f32 %v1206_v18 }
0x1462   :  { %vm884_vm6 = vmor %vm882_vm3, %vm883_vm5 }
0x1463   :  { %v879_v21 = vsub.f32 1.0, %v878_v20 }
0x1465   :  { %v880_v23 = vmul.f32 %v1206_v18, %v879_v21 }
0x1467   :  { %v881_v25 = vadd.f32 %v1206_v18, %v880_v23 }
0x1469   :  { %v885_v26 = vsel %vm884_vm6, %v1206_v18, %v881_v25 }
0x146a   :  { %v890_v27 = vsel %vm887_vm7, %v889_v2, %v885_v26 }
0x146b   :  { %v891_v28 = vmul.f32 %v890_v27, %v872_v7 }
0x146d   :  { %893 = vxpose.xlu2.b32.start.end [1/1] (short) (narrow) %v891_v28, 8  ;;  %892 = vst.msk [vmem:[#allocation9] sm:$0xf] %vm865_vm2, %v891_v28 }
0x146e   :  { %1049 = dma.vmem_to_hbm [thread:$0]  %s1045_s22, 64, %s1047_s20, [#allocation8]  }
0x14cf   :  { %1118 = vset.pattern.permute.xlu2 %v927_v13 }
0x1506   :  { %v909_v43 = vpop.trf.xlu2 }
0x1507   :  { %v939_v45 = vperm.slane %v909_v43, 2  ;;  %v932_v30 = vperm.slane %v909_v43, 1  ;;  %v925_v29 = vperm.slane %v909_v43, 0  ;;  %v946_v31 = vperm.slane %v909_v43, 3 }
0x1508   :  { %v953_v32 = vperm.slane %v909_v43, 4  ;;  %v960_v37 = vperm.slane %v909_v43, 5  ;;  %v967_v33 = vperm.slane %v909_v43, 6  ;;  %v974_v34 = vperm.slane %v909_v43, 7 }
0x1509   :  { %944 = vperm.xlu2 %1118, %v939_v45   ;;  %937 = vperm.xlu0 %1117, %v932_v30  }
0x150a   :  { %930 = vperm.xlu1 %1116, %v925_v29  }
0x1511   :  { %951 = vperm.xlu0 %1117, %v946_v31  }
0x1519   :  { %958 = vperm.xlu0 %1117, %v953_v32  }
0x1521   :  { %965 = vperm.xlu0 %1117, %v960_v37  }
0x1529   :  { %972 = vperm.xlu0 %1117, %v967_v33  }
0x1531   :  { %979 = vperm.xlu0 %1117, %v974_v34  }
0x1563   :  { %v945_v19 = vpop.permute.xlu2 %944 }
0x1564   :  { %v983_v50 = vmul.f32 %v945_v19, %v1539_v10 }
0x1566   :  { %v992_v56 = vsel %vm203_vm8, %v983_v50, 0.0 }
0x157b   :  { %v938_v36 = vpop.permute.xlu0 %937 }
0x157c   :  { %v931_v41 = vpop.permute.xlu1 %930  ;;  %v982_v44 = vmul.f32 %v938_v36, %v1526_v62 }
0x157d   :  { %v981_v46 = vmul.f32 %v931_v41, %v1502_v47 }
0x157e   :  { %v990_v48 = vsel %vm203_vm8, %v982_v44, 0.0 }
0x157f   :  { %v989_v49 = vsel %vm203_vm8, %v981_v46, 0.0 }
0x1580   :  { %v991_v53 = vadd.f32 %v990_v48, %v989_v49 }
0x1582   :  { %v993_v58 = vadd.f32 %v992_v56, %v991_v53 }
0x1583   :  { %v952_v42 = vpop.permute.xlu0 %951 }
0x1584   :  { %v984_v51 = vmul.f32 %v952_v42, %v1511_v52 }
0x1586   :  { %v994_v62 = vsel %vm203_vm8, %v984_v51, 0.0 }
0x1587   :  { %v995_v61 = vadd.f32 %v994_v62, %v993_v58 }
0x158b   :  { %v959_v40 = vpop.permute.xlu0 %958 }
0x158c   :  { %v985_v54 = vmul.f32 %v959_v40, %v1531_v1 }
0x158e   :  { %v996_v59 = vsel %vm203_vm8, %v985_v54, 0.0 }
0x158f   :  { %v997_v55 = vadd.f32 %v996_v59, %v995_v61 }
0x1593   :  { %v966_v17 = vpop.permute.xlu0 %965 }
0x1594   :  { %v986_v47 = vmul.f32 %v966_v17, %v1520_v11  ;;  %v1122_v11 = vld [vmem:[#allocation5] ss:$0 sm:$0xff] }
0x1596   :  { %v998_v10 = vsel %vm203_vm8, %v986_v47, 0.0 }
0x1597   :  { %v999_v57 = vadd.f32 %v998_v10, %v997_v55 }
0x159b   :  { %v973_v9 = vpop.permute.xlu0 %972 }
0x159c   :  { %v987_v60 = vmul.f32 %v973_v9, %v1535_v5 }
0x159e   :  { %v1000_v52 = vsel %vm203_vm8, %v987_v60, 0.0 }
0x159f   :  { %v1001_v0 = vadd.f32 %v1000_v52, %v999_v57 }
0x15a3   :  { %v980_v1 = vpop.permute.xlu0 %979 }
0x15a4   :  { %v988_v63 = vmul.f32 %v980_v1, %v1544_v16 }
0x15a6   :  { %v1002_v3 = vsel %vm203_vm8, %v988_v63, 0.0 }
0x15a7   :  { %v1003_v4 = vadd.f32 %v1002_v3, %v1001_v0 }
0x15a9   :  { %1099 = vmatmul.msk.f32.vlgmr.msra.gmra.mxu2 %vm95_vm0, %v1003_v4 }
0x162c   :  { %v1032_v5 = vpop.f32.mrf.mxu2 }
0x162d   :  { %v1033_v6 = vadd.f32 %v1122_v11, %v1032_v5 }
0x162f   :  { %1036 = vst.msk [vmem:[%s1595_s9] sm:$0xf] %vm1035_vm12, %v1033_v6 }
0x1630   :  { %1257 = dma.done.wait [#allocation8], 64  }
0x1631   :  { %1258 = vsyncadd [#allocation8], 4294967232 }
0x1632   :  { %1056 = vsyncpa [#allocation7], 1 }
0x1633   :  { %1057 = vsyncpa [#allocation8], 1 }

</bundles_post_ra>
